<compile_context>
chip_gen: v6e
topology: v6e:2x2x1
jax: 0.10.0
libtpu: 0.0.40
codegen_flags: <defaults>
</compile_context>

<pallas_src>
import functools

import numpy as np
import jax
import jax.numpy as jnp
from jax.experimental import pallas as pl
from jax.experimental.pallas import tpu as pltpu

HEAD_PAD = 128  # actor logits + 2 critic scalars are packed (zero-padded) to 128 lanes


# ---------------------------------------------------------------------------
# Pallas kernels
# ---------------------------------------------------------------------------
def _conv_gemm_kernel(p_ref, w_ref, b_ref, o_ref):
    # One M-tile of: relu(patches @ w + b).  bf16 inputs, f32 accumulation.
    acc = jnp.dot(p_ref[...], w_ref[...], preferred_element_type=jnp.float32)
    acc = jnp.maximum(acc + b_ref[...], 0.0)
    o_ref[...] = acc.astype(o_ref.dtype)


def _mlp_heads_kernel(x_ref, w1, b1, w2, b2, wa, ba, we, be, wh, bh,
                      pol_ref, val_ref):
    """Fused: fc1 -> fc2 -> {actor hidden, extra_layer} -> residual -> heads."""
    bf16 = jnp.bfloat16
    f32 = jnp.float32
    x = x_ref[...]                                                   # (B, 3136) bf16
    h1 = jnp.dot(x, w1[...], preferred_element_type=f32) + b1[...]
    h1 = jnp.maximum(h1, 0.0).astype(bf16)                           # (B, 256)
    h2 = jnp.dot(h1, w2[...], preferred_element_type=f32) + b2[...]
    h2 = jnp.maximum(h2, 0.0)                                        # (B, 448) f32
    h2b = h2.astype(bf16)
    ha = jnp.dot(h2b, wa[...], preferred_element_type=f32) + ba[...]
    ha = jnp.maximum(ha, 0.0).astype(bf16)                           # actor hidden
    he = jnp.dot(h2b, we[...], preferred_element_type=f32) + be[...]
    he = jnp.maximum(he, 0.0)                                        # extra_layer
    feat = (he + h2).astype(bf16)                                    # extra(x) + x
    # heads weight = [actor_out | critic_ext | critic_int | zero pad]  (448, 128)
    pol_ref[...] = jnp.dot(ha, wh[...], preferred_element_type=f32) + bh[...]
    val_ref[...] = jnp.dot(feat, wh[...], preferred_element_type=f32) + bh[...]


# ---------------------------------------------------------------------------
# Wrappers
# ---------------------------------------------------------------------------
def _choose_bm(m):
    """M-tile size: multiple of 8 (or full M), small enough to shard / fit VMEM."""
    if m <= 256:
        return m
    return min(512, -(-((m + 1) // 2) // 8) * 8)


def conv2d_nhwc(x, w_km, b_row, *, stride, kh, kw):
    """x: (B, H, W, C).  w_km: (kh*kw*C, O) bf16.  b_row: (1, O) f32 -> (B,Ho,Wo,O) bf16."""
    B, H, W, C = x.shape
    K, O = w_km.shape
    Ho = (H - kh) // stride + 1
    Wo = (W - kw) // stride + 1
    # im2col in NHWC: lane-contiguous channel-last slices, column order (i, j, c)
    cols = []
    for i in range(kh):
        for j in range(kw):
            cols.append(x[:, i:i + stride * Ho:stride,
                          j:j + stride * Wo:stride, :])
    p = jnp.concatenate(cols, axis=-1).reshape(B * Ho * Wo, K).astype(jnp.bfloat16)

    M = B * Ho * Wo
    bm = _choose_bm(M)
    y = pl.pallas_call(
        _conv_gemm_kernel,
        out_shape=jax.ShapeDtypeStruct((M, O), jnp.bfloat16),
        grid=(pl.cdiv(M, bm),),
        in_specs=[
            pl.BlockSpec((bm, K), lambda m: (m, 0)),
            pl.BlockSpec((K, O), lambda m: (0, 0)),
            pl.BlockSpec((1, O), lambda m: (0, 0)),
        ],
        out_specs=pl.BlockSpec((bm, O), lambda m: (m, 0)),
        compiler_params=pltpu.CompilerParams(
            dimension_semantics=("parallel",)),
    )(p, w_km, b_row)
    return y.reshape(B, Ho, Wo, O)


def mlp_heads(x, pp):
    """x: (B, 3136) bf16 flattened NHWC conv features -> ((B,128), (B,128)) f32."""
    B = x.shape[0]
    args = (x, pp["fc1_w"], pp["fc1_b"], pp["fc2_w"], pp["fc2_b"],
            pp["a1_w"], pp["a1_b"], pp["e1_w"], pp["e1_b"],
            pp["hd_w"], pp["hd_b"])
    in_specs = [pl.BlockSpec(a.shape, lambda i: (0, 0)) for a in args]
    out_shape = (jax.ShapeDtypeStruct((B, HEAD_PAD), jnp.float32),
                 jax.ShapeDtypeStruct((B, HEAD_PAD), jnp.float32))
    out_specs = (pl.BlockSpec((B, HEAD_PAD), lambda i: (0, 0)),
                 pl.BlockSpec((B, HEAD_PAD), lambda i: (0, 0)))
    return pl.pallas_call(
        _mlp_heads_kernel,
        out_shape=out_shape,
        grid=(1,),
        in_specs=in_specs,
        out_specs=out_specs,
        compiler_params=pltpu.CompilerParams(
            dimension_semantics=("arbitrary",)),
    )(*args)


@functools.partial(jax.jit, static_argnums=(2,))
def cnn_actor_critic_forward(pp, state, output_size):
    """state: (B, 4, 84, 84) NCHW f32 (PyTorch convention)."""
    x = jnp.transpose(state, (0, 2, 3, 1))                      # NCHW -> NHWC (once)
    x = conv2d_nhwc(x, pp["c1_w"], pp["c1_b"], stride=4, kh=8, kw=8)
    x = conv2d_nhwc(x, pp["c2_w"], pp["c2_b"], stride=2, kh=4, kw=4)
    x = conv2d_nhwc(x, pp["c3_w"], pp["c3_b"], stride=1, kh=3, kw=3)
    B = x.shape[0]
    x = x.reshape(B, -1)                                        # (B, 3136) in (H,W,C) order
    pol, val = mlp_heads(x, pp)
    policy = pol[:, :output_size]
    value_ext = val[:, output_size:output_size + 1]
    value_int = val[:, output_size + 1:output_size + 2]
    return policy, value_ext, value_int


# ---------------------------------------------------------------------------
# Deterministic parameter init (orthogonal, PyTorch gains) + one-time re-layout
# ---------------------------------------------------------------------------
def _orthogonal(rng, shape, gain):
    rows = shape[0]
    cols = int(np.prod(shape[1:]))
    a = rng.standard_normal(
        (rows, cols) if rows >= cols else (cols, rows)).astype(np.float32)
    q, r = np.linalg.qr(a)
    q = q * np.sign(np.diag(r))
    if rows < cols:
        q = q.T
    return (gain * q).reshape(shape).astype(np.float32)


def init_torch_params(output_size, seed=0):
    """Parameters in PyTorch layouts (numpy, f32)."""
    rng = np.random.default_rng(seed)
    g2, g001, g01 = float(np.sqrt(2.0)), 0.01, 0.1
    z = lambda n: np.zeros((n,), np.float32)
    return {
        "c1_w": _orthogonal(rng, (32, 4, 8, 8), g2), "c1_b": z(32),
        "c2_w": _orthogonal(rng, (64, 32, 4, 4), g2), "c2_b": z(64),
        "c3_w": _orthogonal(rng, (64, 64, 3, 3), g2), "c3_b": z(64),
        "fc1_w": _orthogonal(rng, (256, 7 * 7 * 64), g2), "fc1_b": z(256),
        "fc2_w": _orthogonal(rng, (448, 256), g2), "fc2_b": z(448),
        "a1_w": _orthogonal(rng, (448, 448), g001), "a1_b": z(448),
        "a2_w": _orthogonal(rng, (output_size, 448), g001), "a2_b": z(output_size),
        "e1_w": _orthogonal(rng, (448, 448), g01), "e1_b": z(448),
        "ce_w": _orthogonal(rng, (1, 448), g001), "ce_b": z(1),
        "ci_w": _orthogonal(rng, (1, 448), g001), "ci_b": z(1),
    }


def prepare_params(tp, output_size):
    """One-time host-side re-layout for the kernels:
       conv weights -> (kh*kw*C, O); linear weights -> (K, N); fc1's K axis
       permuted from PyTorch (C,H,W) flatten order to our NHWC (H,W,C) order;
       the three heads concatenated and zero-padded to 128 lanes.
       Weights stored bf16, biases (1, N) f32."""
    bf = jnp.bfloat16
    f32 = jnp.float32

    def conv_w(w):
        O, C, kh, kw = w.shape
        return jnp.asarray(
            np.transpose(w, (2, 3, 1, 0)).reshape(kh * kw * C, O), bf)

    def row(b):
        return jnp.asarray(np.asarray(b, np.float32).reshape(1, -1), f32)

    fc1 = tp["fc1_w"].reshape(256, 64, 7, 7).transpose(2, 3, 1, 0).reshape(7 * 7 * 64, 256)

    n_heads = output_size + 2
    assert n_heads <= HEAD_PAD
    hd_w = np.zeros((448, HEAD_PAD), np.float32)
    hd_w[:, :output_size] = tp["a2_w"].T
    hd_w[:, output_size:output_size + 1] = tp["ce_w"].T
    hd_w[:, output_size + 1:output_size + 2] = tp["ci_w"].T
    hd_b = np.zeros((1, HEAD_PAD), np.float32)
    hd_b[0, :output_size] = tp["a2_b"]
    hd_b[0, output_size] = tp["ce_b"][0]
    hd_b[0, output_size + 1] = tp["ci_b"][0]

    return {
        "c1_w": conv_w(tp["c1_w"]), "c1_b": row(tp["c1_b"]),
        "c2_w": conv_w(tp["c2_w"]), "c2_b": row(tp["c2_b"]),
        "c3_w": conv_w(tp["c3_w"]), "c3_b": row(tp["c3_b"]),
        "fc1_w": jnp.asarray(fc1, bf), "fc1_b": row(tp["fc1_b"]),
        "fc2_w": jnp.asarray(tp["fc2_w"].T, bf), "fc2_b": row(tp["fc2_b"]),
        "a1_w": jnp.asarray(tp["a1_w"].T, bf), "a1_b": row(tp["a1_b"]),
        "e1_w": jnp.asarray(tp["e1_w"].T, bf), "e1_b": row(tp["e1_b"]),
        "hd_w": jnp.asarray(hd_w, bf), "hd_b": jnp.asarray(hd_b, f32),
    }


# ---------------------------------------------------------------------------
# Pure-JAX f32 reference (independent of the Pallas layouts) for a sanity check
# ---------------------------------------------------------------------------
def reference_forward(tp, state):
    def conv(x, w, b, stride):
        y = jax.lax.conv_general_dilated(
            x, jnp.asarray(w), window_strides=(stride, stride),
            padding="VALID", dimension_numbers=("NCHW", "OIHW", "NCHW"))
        return jax.nn.relu(y + jnp.asarray(b).reshape(1, -1, 1, 1))

    def lin(x, w, b, relu=False):
        y = x @ jnp.asarray(w).T + jnp.asarray(b)
        return jax.nn.relu(y) if relu else y

    x = conv(state, tp["c1_w"], tp["c1_b"], 4)
    x = conv(x, tp["c2_w"], tp["c2_b"], 2)
    x = conv(x, tp["c3_w"], tp["c3_b"], 1)
    x = x.reshape(x.shape[0], -1)                       # PyTorch (C,H,W) flatten
    x = lin(x, tp["fc1_w"], tp["fc1_b"], True)
    x = lin(x, tp["fc2_w"], tp["fc2_b"], True)
    h = lin(x, tp["a1_w"], tp["a1_b"], True)
    policy = lin(h, tp["a2_w"], tp["a2_b"])
    feat = lin(x, tp["e1_w"], tp["e1_b"], True) + x
    return policy, lin(feat, tp["ce_w"], tp["ce_b"]), lin(feat, tp["ci_w"], tp["ci_b"])


# TODO(synk): NoisyLinear (use_noisy_net=True) does stateful in-place noise
# resampling; only the default nn.Linear path is implemented here.

if __name__ == "__main__":
    OUTPUT_SIZE = 18   # e.g. full Atari action space
    BATCH = 2

    tp = init_torch_params(OUTPUT_SIZE, seed=0)
    pp = prepare_params(tp, OUTPUT_SIZE)

    key = jax.random.PRNGKey(0)
    # 84x84 input is required by the module (flatten -> 7*7*64 feeds fc1).
    state = jax.random.uniform(key, (BATCH, 4, 84, 84), dtype=jnp.float32)

    policy, value_ext, value_int = cnn_actor_critic_forward(pp, state, OUTPUT_SIZE)
    jax.block_until_ready((policy, value_ext, value_int))

    assert policy.shape == (BATCH, OUTPUT_SIZE)
    assert value_ext.shape == (BATCH, 1)
    assert value_int.shape == (BATCH, 1)

    # Loose tolerance: kernels use bf16 matmuls with f32 accumulation.
    r_pol, r_ve, r_vi = reference_forward(tp, state)
    np.testing.assert_allclose(np.asarray(policy), np.asarray(r_pol), atol=5e-2, rtol=5e-2)
    np.testing.assert_allclose(np.asarray(value_ext), np.asarray(r_ve), atol=5e-2, rtol=5e-2)
    np.testing.assert_allclose(np.asarray(value_int), np.asarray(r_vi), atol=5e-2, rtol=5e-2)

    print("KERNEL_OK")
</pallas_src>

<mosaic_0001>
module attributes {stable_mosaic.version = 11 : i64} {
  func.func @_conv_gemm_kernel(%arg0: i32, %arg1: memref<400x256xbf16, #tpu.memory_space<vmem>>, %arg2: memref<256x32xbf16, #tpu.memory_space<vmem>>, %arg3: memref<1x32xf32, #tpu.memory_space<vmem>>, %arg4: memref<400x32xbf16, #tpu.memory_space<vmem>>) attributes {dimension_semantics = [#tpu.dimension_semantics<parallel>], iteration_bounds = array<i64: 2>, scalar_prefetch = 0 : i64, scratch_operands = 0 : i64, tpu.core_type = #tpu.core_type<tc>, window_params = [{transform_indices = @transform_0, window_bounds = array<i64: 400, 256>}, {pipeline_mode = #tpu.pipeline_mode<synchronous>, transform_indices = @transform_1, window_bounds = array<i64: 256, 32>}, {pipeline_mode = #tpu.pipeline_mode<synchronous>, transform_indices = @transform_2, window_bounds = array<i64: 1, 32>}, {transform_indices = @transform_3, window_bounds = array<i64: 400, 32>}]} {
    %c0 = arith.constant 0 : index
    %c0_0 = arith.constant 0 : index
    %0 = vector.load %arg1[%c0, %c0_0] : memref<400x256xbf16, #tpu.memory_space<vmem>>, vector<400x256xbf16>
    %c0_1 = arith.constant 0 : index
    %c0_2 = arith.constant 0 : index
    %1 = vector.load %arg2[%c0_1, %c0_2] : memref<256x32xbf16, #tpu.memory_space<vmem>>, vector<256x32xbf16>
    %cst = arith.constant dense<0.000000e+00> : vector<400x32xf32>
    %2 = tpu.matmul %0, %1, %cst {dimension_numbers = #tpu.dot_dimension_numbers<[1], [0], [0], [1], [0, 0, 1, 1], [], []>} : vector<400x256xbf16>, vector<256x32xbf16>, vector<400x32xf32> -> vector<400x32xf32>
    %c0_3 = arith.constant 0 : index
    %c0_4 = arith.constant 0 : index
    %3 = vector.load %arg3[%c0_3, %c0_4] : memref<1x32xf32, #tpu.memory_space<vmem>>, vector<1x32xf32>
    %4 = vector.broadcast %3 : vector<1x32xf32> to vector<400x32xf32>
    %5 = arith.addf %2, %4 : vector<400x32xf32>
    %cst_5 = arith.constant 0.000000e+00 : f32
    %6 = vector.broadcast %cst_5 : f32 to vector<400x32xf32>
    %7 = arith.maximumf %5, %6 : vector<400x32xf32>
    %8 = arith.truncf %7 : vector<400x32xf32> to vector<400x32xbf16>
    %c0_6 = arith.constant 0 : index
    %c0_7 = arith.constant 0 : index
    %9 = vector.load %arg4[%c0_6, %c0_7] : memref<400x32xbf16, #tpu.memory_space<vmem>>, vector<400x32xbf16>
    tpu.vector_store %arg4[%c0_6, %c0_7], %8 {strides = array<i32>} : memref<400x32xbf16, #tpu.memory_space<vmem>>, vector<400x32xbf16>,
    return
  }
  func.func @transform_0(%arg0: i32) -> (i32, i32) {
    %c0_i32 = arith.constant 0 : i32
    %c0_i32_0 = arith.constant 0 : i32
    return %arg0, %c0_i32 : i32, i32
  }
  func.func @transform_1(%arg0: i32) -> (i32, i32) {
    %c0_i32 = arith.constant 0 : i32
    %c0_i32_0 = arith.constant 0 : i32
    %c0_i32_1 = arith.constant 0 : i32
    return %c0_i32, %c0_i32_0 : i32, i32
  }
  func.func @transform_2(%arg0: i32) -> (i32, i32) {
    %c0_i32 = arith.constant 0 : i32
    %c0_i32_0 = arith.constant 0 : i32
    %c0_i32_1 = arith.constant 0 : i32
    return %c0_i32, %c0_i32_0 : i32, i32
  }
  func.func @transform_3(%arg0: i32) -> (i32, i32) {
    %c0_i32 = arith.constant 0 : i32
    %c0_i32_0 = arith.constant 0 : i32
    return %arg0, %c0_i32 : i32, i32
  }
}

module attributes {stable_mosaic.version = 11 : i64} {
  func.func @_conv_gemm_kernel(%arg0: i32, %arg1: memref<162x512xbf16, #tpu.memory_space<vmem>>, %arg2: memref<512x64xbf16, #tpu.memory_space<vmem>>, %arg3: memref<1x64xf32, #tpu.memory_space<vmem>>, %arg4: memref<162x64xbf16, #tpu.memory_space<vmem>>) attributes {dimension_semantics = [#tpu.dimension_semantics<parallel>], iteration_bounds = array<i64: 1>, scalar_prefetch = 0 : i64, scratch_operands = 0 : i64, tpu.core_type = #tpu.core_type<tc>, window_params = [{transform_indices = @transform_0, window_bounds = array<i64: 162, 512>}, {pipeline_mode = #tpu.pipeline_mode<synchronous>, transform_indices = @transform_1, window_bounds = array<i64: 512, 64>}, {pipeline_mode = #tpu.pipeline_mode<synchronous>, transform_indices = @transform_2, window_bounds = array<i64: 1, 64>}, {transform_indices = @transform_3, window_bounds = array<i64: 162, 64>}]} {
    %c0 = arith.constant 0 : index
    %c0_0 = arith.constant 0 : index
    %0 = vector.load %arg1[%c0, %c0_0] : memref<162x512xbf16, #tpu.memory_space<vmem>>, vector<162x512xbf16>
    %c0_1 = arith.constant 0 : index
    %c0_2 = arith.constant 0 : index
    %1 = vector.load %arg2[%c0_1, %c0_2] : memref<512x64xbf16, #tpu.memory_space<vmem>>, vector<512x64xbf16>
    %cst = arith.constant dense<0.000000e+00> : vector<162x64xf32>
    %2 = tpu.matmul %0, %1, %cst {dimension_numbers = #tpu.dot_dimension_numbers<[1], [0], [0], [1], [0, 0, 1, 1], [], []>} : vector<162x512xbf16>, vector<512x64xbf16>, vector<162x64xf32> -> vector<162x64xf32>
    %c0_3 = arith.constant 0 : index
    %c0_4 = arith.constant 0 : index
    %3 = vector.load %arg3[%c0_3, %c0_4] : memref<1x64xf32, #tpu.memory_space<vmem>>, vector<1x64xf32>
    %4 = vector.broadcast %3 : vector<1x64xf32> to vector<162x64xf32>
    %5 = arith.addf %2, %4 : vector<162x64xf32>
    %cst_5 = arith.constant 0.000000e+00 : f32
    %6 = vector.broadcast %cst_5 : f32 to vector<162x64xf32>
    %7 = arith.maximumf %5, %6 : vector<162x64xf32>
    %8 = arith.truncf %7 : vector<162x64xf32> to vector<162x64xbf16>
    %c0_6 = arith.constant 0 : index
    %c0_7 = arith.constant 0 : index
    %9 = vector.load %arg4[%c0_6, %c0_7] : memref<162x64xbf16, #tpu.memory_space<vmem>>, vector<162x64xbf16>
    tpu.vector_store %arg4[%c0_6, %c0_7], %8 {strides = array<i32>} : memref<162x64xbf16, #tpu.memory_space<vmem>>, vector<162x64xbf16>,
    return
  }
  func.func @transform_0(%arg0: i32) -> (i32, i32) {
    %c0_i32 = arith.constant 0 : i32
    %c0_i32_0 = arith.constant 0 : i32
    return %arg0, %c0_i32 : i32, i32
  }
  func.func @transform_1(%arg0: i32) -> (i32, i32) {
    %c0_i32 = arith.constant 0 : i32
    %c0_i32_0 = arith.constant 0 : i32
    %c0_i32_1 = arith.constant 0 : i32
    return %c0_i32, %c0_i32_0 : i32, i32
  }
  func.func @transform_2(%arg0: i32) -> (i32, i32) {
    %c0_i32 = arith.constant 0 : i32
    %c0_i32_0 = arith.constant 0 : i32
    %c0_i32_1 = arith.constant 0 : i32
    return %c0_i32, %c0_i32_0 : i32, i32
  }
  func.func @transform_3(%arg0: i32) -> (i32, i32) {
    %c0_i32 = arith.constant 0 : i32
    %c0_i32_0 = arith.constant 0 : i32
    return %arg0, %c0_i32 : i32, i32
  }
}

module attributes {stable_mosaic.version = 11 : i64} {
  func.func @_conv_gemm_kernel(%arg0: i32, %arg1: memref<98x576xbf16, #tpu.memory_space<vmem>>, %arg2: memref<576x64xbf16, #tpu.memory_space<vmem>>, %arg3: memref<1x64xf32, #tpu.memory_space<vmem>>, %arg4: memref<98x64xbf16, #tpu.memory_space<vmem>>) attributes {dimension_semantics = [#tpu.dimension_semantics<parallel>], iteration_bounds = array<i64: 1>, scalar_prefetch = 0 : i64, scratch_operands = 0 : i64, tpu.core_type = #tpu.core_type<tc>, window_params = [{transform_indices = @transform_0, window_bounds = array<i64: 98, 576>}, {pipeline_mode = #tpu.pipeline_mode<synchronous>, transform_indices = @transform_1, window_bounds = array<i64: 576, 64>}, {pipeline_mode = #tpu.pipeline_mode<synchronous>, transform_indices = @transform_2, window_bounds = array<i64: 1, 64>}, {transform_indices = @transform_3, window_bounds = array<i64: 98, 64>}]} {
    %c0 = arith.constant 0 : index
    %c0_0 = arith.constant 0 : index
    %0 = vector.load %arg1[%c0, %c0_0] : memref<98x576xbf16, #tpu.memory_space<vmem>>, vector<98x576xbf16>
    %c0_1 = arith.constant 0 : index
    %c0_2 = arith.constant 0 : index
    %1 = vector.load %arg2[%c0_1, %c0_2] : memref<576x64xbf16, #tpu.memory_space<vmem>>, vector<576x64xbf16>
    %cst = arith.constant dense<0.000000e+00> : vector<98x64xf32>
    %2 = tpu.matmul %0, %1, %cst {dimension_numbers = #tpu.dot_dimension_numbers<[1], [0], [0], [1], [0, 0, 1, 1], [], []>} : vector<98x576xbf16>, vector<576x64xbf16>, vector<98x64xf32> -> vector<98x64xf32>
    %c0_3 = arith.constant 0 : index
    %c0_4 = arith.constant 0 : index
    %3 = vector.load %arg3[%c0_3, %c0_4] : memref<1x64xf32, #tpu.memory_space<vmem>>, vector<1x64xf32>
    %4 = vector.broadcast %3 : vector<1x64xf32> to vector<98x64xf32>
    %5 = arith.addf %2, %4 : vector<98x64xf32>
    %cst_5 = arith.constant 0.000000e+00 : f32
    %6 = vector.broadcast %cst_5 : f32 to vector<98x64xf32>
    %7 = arith.maximumf %5, %6 : vector<98x64xf32>
    %8 = arith.truncf %7 : vector<98x64xf32> to vector<98x64xbf16>
    %c0_6 = arith.constant 0 : index
    %c0_7 = arith.constant 0 : index
    %9 = vector.load %arg4[%c0_6, %c0_7] : memref<98x64xbf16, #tpu.memory_space<vmem>>, vector<98x64xbf16>
    tpu.vector_store %arg4[%c0_6, %c0_7], %8 {strides = array<i32>} : memref<98x64xbf16, #tpu.memory_space<vmem>>, vector<98x64xbf16>,
    return
  }
  func.func @transform_0(%arg0: i32) -> (i32, i32) {
    %c0_i32 = arith.constant 0 : i32
    %c0_i32_0 = arith.constant 0 : i32
    return %arg0, %c0_i32 : i32, i32
  }
  func.func @transform_1(%arg0: i32) -> (i32, i32) {
    %c0_i32 = arith.constant 0 : i32
    %c0_i32_0 = arith.constant 0 : i32
    %c0_i32_1 = arith.constant 0 : i32
    return %c0_i32, %c0_i32_0 : i32, i32
  }
  func.func @transform_2(%arg0: i32) -> (i32, i32) {
    %c0_i32 = arith.constant 0 : i32
    %c0_i32_0 = arith.constant 0 : i32
    %c0_i32_1 = arith.constant 0 : i32
    return %c0_i32, %c0_i32_0 : i32, i32
  }
  func.func @transform_3(%arg0: i32) -> (i32, i32) {
    %c0_i32 = arith.constant 0 : i32
    %c0_i32_0 = arith.constant 0 : i32
    return %arg0, %c0_i32 : i32, i32
  }
}

module attributes {stable_mosaic.version = 11 : i64} {
  func.func @_mlp_heads_kernel(%arg0: i32, %arg1: memref<2x3136xbf16, #tpu.memory_space<vmem>>, %arg2: memref<3136x256xbf16, #tpu.memory_space<vmem>>, %arg3: memref<1x256xf32, #tpu.memory_space<vmem>>, %arg4: memref<256x448xbf16, #tpu.memory_space<vmem>>, %arg5: memref<1x448xf32, #tpu.memory_space<vmem>>, %arg6: memref<448x448xbf16, #tpu.memory_space<vmem>>, %arg7: memref<1x448xf32, #tpu.memory_space<vmem>>, %arg8: memref<448x448xbf16, #tpu.memory_space<vmem>>, %arg9: memref<1x448xf32, #tpu.memory_space<vmem>>, %arg10: memref<448x128xbf16, #tpu.memory_space<vmem>>, %arg11: memref<1x128xf32, #tpu.memory_space<vmem>>, %arg12: memref<2x128xf32, #tpu.memory_space<vmem>>, %arg13: memref<2x128xf32, #tpu.memory_space<vmem>>) attributes {dimension_semantics = [#tpu.dimension_semantics<arbitrary>], iteration_bounds = array<i64: 1>, scalar_prefetch = 0 : i64, scratch_operands = 0 : i64, tpu.core_type = #tpu.core_type<tc>, window_params = [{pipeline_mode = #tpu.pipeline_mode<synchronous>, transform_indices = @transform_0, window_bounds = array<i64: 2, 3136>}, {pipeline_mode = #tpu.pipeline_mode<synchronous>, transform_indices = @transform_1, window_bounds = array<i64: 3136, 256>}, {pipeline_mode = #tpu.pipeline_mode<synchronous>, transform_indices = @transform_2, window_bounds = array<i64: 1, 256>}, {pipeline_mode = #tpu.pipeline_mode<synchronous>, transform_indices = @transform_3, window_bounds = array<i64: 256, 448>}, {pipeline_mode = #tpu.pipeline_mode<synchronous>, transform_indices = @transform_4, window_bounds = array<i64: 1, 448>}, {pipeline_mode = #tpu.pipeline_mode<synchronous>, transform_indices = @transform_5, window_bounds = array<i64: 448, 448>}, {pipeline_mode = #tpu.pipeline_mode<synchronous>, transform_indices = @transform_6, window_bounds = array<i64: 1, 448>}, {pipeline_mode = #tpu.pipeline_mode<synchronous>, transform_indices = @transform_7, window_bounds = array<i64: 448, 448>}, {pipeline_mode = #tpu.pipeline_mode<synchronous>, transform_indices = @transform_8, window_bounds = array<i64: 1, 448>}, {pipeline_mode = #tpu.pipeline_mode<synchronous>, transform_indices = @transform_9, window_bounds = array<i64: 448, 128>}, {pipeline_mode = #tpu.pipeline_mode<synchronous>, transform_indices = @transform_10, window_bounds = array<i64: 1, 128>}, {pipeline_mode = #tpu.pipeline_mode<synchronous>, transform_indices = @transform_11, window_bounds = array<i64: 2, 128>}, {pipeline_mode = #tpu.pipeline_mode<synchronous>, transform_indices = @transform_12, window_bounds = array<i64: 2, 128>}]} {
    %c0 = arith.constant 0 : index
    %c0_0 = arith.constant 0 : index
    %0 = vector.load %arg1[%c0, %c0_0] : memref<2x3136xbf16, #tpu.memory_space<vmem>>, vector<2x3136xbf16>
    %c0_1 = arith.constant 0 : index
    %c0_2 = arith.constant 0 : index
    %1 = vector.load %arg2[%c0_1, %c0_2] : memref<3136x256xbf16, #tpu.memory_space<vmem>>, vector<3136x256xbf16>
    %cst = arith.constant dense<0.000000e+00> : vector<2x256xf32>
    %2 = tpu.matmul %0, %1, %cst {dimension_numbers = #tpu.dot_dimension_numbers<[1], [0], [0], [1], [0, 0, 1, 1], [], []>} : vector<2x3136xbf16>, vector<3136x256xbf16>, vector<2x256xf32> -> vector<2x256xf32>
    %c0_3 = arith.constant 0 : index
    %c0_4 = arith.constant 0 : index
    %3 = vector.load %arg3[%c0_3, %c0_4] : memref<1x256xf32, #tpu.memory_space<vmem>>, vector<1x256xf32>
    %4 = vector.broadcast %3 : vector<1x256xf32> to vector<2x256xf32>
    %5 = arith.addf %2, %4 : vector<2x256xf32>
    %cst_5 = arith.constant 0.000000e+00 : f32
    %6 = vector.broadcast %cst_5 : f32 to vector<2x256xf32>
    %7 = arith.maximumf %5, %6 : vector<2x256xf32>
    %8 = arith.truncf %7 : vector<2x256xf32> to vector<2x256xbf16>
    %c0_6 = arith.constant 0 : index
    %c0_7 = arith.constant 0 : index
    %9 = vector.load %arg4[%c0_6, %c0_7] : memref<256x448xbf16, #tpu.memory_space<vmem>>, vector<256x448xbf16>
    %cst_8 = arith.constant dense<0.000000e+00> : vector<2x448xf32>
    %10 = tpu.matmul %8, %9, %cst_8 {dimension_numbers = #tpu.dot_dimension_numbers<[1], [0], [0], [1], [0, 0, 1, 1], [], []>} : vector<2x256xbf16>, vector<256x448xbf16>, vector<2x448xf32> -> vector<2x448xf32>
    %c0_9 = arith.constant 0 : index
    %c0_10 = arith.constant 0 : index
    %11 = vector.load %arg5[%c0_9, %c0_10] : memref<1x448xf32, #tpu.memory_space<vmem>>, vector<1x448xf32>
    %12 = vector.broadcast %11 : vector<1x448xf32> to vector<2x448xf32>
    %13 = arith.addf %10, %12 : vector<2x448xf32>
    %cst_11 = arith.constant 0.000000e+00 : f32
    %14 = vector.broadcast %cst_11 : f32 to vector<2x448xf32>
    %15 = arith.maximumf %13, %14 : vector<2x448xf32>
    %16 = arith.truncf %15 : vector<2x448xf32> to vector<2x448xbf16>
    %c0_12 = arith.constant 0 : index
    %c0_13 = arith.constant 0 : index
    %17 = vector.load %arg6[%c0_12, %c0_13] : memref<448x448xbf16, #tpu.memory_space<vmem>>, vector<448x448xbf16>
    %cst_14 = arith.constant dense<0.000000e+00> : vector<2x448xf32>
    %18 = tpu.matmul %16, %17, %cst_14 {dimension_numbers = #tpu.dot_dimension_numbers<[1], [0], [0], [1], [0, 0, 1, 1], [], []>} : vector<2x448xbf16>, vector<448x448xbf16>, vector<2x448xf32> -> vector<2x448xf32>
    %c0_15 = arith.constant 0 : index
    %c0_16 = arith.constant 0 : index
    %19 = vector.load %arg7[%c0_15, %c0_16] : memref<1x448xf32, #tpu.memory_space<vmem>>, vector<1x448xf32>
    %20 = vector.broadcast %19 : vector<1x448xf32> to vector<2x448xf32>
    %21 = arith.addf %18, %20 : vector<2x448xf32>
    %cst_17 = arith.constant 0.000000e+00 : f32
    %22 = vector.broadcast %cst_17 : f32 to vector<2x448xf32>
    %23 = arith.maximumf %21, %22 : vector<2x448xf32>
    %24 = arith.truncf %23 : vector<2x448xf32> to vector<2x448xbf16>
    %c0_18 = arith.constant 0 : index
    %c0_19 = arith.constant 0 : index
    %25 = vector.load %arg8[%c0_18, %c0_19] : memref<448x448xbf16, #tpu.memory_space<vmem>>, vector<448x448xbf16>
    %cst_20 = arith.constant dense<0.000000e+00> : vector<2x448xf32>
    %26 = tpu.matmul %16, %25, %cst_20 {dimension_numbers = #tpu.dot_dimension_numbers<[1], [0], [0], [1], [0, 0, 1, 1], [], []>} : vector<2x448xbf16>, vector<448x448xbf16>, vector<2x448xf32> -> vector<2x448xf32>
    %c0_21 = arith.constant 0 : index
    %c0_22 = arith.constant 0 : index
    %27 = vector.load %arg9[%c0_21, %c0_22] : memref<1x448xf32, #tpu.memory_space<vmem>>, vector<1x448xf32>
    %28 = vector.broadcast %27 : vector<1x448xf32> to vector<2x448xf32>
    %29 = arith.addf %26, %28 : vector<2x448xf32>
    %cst_23 = arith.constant 0.000000e+00 : f32
    %30 = vector.broadcast %cst_23 : f32 to vector<2x448xf32>
    %31 = arith.maximumf %29, %30 : vector<2x448xf32>
    %32 = arith.addf %31, %15 : vector<2x448xf32>
    %33 = arith.truncf %32 : vector<2x448xf32> to vector<2x448xbf16>
    %c0_24 = arith.constant 0 : index
    %c0_25 = arith.constant 0 : index
    %34 = vector.load %arg10[%c0_24, %c0_25] : memref<448x128xbf16, #tpu.memory_space<vmem>>, vector<448x128xbf16>
    %cst_26 = arith.constant dense<0.000000e+00> : vector<2x128xf32>
    %35 = tpu.matmul %24, %34, %cst_26 {dimension_numbers = #tpu.dot_dimension_numbers<[1], [0], [0], [1], [0, 0, 1, 1], [], []>} : vector<2x448xbf16>, vector<448x128xbf16>, vector<2x128xf32> -> vector<2x128xf32>
    %c0_27 = arith.constant 0 : index
    %c0_28 = arith.constant 0 : index
    %36 = vector.load %arg11[%c0_27, %c0_28] : memref<1x128xf32, #tpu.memory_space<vmem>>, vector<1x128xf32>
    %37 = vector.broadcast %36 : vector<1x128xf32> to vector<2x128xf32>
    %38 = arith.addf %35, %37 : vector<2x128xf32>
    %c0_29 = arith.constant 0 : index
    %c0_30 = arith.constant 0 : index
    %39 = vector.load %arg12[%c0_29, %c0_30] : memref<2x128xf32, #tpu.memory_space<vmem>>, vector<2x128xf32>
    tpu.vector_store %arg12[%c0_29, %c0_30], %38 {strides = array<i32>} : memref<2x128xf32, #tpu.memory_space<vmem>>, vector<2x128xf32>,
    %c0_31 = arith.constant 0 : index
    %c0_32 = arith.constant 0 : index
    %40 = vector.load %arg10[%c0_31, %c0_32] : memref<448x128xbf16, #tpu.memory_space<vmem>>, vector<448x128xbf16>
    %cst_33 = arith.constant dense<0.000000e+00> : vector<2x128xf32>
    %41 = tpu.matmul %33, %40, %cst_33 {dimension_numbers = #tpu.dot_dimension_numbers<[1], [0], [0], [1], [0, 0, 1, 1], [], []>} : vector<2x448xbf16>, vector<448x128xbf16>, vector<2x128xf32> -> vector<2x128xf32>
    %c0_34 = arith.constant 0 : index
    %c0_35 = arith.constant 0 : index
    %42 = vector.load %arg11[%c0_34, %c0_35] : memref<1x128xf32, #tpu.memory_space<vmem>>, vector<1x128xf32>
    %43 = vector.broadcast %42 : vector<1x128xf32> to vector<2x128xf32>
    %44 = arith.addf %41, %43 : vector<2x128xf32>
    %c0_36 = arith.constant 0 : index
    %c0_37 = arith.constant 0 : index
    %45 = vector.load %arg13[%c0_36, %c0_37] : memref<2x128xf32, #tpu.memory_space<vmem>>, vector<2x128xf32>
    tpu.vector_store %arg13[%c0_36, %c0_37], %44 {strides = array<i32>} : memref<2x128xf32, #tpu.memory_space<vmem>>, vector<2x128xf32>,
    return
  }
  func.func @transform_0(%arg0: i32) -> (i32, i32) {
    %c0_i32 = arith.constant 0 : i32
    %c0_i32_0 = arith.constant 0 : i32
    %c0_i32_1 = arith.constant 0 : i32
    return %c0_i32, %c0_i32_0 : i32, i32
  }
  func.func @transform_1(%arg0: i32) -> (i32, i32) {
    %c0_i32 = arith.constant 0 : i32
    %c0_i32_0 = arith.constant 0 : i32
    %c0_i32_1 = arith.constant 0 : i32
    return %c0_i32, %c0_i32_0 : i32, i32
  }
  func.func @transform_2(%arg0: i32) -> (i32, i32) {
    %c0_i32 = arith.constant 0 : i32
    %c0_i32_0 = arith.constant 0 : i32
    %c0_i32_1 = arith.constant 0 : i32
    return %c0_i32, %c0_i32_0 : i32, i32
  }
  func.func @transform_3(%arg0: i32) -> (i32, i32) {
    %c0_i32 = arith.constant 0 : i32
    %c0_i32_0 = arith.constant 0 : i32
    %c0_i32_1 = arith.constant 0 : i32
    return %c0_i32, %c0_i32_0 : i32, i32
  }
  func.func @transform_4(%arg0: i32) -> (i32, i32) {
    %c0_i32 = arith.constant 0 : i32
    %c0_i32_0 = arith.constant 0 : i32
    %c0_i32_1 = arith.constant 0 : i32
    return %c0_i32, %c0_i32_0 : i32, i32
  }
  func.func @transform_5(%arg0: i32) -> (i32, i32) {
    %c0_i32 = arith.constant 0 : i32
    %c0_i32_0 = arith.constant 0 : i32
    %c0_i32_1 = arith.constant 0 : i32
    return %c0_i32, %c0_i32_0 : i32, i32
  }
  func.func @transform_6(%arg0: i32) -> (i32, i32) {
    %c0_i32 = arith.constant 0 : i32
    %c0_i32_0 = arith.constant 0 : i32
    %c0_i32_1 = arith.constant 0 : i32
    return %c0_i32, %c0_i32_0 : i32, i32
  }
  func.func @transform_7(%arg0: i32) -> (i32, i32) {
    %c0_i32 = arith.constant 0 : i32
    %c0_i32_0 = arith.constant 0 : i32
    %c0_i32_1 = arith.constant 0 : i32
    return %c0_i32, %c0_i32_0 : i32, i32
  }
  func.func @transform_8(%arg0: i32) -> (i32, i32) {
    %c0_i32 = arith.constant 0 : i32
    %c0_i32_0 = arith.constant 0 : i32
    %c0_i32_1 = arith.constant 0 : i32
    return %c0_i32, %c0_i32_0 : i32, i32
  }
  func.func @transform_9(%arg0: i32) -> (i32, i32) {
    %c0_i32 = arith.constant 0 : i32
    %c0_i32_0 = arith.constant 0 : i32
    %c0_i32_1 = arith.constant 0 : i32
    return %c0_i32, %c0_i32_0 : i32, i32
  }
  func.func @transform_10(%arg0: i32) -> (i32, i32) {
    %c0_i32 = arith.constant 0 : i32
    %c0_i32_0 = arith.constant 0 : i32
    %c0_i32_1 = arith.constant 0 : i32
    return %c0_i32, %c0_i32_0 : i32, i32
  }
  func.func @transform_11(%arg0: i32) -> (i32, i32) {
    %c0_i32 = arith.constant 0 : i32
    %c0_i32_0 = arith.constant 0 : i32
    %c0_i32_1 = arith.constant 0 : i32
    return %c0_i32, %c0_i32_0 : i32, i32
  }
  func.func @transform_12(%arg0: i32) -> (i32, i32) {
    %c0_i32 = arith.constant 0 : i32
    %c0_i32_0 = arith.constant 0 : i32
    %c0_i32_1 = arith.constant 0 : i32
    return %c0_i32, %c0_i32_0 : i32, i32
  }
}

</mosaic_0001>

<bundles_post_ra>
// kernel: cnn_actor_critic_forward.4
= control target key start
LH: loop header
LB: loop body
LE: loop exit
PB: predicated region body
PF: predicated region fallthrough
CT: control target
= control target key end

     0   :  { %s1542_s12 = smov 0   ;;  %s1852_s0 = inlined_call_operand.vmem [shape: bf16[800,256], index: 0, kind: input, shape index: {}]   ;;  %s1853_s1 = inlined_call_operand.vmem [shape: bf16[256,32], index: 1, kind: input, shape index: {}]   ;;  %s1854_s2 = inlined_call_operand.vmem [shape: f32[1,32], index: 2, kind: input, shape index: {}]   ;;  %s1855_s3 = inlined_call_operand.vmem [shape: bf16[800,32], index: 3, kind: output, shape index: {}]  }
   0x1 LB: > { %s1203_s13 = sadd.s32 4294967295, %s1519_s12   ;;  %p1207_p0 = scmp.ge.s32.totalorder %s1519_s12, 1  ;;  %s1519_s12 = sphi %s1542_s12, %s13_s12  }
   0x2   : > { %p139_p1 = scmp.lt.s32.totalorder %s1519_s12, 3 }
   0x4   : > { %p140_p2 = pnand %p1207_p0, %p139_p1 }
   0x5   : > { %s164_s16 = smul.u32 (!%p140_p2), 50, %s1203_s13 }
   0x6   : > { %143 = sbr.rel (%p140_p2) target bundleno = 376 (0x178), region = 32 }
   0x7   : > { %p165_p3 = scmp.lt.s32.totalorder (!%p140_p2), %s164_s16, 99 }
   0xb   : > { %v1422_v0 = vld [vmem:[%s1853_s1 + $0x38] sm:$0xff]   ;;  %v1521_v1 = vmov 0   ;;  %v1423_v2 = vld [vmem:[%s1853_s1 + $0x30] sm:$0xff]   ;;  %v1424_v3 = vld [vmem:[%s1853_s1 + $0x28] sm:$0xff]   ;;  %s1857_s16 = smov (!%p165_p3, %s164_s16), 99  ;;  %vm1096_vm0 = vcmask 257024  }
   0xc   : > { %613 = vmatprep.subr.bf16.mxu0 %v1521_v1  ;;  %1381 = vmatprep.subr.bf16.mxu1 %v1521_v1  ;;  %v1425_v4 = vld [vmem:[%s1853_s1 + $0x20] sm:$0xff]   ;;  %s1330_s23 = sshll.u32 %s1857_s16, 3  ;;  %v1426_v5 = vld [vmem:[%s1853_s1 + $0x18] sm:$0xff]   ;;  %v1427_v7 = vld [vmem:[%s1853_s1 + $0x10] sm:$0xff]   ;;  %s1210_s29 = sshll.u32 %s1857_s16, 2 }
   0xd   : > { %614 = vmatpush1.bf16.msra.mxu0 %v1422_v0  ;;  %1397 = vmatpush1.bf16.msra.mxu1 %v1422_v0  ;;  %s1579_s28 = scalar_lea.vmem %s1852_s0, %s1330_s23  ;;  %v1428_v9 = vld [vmem:[%s1853_s1 + $0x8] sm:$0xff]   ;;  %v1429_v10 = vld [vmem:[%s1853_s1] sm:$0xff]   ;;  %v1430_v11 = vld [vmem:[%s1853_s1 + $0x78] sm:$0xff]  }
   0xe   : > { %615 = vmatprep.subr.bf16.mxu0 %v1521_v1  ;;  %1382 = vmatprep.subr.bf16.mxu1 %v1521_v1  ;;  %v1440_v6 = vld [vmem:[%s1579_s28 + $0x4] ss:$8 sps:$4 sm:$0xff]   ;;  %v1443_v8 = vld [vmem:[%s1579_s28 + $0xd4] ss:$8 sps:$4 sm:$0xff]   ;;  %v1438_v19 = vld [vmem:[%s1579_s28] ss:$8 sps:$4 sm:$0xff]  }
   0xf   : > { %645 = vmatprep.mubr.bf16.mxu0 %v1440_v6  ;;  %749 = vmatprep.mubr.bf16.mxu1 %v1443_v8  ;;  %v1431_v12 = vld [vmem:[%s1853_s1 + $0x70] sm:$0xff]   ;;  %v1432_v13 = vld [vmem:[%s1853_s1 + $0x68] sm:$0xff]   ;;  %v1433_v14 = vld [vmem:[%s1853_s1 + $0x60] sm:$0xff]  }
  0x10   : > { %v1434_v15 = vld [vmem:[%s1853_s1 + $0x58] sm:$0xff]   ;;  %v1435_v16 = vld [vmem:[%s1853_s1 + $0x50] sm:$0xff]   ;;  %v1436_v17 = vld [vmem:[%s1853_s1 + $0x48] sm:$0xff]  }
  0x11   : > { %616 = vmatpush1.bf16.msra.mxu0 %v1423_v2  ;;  %1398 = vmatpush1.bf16.msra.mxu1 %v1423_v2  ;;  %v1437_v18 = vld [vmem:[%s1853_s1 + $0x40] sm:$0xff]   ;;  %v1441_v20 = vld [vmem:[%s1579_s28 + $0xd0] ss:$8 sps:$4 sm:$0xff]   ;;  %v1444_v21 = vld [vmem:[%s1579_s28 + $0x14] ss:$8 sps:$4 sm:$0xff]  }
  0x12   : > { %617 = vmatprep.subr.bf16.mxu0 %v1521_v1  ;;  %1383 = vmatprep.subr.bf16.mxu1 %v1521_v1  ;;  %v1447_v22 = vld [vmem:[%s1579_s28 + $0xe4] ss:$8 sps:$4 sm:$0xff]   ;;  %v1446_v23 = vld [vmem:[%s1579_s28 + $0x10] ss:$8 sps:$4 sm:$0xff]   ;;  %v1449_v24 = vld [vmem:[%s1579_s28 + $0xe0] ss:$8 sps:$4 sm:$0xff]  }
  0x13   : > { %v1450_v25 = vld [vmem:[%s1579_s28 + $0x24] ss:$8 sps:$4 sm:$0xff]   ;;  %v1453_v26 = vld [vmem:[%s1579_s28 + $0xf4] ss:$8 sps:$4 sm:$0xff]   ;;  %v1452_v27 = vld [vmem:[%s1579_s28 + $0x20] ss:$8 sps:$4 sm:$0xff]  }
  0x14   : > { %v1455_v28 = vld [vmem:[%s1579_s28 + $0xf0] ss:$8 sps:$4 sm:$0xff]   ;;  %v1456_v29 = vld [vmem:[%s1579_s28 + $0x34] ss:$8 sps:$4 sm:$0xff]   ;;  %v1459_v30 = vld [vmem:[%s1579_s28 + $0x104] ss:$8 sps:$4 sm:$0xff]  }
  0x15   : > { %618 = vmatpush1.bf16.msra.mxu0 %v1424_v3  ;;  %1399 = vmatpush1.bf16.msra.mxu1 %v1424_v3  ;;  %v1458_v31 = vld [vmem:[%s1579_s28 + $0x30] ss:$8 sps:$4 sm:$0xff]   ;;  %v1461_v32 = vld [vmem:[%s1579_s28 + $0x100] ss:$8 sps:$4 sm:$0xff]   ;;  %v1462_v33 = vld [vmem:[%s1579_s28 + $0x44] ss:$8 sps:$4 sm:$0xff]  }
  0x16   : > { %619 = vmatprep.subr.bf16.mxu0 %v1521_v1  ;;  %1384 = vmatprep.subr.bf16.mxu1 %v1521_v1  ;;  %v1465_v34 = vld [vmem:[%s1579_s28 + $0x114] ss:$8 sps:$4 sm:$0xff]   ;;  %v1464_v35 = vld [vmem:[%s1579_s28 + $0x40] ss:$8 sps:$4 sm:$0xff]   ;;  %v1467_v36 = vld [vmem:[%s1579_s28 + $0x110] ss:$8 sps:$4 sm:$0xff]  }
  0x17   : > { %v1468_v37 = vld [vmem:[%s1579_s28 + $0x54] ss:$8 sps:$4 sm:$0xff]   ;;  %v1471_v38 = vld [vmem:[%s1579_s28 + $0x124] ss:$8 sps:$4 sm:$0xff]   ;;  %v1470_v39 = vld [vmem:[%s1579_s28 + $0x50] ss:$8 sps:$4 sm:$0xff]  }
  0x18   : > { %v1473_v40 = vld [vmem:[%s1579_s28 + $0x120] ss:$8 sps:$4 sm:$0xff]   ;;  %v1474_v41 = vld [vmem:[%s1579_s28 + $0x64] ss:$8 sps:$4 sm:$0xff]   ;;  %v1477_v42 = vld [vmem:[%s1579_s28 + $0x134] ss:$8 sps:$4 sm:$0xff]  }
  0x19   : > { %620 = vmatpush1.bf16.msra.mxu0 %v1425_v4  ;;  %1400 = vmatpush1.bf16.msra.mxu1 %v1425_v4  ;;  %v1476_v43 = vld [vmem:[%s1579_s28 + $0x60] ss:$8 sps:$4 sm:$0xff]   ;;  %v1479_v44 = vld [vmem:[%s1579_s28 + $0x130] ss:$8 sps:$4 sm:$0xff]   ;;  %v1480_v45 = vld [vmem:[%s1579_s28 + $0x74] ss:$8 sps:$4 sm:$0xff]  }
  0x1a   : > { %621 = vmatprep.subr.bf16.mxu0 %v1521_v1  ;;  %1385 = vmatprep.subr.bf16.mxu1 %v1521_v1  ;;  %v1483_v46 = vld [vmem:[%s1579_s28 + $0x144] ss:$8 sps:$4 sm:$0xff]   ;;  %v1482_v47 = vld [vmem:[%s1579_s28 + $0x70] ss:$8 sps:$4 sm:$0xff]   ;;  %v1485_v48 = vld [vmem:[%s1579_s28 + $0x140] ss:$8 sps:$4 sm:$0xff]  }
  0x1b   : > { %v1486_v49 = vld [vmem:[%s1579_s28 + $0x84] ss:$8 sps:$4 sm:$0xff]   ;;  %v1489_v50 = vld [vmem:[%s1579_s28 + $0x154] ss:$8 sps:$4 sm:$0xff]   ;;  %v1488_v51 = vld [vmem:[%s1579_s28 + $0x80] ss:$8 sps:$4 sm:$0xff]  }
  0x1c   : > { %v1491_v52 = vld [vmem:[%s1579_s28 + $0x150] ss:$8 sps:$4 sm:$0xff]   ;;  %v1492_v53 = vld [vmem:[%s1579_s28 + $0x94] ss:$8 sps:$4 sm:$0xff]   ;;  %v1495_v54 = vld [vmem:[%s1579_s28 + $0x164] ss:$8 sps:$4 sm:$0xff]  }
  0x1d   : > { %622 = vmatpush1.bf16.msra.mxu0 %v1426_v5  ;;  %1401 = vmatpush1.bf16.msra.mxu1 %v1426_v5  ;;  %v1494_v55 = vld [vmem:[%s1579_s28 + $0x90] ss:$8 sps:$4 sm:$0xff]   ;;  %v1497_v56 = vld [vmem:[%s1579_s28 + $0x160] ss:$8 sps:$4 sm:$0xff]   ;;  %v1498_v57 = vld [vmem:[%s1579_s28 + $0xa4] ss:$8 sps:$4 sm:$0xff]  }
  0x1e   : > { %623 = vmatprep.subr.bf16.mxu0 %v1521_v1  ;;  %1386 = vmatprep.subr.bf16.mxu1 %v1521_v1  ;;  %v1501_v58 = vld [vmem:[%s1579_s28 + $0x174] ss:$8 sps:$4 sm:$0xff]   ;;  %v1500_v59 = vld [vmem:[%s1579_s28 + $0xa0] ss:$8 sps:$4 sm:$0xff]   ;;  %v1503_v60 = vld [vmem:[%s1579_s28 + $0x170] ss:$8 sps:$4 sm:$0xff]  }
  0x1f   : > { %v1504_v61 = vld [vmem:[%s1579_s28 + $0xb4] ss:$8 sps:$4 sm:$0xff]   ;;  %v1507_v62 = vld [vmem:[%s1579_s28 + $0x184] ss:$8 sps:$4 sm:$0xff]   ;;  %v1506_v63 = vld [vmem:[%s1579_s28 + $0xb0] ss:$8 sps:$4 sm:$0xff]  }
  0x20   : > { %v1509_v0 = vld [vmem:[%s1579_s28 + $0x180] ss:$8 sps:$4 sm:$0xff]  }
  0x21   : > { %624 = vmatpush1.bf16.msra.mxu0 %v1427_v7  ;;  %1402 = vmatpush1.bf16.msra.mxu1 %v1427_v7  ;;  %v1512_v2 = vld [vmem:[%s1579_s28 + $0xc0] ss:$8 sps:$4 sm:$0xff]  }
  0x22   : > { %625 = vmatprep.subr.bf16.mxu0 %v1521_v1  ;;  %1387 = vmatprep.subr.bf16.mxu1 %v1521_v1  ;;  %v1691_v3 = vld [vmem:[%s1854_s2] ss:$0 sm:$0xff] }
  0x25   : > { %626 = vmatpush1.bf16.msra.mxu0 %v1428_v9  ;;  %1403 = vmatpush1.bf16.msra.mxu1 %v1428_v9 }
  0x26   : > { %627 = vmatprep.subr.bf16.mxu0 %v1521_v1  ;;  %1388 = vmatprep.subr.bf16.mxu1 %v1521_v1 }
  0x29   : > { %628 = vmatpush1.bf16.msra.mxu0 %v1429_v10  ;;  %1404 = vmatpush1.bf16.msra.mxu1 %v1429_v10 }
  0x2a   : > { %629 = vmatprep.subr.bf16.mxu0 %v1521_v1  ;;  %1389 = vmatprep.subr.bf16.mxu1 %v1521_v1 }
  0x2d   : > { %630 = vmatpush2.bf16.msra.mxu0 %v1430_v11  ;;  %1405 = vmatpush2.bf16.msra.mxu1 %v1430_v11 }
  0x2e   : > { %631 = vmatprep.subr.bf16.mxu0 %v1521_v1  ;;  %1390 = vmatprep.subr.bf16.mxu1 %v1521_v1 }
  0x31   : > { %632 = vmatpush2.bf16.msra.mxu0 %v1431_v12  ;;  %1406 = vmatpush2.bf16.msra.mxu1 %v1431_v12 }
  0x32   : > { %633 = vmatprep.subr.bf16.mxu0 %v1521_v1  ;;  %1391 = vmatprep.subr.bf16.mxu1 %v1521_v1 }
  0x35   : > { %634 = vmatpush2.bf16.msra.mxu0 %v1432_v13  ;;  %1407 = vmatpush2.bf16.msra.mxu1 %v1432_v13 }
  0x36   : > { %635 = vmatprep.subr.bf16.mxu0 %v1521_v1  ;;  %1392 = vmatprep.subr.bf16.mxu1 %v1521_v1 }
  0x39   : > { %636 = vmatpush2.bf16.msra.mxu0 %v1433_v14  ;;  %1408 = vmatpush2.bf16.msra.mxu1 %v1433_v14 }
  0x3a   : > { %637 = vmatprep.subr.bf16.mxu0 %v1521_v1  ;;  %1393 = vmatprep.subr.bf16.mxu1 %v1521_v1 }
  0x3d   : > { %638 = vmatpush2.bf16.msra.mxu0 %v1434_v15  ;;  %1409 = vmatpush2.bf16.msra.mxu1 %v1434_v15 }
  0x3e   : > { %639 = vmatprep.subr.bf16.mxu0 %v1521_v1  ;;  %1394 = vmatprep.subr.bf16.mxu1 %v1521_v1 }
  0x41   : > { %640 = vmatpush2.bf16.msra.mxu0 %v1435_v16  ;;  %1410 = vmatpush2.bf16.msra.mxu1 %v1435_v16 }
  0x42   : > { %641 = vmatprep.subr.bf16.mxu0 %v1521_v1  ;;  %1395 = vmatprep.subr.bf16.mxu1 %v1521_v1 }
  0x45   : > { %642 = vmatpush2.bf16.msra.mxu0 %v1436_v17  ;;  %1411 = vmatpush2.bf16.msra.mxu1 %v1436_v17 }
  0x46   : > { %643 = vmatprep.subr.bf16.mxu0 %v1521_v1  ;;  %1396 = vmatprep.subr.bf16.mxu1 %v1521_v1  ;;  %v1510_v1 = vld [vmem:[%s1579_s28 + $0xc4] ss:$8 sps:$4 sm:$0xff]   ;;  %s1699_s28 = scalar_lea.vmem %s1855_s3, %s1210_s29 }
  0x49   : > { %644 = vmatpush2.bf16.msra.mxu0 %v1437_v18  ;;  %1412 = vmatpush2.bf16.msra.mxu1 %v1437_v18 }
  0x4c   : > { %646 = vmatmul.mubr.bf16.vlgmr.msra.gmra.mxu0 %v1438_v19  ;;  %750 = vmatmul.mubr.bf16.vlgmr.msra.gmra.mxu1 %v1441_v20 }
  0x4d   : > { %653 = vmatprep.mubr.bf16.mxu0 %v1444_v21  ;;  %757 = vmatprep.mubr.bf16.mxu1 %v1447_v22 }
  0x54   : > { %654 = vmatmul.mubr.bf16.gmra.mxu0 %v1446_v23  ;;  %758 = vmatmul.mubr.bf16.gmra.mxu1 %v1449_v24 }
  0x55   : > { %661 = vmatprep.mubr.bf16.mxu0 %v1450_v25  ;;  %765 = vmatprep.mubr.bf16.mxu1 %v1453_v26 }
  0x5c   : > { %662 = vmatmul.mubr.bf16.gmra.mxu0 %v1452_v27  ;;  %766 = vmatmul.mubr.bf16.gmra.mxu1 %v1455_v28 }
  0x5d   : > { %669 = vmatprep.mubr.bf16.mxu0 %v1456_v29  ;;  %773 = vmatprep.mubr.bf16.mxu1 %v1459_v30 }
  0x64   : > { %670 = vmatmul.mubr.bf16.gmra.mxu0 %v1458_v31  ;;  %774 = vmatmul.mubr.bf16.gmra.mxu1 %v1461_v32 }
  0x65   : > { %677 = vmatprep.mubr.bf16.mxu0 %v1462_v33  ;;  %781 = vmatprep.mubr.bf16.mxu1 %v1465_v34 }
  0x6c   : > { %678 = vmatmul.mubr.bf16.gmra.mxu0 %v1464_v35  ;;  %782 = vmatmul.mubr.bf16.gmra.mxu1 %v1467_v36 }
  0x6d   : > { %685 = vmatprep.mubr.bf16.mxu0 %v1468_v37  ;;  %789 = vmatprep.mubr.bf16.mxu1 %v1471_v38 }
  0x74   : > { %686 = vmatmul.mubr.bf16.gmra.mxu0 %v1470_v39  ;;  %790 = vmatmul.mubr.bf16.gmra.mxu1 %v1473_v40 }
  0x75   : > { %693 = vmatprep.mubr.bf16.mxu0 %v1474_v41  ;;  %797 = vmatprep.mubr.bf16.mxu1 %v1477_v42 }
  0x7c   : > { %694 = vmatmul.mubr.bf16.gmra.mxu0 %v1476_v43  ;;  %798 = vmatmul.mubr.bf16.gmra.mxu1 %v1479_v44 }
  0x7d   : > { %701 = vmatprep.mubr.bf16.mxu0 %v1480_v45  ;;  %805 = vmatprep.mubr.bf16.mxu1 %v1483_v46 }
  0x84   : > { %702 = vmatmul.mubr.bf16.gmra.mxu0 %v1482_v47  ;;  %806 = vmatmul.mubr.bf16.gmra.mxu1 %v1485_v48 }
  0x85   : > { %709 = vmatprep.mubr.bf16.mxu0 %v1486_v49  ;;  %813 = vmatprep.mubr.bf16.mxu1 %v1489_v50 }
  0x8c   : > { %710 = vmatmul.mubr.bf16.gmra.mxu0 %v1488_v51  ;;  %814 = vmatmul.mubr.bf16.gmra.mxu1 %v1491_v52 }
  0x8d   : > { %717 = vmatprep.mubr.bf16.mxu0 %v1492_v53  ;;  %821 = vmatprep.mubr.bf16.mxu1 %v1495_v54 }
  0x94   : > { %718 = vmatmul.mubr.bf16.gmra.mxu0 %v1494_v55  ;;  %822 = vmatmul.mubr.bf16.gmra.mxu1 %v1497_v56 }
  0x95   : > { %725 = vmatprep.mubr.bf16.mxu0 %v1498_v57  ;;  %829 = vmatprep.mubr.bf16.mxu1 %v1501_v58 }
  0x9c   : > { %726 = vmatmul.mubr.bf16.gmra.mxu0 %v1500_v59  ;;  %830 = vmatmul.mubr.bf16.gmra.mxu1 %v1503_v60 }
  0x9d   : > { %733 = vmatprep.mubr.bf16.mxu0 %v1504_v61  ;;  %837 = vmatprep.mubr.bf16.mxu1 %v1507_v62 }
  0xa4   : > { %734 = vmatmul.mubr.bf16.gmra.mxu0 %v1506_v63  ;;  %838 = vmatmul.mubr.bf16.gmra.mxu1 %v1509_v0 }
  0xa5   : > { %741 = vmatprep.mubr.bf16.mxu0 %v1510_v1 }
  0xac   : > { %742 = vmatmul.mubr.bf16.gmra.mxu0 %v1512_v2 }
 0x10c   : > { %v647_v4 = vpop.f32.mrf.mxu0  ;;  %v751_v5 = vpop.f32.mrf.mxu1 }
 0x10d   : > { %v648_v6 = vadd.f32 %v1691_v3, %v647_v4  ;;  %v752_v7 = vadd.f32 %v1691_v3, %v751_v5 }
 0x10e   : > { %v649_v8 = vpop.f32.mrf.mxu0  ;;  %v753_v9 = vpop.f32.mrf.mxu1 }
 0x10f   : > { %v846_v10 = vmax.f32 %v648_v6, 0.0  ;;  %v872_v11 = vmax.f32 %v752_v7, 0.0 }
 0x110   : > { %v650_v12 = vpop.f32.mrf.mxu0  ;;  %v754_v13 = vpop.f32.mrf.mxu1 }
 0x111   : > { %v1331_v14 = vpack.c.bf16 %v846_v10, %v846_v10  ;;  %v1357_v15 = vpack.c.bf16 %v872_v11, %v872_v11  ;;  %v651_v16 = vadd.f32 %v1691_v3, %v650_v12  ;;  %v755_v17 = vadd.f32 %v1691_v3, %v754_v13 }
 0x112   : > { %v652_v18 = vpop.f32.mrf.mxu0  ;;  %v756_v19 = vpop.f32.mrf.mxu1 }
 0x113   : > { %1097 = vst.msk [vmem:[%s1699_s28] sm:$0xf] %vm1096_vm0, %v1331_v14  ;;  %1123 = vst.msk [vmem:[%s1699_s28 + $0x68] sm:$0xf] %vm1096_vm0, %v1357_v15  ;;  %v847_v20 = vmax.f32 %v651_v16, 0.0  ;;  %v873_v21 = vmax.f32 %v755_v17, 0.0 }
 0x114   : > { %v655_v22 = vpop.f32.mrf.mxu0  ;;  %v759_v23 = vpop.f32.mrf.mxu1 }
 0x115   : > { %v1332_v24 = vpack.c.bf16 %v847_v20, %v847_v20  ;;  %v1358_v25 = vpack.c.bf16 %v873_v21, %v873_v21  ;;  %v656_v26 = vadd.f32 %v1691_v3, %v655_v22  ;;  %v760_v27 = vadd.f32 %v1691_v3, %v759_v23 }
 0x116   : > { %v657_v28 = vpop.f32.mrf.mxu0  ;;  %v761_v29 = vpop.f32.mrf.mxu1 }
 0x117   : > { %1098 = vst.msk [vmem:[%s1699_s28 + $0x4] sm:$0xf] %vm1096_vm0, %v1332_v24  ;;  %1124 = vst.msk [vmem:[%s1699_s28 + $0x6c] sm:$0xf] %vm1096_vm0, %v1358_v25  ;;  %v848_v30 = vmax.f32 %v656_v26, 0.0  ;;  %v874_v31 = vmax.f32 %v760_v27, 0.0 }
 0x118   : > { %v658_v32 = vpop.f32.mrf.mxu0  ;;  %v762_v33 = vpop.f32.mrf.mxu1 }
 0x119   : > { %v1333_v34 = vpack.c.bf16 %v848_v30, %v848_v30  ;;  %v1359_v35 = vpack.c.bf16 %v874_v31, %v874_v31  ;;  %v659_v36 = vadd.f32 %v1691_v3, %v658_v32  ;;  %v763_v37 = vadd.f32 %v1691_v3, %v762_v33 }
 0x11a   : > { %v660_v38 = vpop.f32.mrf.mxu0  ;;  %v764_v39 = vpop.f32.mrf.mxu1 }
 0x11b   : > { %1099 = vst.msk [vmem:[%s1699_s28 + $0x8] sm:$0xf] %vm1096_vm0, %v1333_v34  ;;  %1125 = vst.msk [vmem:[%s1699_s28 + $0x70] sm:$0xf] %vm1096_vm0, %v1359_v35  ;;  %v849_v40 = vmax.f32 %v659_v36, 0.0  ;;  %v875_v41 = vmax.f32 %v763_v37, 0.0 }
 0x11c   : > { %v663_v42 = vpop.f32.mrf.mxu0  ;;  %v767_v43 = vpop.f32.mrf.mxu1 }
 0x11d   : > { %v1334_v44 = vpack.c.bf16 %v849_v40, %v849_v40  ;;  %v1360_v45 = vpack.c.bf16 %v875_v41, %v875_v41  ;;  %v664_v46 = vadd.f32 %v1691_v3, %v663_v42  ;;  %v768_v47 = vadd.f32 %v1691_v3, %v767_v43 }
 0x11e   : > { %v665_v48 = vpop.f32.mrf.mxu0  ;;  %v769_v49 = vpop.f32.mrf.mxu1 }
 0x11f   : > { %1100 = vst.msk [vmem:[%s1699_s28 + $0xc] sm:$0xf] %vm1096_vm0, %v1334_v44  ;;  %1126 = vst.msk [vmem:[%s1699_s28 + $0x74] sm:$0xf] %vm1096_vm0, %v1360_v45  ;;  %v850_v50 = vmax.f32 %v664_v46, 0.0  ;;  %v876_v51 = vmax.f32 %v768_v47, 0.0 }
 0x120   : > { %v666_v52 = vpop.f32.mrf.mxu0  ;;  %v770_v53 = vpop.f32.mrf.mxu1 }
 0x121   : > { %v1335_v54 = vpack.c.bf16 %v850_v50, %v850_v50  ;;  %v1361_v55 = vpack.c.bf16 %v876_v51, %v876_v51  ;;  %v667_v56 = vadd.f32 %v1691_v3, %v666_v52  ;;  %v771_v57 = vadd.f32 %v1691_v3, %v770_v53 }
 0x122   : > { %v668_v58 = vpop.f32.mrf.mxu0  ;;  %v772_v59 = vpop.f32.mrf.mxu1 }
 0x123   : > { %1101 = vst.msk [vmem:[%s1699_s28 + $0x10] sm:$0xf] %vm1096_vm0, %v1335_v54  ;;  %1127 = vst.msk [vmem:[%s1699_s28 + $0x78] sm:$0xf] %vm1096_vm0, %v1361_v55  ;;  %v851_v60 = vmax.f32 %v667_v56, 0.0  ;;  %v877_v61 = vmax.f32 %v771_v57, 0.0 }
 0x124   : > { %v671_v62 = vpop.f32.mrf.mxu0  ;;  %v775_v63 = vpop.f32.mrf.mxu1 }
 0x125   : > { %v1336_v0 = vpack.c.bf16 %v851_v60, %v851_v60  ;;  %v1362_v1 = vpack.c.bf16 %v877_v61, %v877_v61  ;;  %v672_v2 = vadd.f32 %v1691_v3, %v671_v62  ;;  %v776_v4 = vadd.f32 %v1691_v3, %v775_v63 }
 0x126   : > { %v673_v5 = vpop.f32.mrf.mxu0  ;;  %v777_v6 = vpop.f32.mrf.mxu1 }
 0x127   : > { %1102 = vst.msk [vmem:[%s1699_s28 + $0x14] sm:$0xf] %vm1096_vm0, %v1336_v0  ;;  %1128 = vst.msk [vmem:[%s1699_s28 + $0x7c] sm:$0xf] %vm1096_vm0, %v1362_v1  ;;  %v852_v7 = vmax.f32 %v672_v2, 0.0  ;;  %v878_v8 = vmax.f32 %v776_v4, 0.0 }
 0x128   : > { %v674_v9 = vpop.f32.mrf.mxu0  ;;  %v778_v10 = vpop.f32.mrf.mxu1 }
 0x129   : > { %v1337_v11 = vpack.c.bf16 %v852_v7, %v852_v7  ;;  %v1363_v12 = vpack.c.bf16 %v878_v8, %v878_v8  ;;  %v675_v13 = vadd.f32 %v1691_v3, %v674_v9  ;;  %v779_v14 = vadd.f32 %v1691_v3, %v778_v10 }
 0x12a   : > { %v676_v15 = vpop.f32.mrf.mxu0  ;;  %v780_v16 = vpop.f32.mrf.mxu1 }
 0x12b   : > { %1103 = vst.msk [vmem:[%s1699_s28 + $0x18] sm:$0xf] %vm1096_vm0, %v1337_v11  ;;  %1129 = vst.msk [vmem:[%s1699_s28 + $0x80] sm:$0xf] %vm1096_vm0, %v1363_v12  ;;  %v853_v17 = vmax.f32 %v675_v13, 0.0  ;;  %v879_v18 = vmax.f32 %v779_v14, 0.0 }
 0x12c   : > { %v679_v19 = vpop.f32.mrf.mxu0  ;;  %v783_v20 = vpop.f32.mrf.mxu1 }
 0x12d   : > { %v1338_v21 = vpack.c.bf16 %v853_v17, %v853_v17  ;;  %v1364_v22 = vpack.c.bf16 %v879_v18, %v879_v18  ;;  %v680_v23 = vadd.f32 %v1691_v3, %v679_v19  ;;  %v784_v24 = vadd.f32 %v1691_v3, %v783_v20 }
 0x12e   : > { %v681_v25 = vpop.f32.mrf.mxu0  ;;  %v785_v26 = vpop.f32.mrf.mxu1 }
 0x12f   : > { %1104 = vst.msk [vmem:[%s1699_s28 + $0x1c] sm:$0xf] %vm1096_vm0, %v1338_v21  ;;  %1130 = vst.msk [vmem:[%s1699_s28 + $0x84] sm:$0xf] %vm1096_vm0, %v1364_v22  ;;  %v854_v27 = vmax.f32 %v680_v23, 0.0  ;;  %v880_v28 = vmax.f32 %v784_v24, 0.0 }
 0x130   : > { %v682_v29 = vpop.f32.mrf.mxu0  ;;  %v786_v30 = vpop.f32.mrf.mxu1 }
 0x131   : > { %v1339_v31 = vpack.c.bf16 %v854_v27, %v854_v27  ;;  %v1365_v32 = vpack.c.bf16 %v880_v28, %v880_v28  ;;  %v683_v33 = vadd.f32 %v1691_v3, %v682_v29  ;;  %v787_v34 = vadd.f32 %v1691_v3, %v786_v30 }
 0x132   : > { %v684_v35 = vpop.f32.mrf.mxu0  ;;  %v788_v36 = vpop.f32.mrf.mxu1 }
 0x133   : > { %1105 = vst.msk [vmem:[%s1699_s28 + $0x20] sm:$0xf] %vm1096_vm0, %v1339_v31  ;;  %1131 = vst.msk [vmem:[%s1699_s28 + $0x88] sm:$0xf] %vm1096_vm0, %v1365_v32  ;;  %v855_v37 = vmax.f32 %v683_v33, 0.0  ;;  %v881_v38 = vmax.f32 %v787_v34, 0.0 }
 0x134   : > { %v687_v39 = vpop.f32.mrf.mxu0  ;;  %v791_v40 = vpop.f32.mrf.mxu1 }
 0x135   : > { %v1340_v41 = vpack.c.bf16 %v855_v37, %v855_v37  ;;  %v1366_v42 = vpack.c.bf16 %v881_v38, %v881_v38  ;;  %v688_v43 = vadd.f32 %v1691_v3, %v687_v39  ;;  %v792_v44 = vadd.f32 %v1691_v3, %v791_v40 }
 0x136   : > { %v689_v45 = vpop.f32.mrf.mxu0  ;;  %v793_v46 = vpop.f32.mrf.mxu1 }
 0x137   : > { %1106 = vst.msk [vmem:[%s1699_s28 + $0x24] sm:$0xf] %vm1096_vm0, %v1340_v41  ;;  %1132 = vst.msk [vmem:[%s1699_s28 + $0x8c] sm:$0xf] %vm1096_vm0, %v1366_v42  ;;  %v856_v47 = vmax.f32 %v688_v43, 0.0  ;;  %v882_v48 = vmax.f32 %v792_v44, 0.0 }
 0x138   : > { %v690_v49 = vpop.f32.mrf.mxu0  ;;  %v794_v50 = vpop.f32.mrf.mxu1 }
 0x139   : > { %v1341_v51 = vpack.c.bf16 %v856_v47, %v856_v47  ;;  %v1367_v52 = vpack.c.bf16 %v882_v48, %v882_v48  ;;  %v691_v53 = vadd.f32 %v1691_v3, %v690_v49  ;;  %v795_v54 = vadd.f32 %v1691_v3, %v794_v50 }
 0x13a   : > { %v692_v55 = vpop.f32.mrf.mxu0  ;;  %v796_v56 = vpop.f32.mrf.mxu1 }
 0x13b   : > { %1107 = vst.msk [vmem:[%s1699_s28 + $0x28] sm:$0xf] %vm1096_vm0, %v1341_v51  ;;  %1133 = vst.msk [vmem:[%s1699_s28 + $0x90] sm:$0xf] %vm1096_vm0, %v1367_v52  ;;  %v857_v57 = vmax.f32 %v691_v53, 0.0  ;;  %v883_v58 = vmax.f32 %v795_v54, 0.0 }
 0x13c   : > { %v695_v59 = vpop.f32.mrf.mxu0  ;;  %v799_v60 = vpop.f32.mrf.mxu1 }
 0x13d   : > { %v1342_v61 = vpack.c.bf16 %v857_v57, %v857_v57  ;;  %v1368_v62 = vpack.c.bf16 %v883_v58, %v883_v58  ;;  %v696_v63 = vadd.f32 %v1691_v3, %v695_v59  ;;  %v800_v0 = vadd.f32 %v1691_v3, %v799_v60 }
 0x13e   : > { %v697_v1 = vpop.f32.mrf.mxu0  ;;  %v801_v2 = vpop.f32.mrf.mxu1 }
 0x13f   : > { %1108 = vst.msk [vmem:[%s1699_s28 + $0x2c] sm:$0xf] %vm1096_vm0, %v1342_v61  ;;  %1134 = vst.msk [vmem:[%s1699_s28 + $0x94] sm:$0xf] %vm1096_vm0, %v1368_v62  ;;  %v858_v4 = vmax.f32 %v696_v63, 0.0  ;;  %v884_v5 = vmax.f32 %v800_v0, 0.0 }
 0x140   : > { %v698_v6 = vpop.f32.mrf.mxu0  ;;  %v802_v7 = vpop.f32.mrf.mxu1 }
 0x141   : > { %v1343_v8 = vpack.c.bf16 %v858_v4, %v858_v4  ;;  %v1369_v9 = vpack.c.bf16 %v884_v5, %v884_v5  ;;  %v699_v10 = vadd.f32 %v1691_v3, %v698_v6  ;;  %v803_v11 = vadd.f32 %v1691_v3, %v802_v7 }
 0x142   : > { %v700_v12 = vpop.f32.mrf.mxu0  ;;  %v804_v13 = vpop.f32.mrf.mxu1 }
 0x143   : > { %1109 = vst.msk [vmem:[%s1699_s28 + $0x30] sm:$0xf] %vm1096_vm0, %v1343_v8  ;;  %1135 = vst.msk [vmem:[%s1699_s28 + $0x98] sm:$0xf] %vm1096_vm0, %v1369_v9  ;;  %v859_v14 = vmax.f32 %v699_v10, 0.0  ;;  %v885_v15 = vmax.f32 %v803_v11, 0.0 }
 0x144   : > { %v703_v16 = vpop.f32.mrf.mxu0  ;;  %v807_v17 = vpop.f32.mrf.mxu1 }
 0x145   : > { %v1344_v18 = vpack.c.bf16 %v859_v14, %v859_v14  ;;  %v1370_v19 = vpack.c.bf16 %v885_v15, %v885_v15  ;;  %v704_v20 = vadd.f32 %v1691_v3, %v703_v16  ;;  %v808_v21 = vadd.f32 %v1691_v3, %v807_v17 }
 0x146   : > { %v705_v22 = vpop.f32.mrf.mxu0  ;;  %v809_v23 = vpop.f32.mrf.mxu1 }
 0x147   : > { %1110 = vst.msk [vmem:[%s1699_s28 + $0x34] sm:$0xf] %vm1096_vm0, %v1344_v18  ;;  %1136 = vst.msk [vmem:[%s1699_s28 + $0x9c] sm:$0xf] %vm1096_vm0, %v1370_v19  ;;  %v860_v24 = vmax.f32 %v704_v20, 0.0  ;;  %v886_v25 = vmax.f32 %v808_v21, 0.0 }
 0x148   : > { %v706_v26 = vpop.f32.mrf.mxu0  ;;  %v810_v27 = vpop.f32.mrf.mxu1 }
 0x149   : > { %v1345_v28 = vpack.c.bf16 %v860_v24, %v860_v24  ;;  %v1371_v29 = vpack.c.bf16 %v886_v25, %v886_v25  ;;  %v707_v30 = vadd.f32 %v1691_v3, %v706_v26  ;;  %v811_v31 = vadd.f32 %v1691_v3, %v810_v27 }
 0x14a   : > { %v708_v32 = vpop.f32.mrf.mxu0  ;;  %v812_v33 = vpop.f32.mrf.mxu1 }
 0x14b   : > { %1111 = vst.msk [vmem:[%s1699_s28 + $0x38] sm:$0xf] %vm1096_vm0, %v1345_v28  ;;  %1137 = vst.msk [vmem:[%s1699_s28 + $0xa0] sm:$0xf] %vm1096_vm0, %v1371_v29  ;;  %v861_v34 = vmax.f32 %v707_v30, 0.0  ;;  %v887_v35 = vmax.f32 %v811_v31, 0.0 }
 0x14c   : > { %v711_v36 = vpop.f32.mrf.mxu0  ;;  %v815_v37 = vpop.f32.mrf.mxu1 }
 0x14d   : > { %v1346_v38 = vpack.c.bf16 %v861_v34, %v861_v34  ;;  %v1372_v39 = vpack.c.bf16 %v887_v35, %v887_v35  ;;  %v712_v40 = vadd.f32 %v1691_v3, %v711_v36  ;;  %v816_v41 = vadd.f32 %v1691_v3, %v815_v37 }
 0x14e   : > { %v713_v42 = vpop.f32.mrf.mxu0  ;;  %v817_v43 = vpop.f32.mrf.mxu1 }
 0x14f   : > { %1112 = vst.msk [vmem:[%s1699_s28 + $0x3c] sm:$0xf] %vm1096_vm0, %v1346_v38  ;;  %1138 = vst.msk [vmem:[%s1699_s28 + $0xa4] sm:$0xf] %vm1096_vm0, %v1372_v39  ;;  %v862_v44 = vmax.f32 %v712_v40, 0.0  ;;  %v888_v45 = vmax.f32 %v816_v41, 0.0 }
 0x150   : > { %v714_v46 = vpop.f32.mrf.mxu0  ;;  %v818_v47 = vpop.f32.mrf.mxu1 }
 0x151   : > { %v1347_v48 = vpack.c.bf16 %v862_v44, %v862_v44  ;;  %v1373_v49 = vpack.c.bf16 %v888_v45, %v888_v45  ;;  %v715_v50 = vadd.f32 %v1691_v3, %v714_v46  ;;  %v819_v51 = vadd.f32 %v1691_v3, %v818_v47 }
 0x152   : > { %v716_v52 = vpop.f32.mrf.mxu0  ;;  %v820_v53 = vpop.f32.mrf.mxu1 }
 0x153   : > { %1113 = vst.msk [vmem:[%s1699_s28 + $0x40] sm:$0xf] %vm1096_vm0, %v1347_v48  ;;  %1139 = vst.msk [vmem:[%s1699_s28 + $0xa8] sm:$0xf] %vm1096_vm0, %v1373_v49  ;;  %v863_v54 = vmax.f32 %v715_v50, 0.0  ;;  %v889_v55 = vmax.f32 %v819_v51, 0.0 }
 0x154   : > { %v719_v56 = vpop.f32.mrf.mxu0  ;;  %v823_v57 = vpop.f32.mrf.mxu1 }
 0x155   : > { %v1348_v58 = vpack.c.bf16 %v863_v54, %v863_v54  ;;  %v1374_v59 = vpack.c.bf16 %v889_v55, %v889_v55  ;;  %v720_v60 = vadd.f32 %v1691_v3, %v719_v56  ;;  %v824_v61 = vadd.f32 %v1691_v3, %v823_v57 }
 0x156   : > { %v721_v62 = vpop.f32.mrf.mxu0  ;;  %v825_v63 = vpop.f32.mrf.mxu1 }
 0x157   : > { %1114 = vst.msk [vmem:[%s1699_s28 + $0x44] sm:$0xf] %vm1096_vm0, %v1348_v58  ;;  %1140 = vst.msk [vmem:[%s1699_s28 + $0xac] sm:$0xf] %vm1096_vm0, %v1374_v59  ;;  %v864_v0 = vmax.f32 %v720_v60, 0.0  ;;  %v890_v1 = vmax.f32 %v824_v61, 0.0 }
 0x158   : > { %v722_v2 = vpop.f32.mrf.mxu0  ;;  %v826_v4 = vpop.f32.mrf.mxu1 }
 0x159   : > { %v1349_v5 = vpack.c.bf16 %v864_v0, %v864_v0  ;;  %v1375_v6 = vpack.c.bf16 %v890_v1, %v890_v1  ;;  %v723_v7 = vadd.f32 %v1691_v3, %v722_v2  ;;  %v827_v8 = vadd.f32 %v1691_v3, %v826_v4 }
 0x15a   : > { %v724_v9 = vpop.f32.mrf.mxu0  ;;  %v828_v10 = vpop.f32.mrf.mxu1 }
 0x15b   : > { %1115 = vst.msk [vmem:[%s1699_s28 + $0x48] sm:$0xf] %vm1096_vm0, %v1349_v5  ;;  %1141 = vst.msk [vmem:[%s1699_s28 + $0xb0] sm:$0xf] %vm1096_vm0, %v1375_v6  ;;  %v865_v11 = vmax.f32 %v723_v7, 0.0  ;;  %v891_v12 = vmax.f32 %v827_v8, 0.0 }
 0x15c   : > { %v727_v13 = vpop.f32.mrf.mxu0  ;;  %v831_v14 = vpop.f32.mrf.mxu1 }
 0x15d   : > { %v1350_v15 = vpack.c.bf16 %v865_v11, %v865_v11  ;;  %v1376_v16 = vpack.c.bf16 %v891_v12, %v891_v12  ;;  %v728_v17 = vadd.f32 %v1691_v3, %v727_v13  ;;  %v832_v18 = vadd.f32 %v1691_v3, %v831_v14 }
 0x15e   : > { %v729_v19 = vpop.f32.mrf.mxu0  ;;  %v833_v20 = vpop.f32.mrf.mxu1 }
 0x15f   : > { %1116 = vst.msk [vmem:[%s1699_s28 + $0x4c] sm:$0xf] %vm1096_vm0, %v1350_v15  ;;  %1142 = vst.msk [vmem:[%s1699_s28 + $0xb4] sm:$0xf] %vm1096_vm0, %v1376_v16  ;;  %v866_v21 = vmax.f32 %v728_v17, 0.0  ;;  %v892_v22 = vmax.f32 %v832_v18, 0.0 }
 0x160   : > { %v730_v23 = vpop.f32.mrf.mxu0  ;;  %v834_v24 = vpop.f32.mrf.mxu1 }
 0x161   : > { %v1351_v25 = vpack.c.bf16 %v866_v21, %v866_v21  ;;  %v1377_v26 = vpack.c.bf16 %v892_v22, %v892_v22  ;;  %v731_v27 = vadd.f32 %v1691_v3, %v730_v23  ;;  %v835_v28 = vadd.f32 %v1691_v3, %v834_v24 }
 0x162   : > { %v732_v29 = vpop.f32.mrf.mxu0  ;;  %v836_v30 = vpop.f32.mrf.mxu1 }
 0x163   : > { %1117 = vst.msk [vmem:[%s1699_s28 + $0x50] sm:$0xf] %vm1096_vm0, %v1351_v25  ;;  %1143 = vst.msk [vmem:[%s1699_s28 + $0xb8] sm:$0xf] %vm1096_vm0, %v1377_v26  ;;  %v867_v31 = vmax.f32 %v731_v27, 0.0  ;;  %v893_v32 = vmax.f32 %v835_v28, 0.0 }
 0x164   : > { %v735_v33 = vpop.f32.mrf.mxu0  ;;  %v839_v34 = vpop.f32.mrf.mxu1 }
 0x165   : > { %v1352_v35 = vpack.c.bf16 %v867_v31, %v867_v31  ;;  %v1378_v36 = vpack.c.bf16 %v893_v32, %v893_v32  ;;  %v736_v37 = vadd.f32 %v1691_v3, %v735_v33  ;;  %v840_v38 = vadd.f32 %v1691_v3, %v839_v34 }
 0x166   : > { %v737_v39 = vpop.f32.mrf.mxu0  ;;  %v841_v40 = vpop.f32.mrf.mxu1 }
 0x167   : > { %1118 = vst.msk [vmem:[%s1699_s28 + $0x54] sm:$0xf] %vm1096_vm0, %v1352_v35  ;;  %1144 = vst.msk [vmem:[%s1699_s28 + $0xbc] sm:$0xf] %vm1096_vm0, %v1378_v36  ;;  %v868_v41 = vmax.f32 %v736_v37, 0.0  ;;  %v894_v42 = vmax.f32 %v840_v38, 0.0 }
 0x168   : > { %v738_v43 = vpop.f32.mrf.mxu0  ;;  %v842_v44 = vpop.f32.mrf.mxu1 }
 0x169   : > { %v1353_v45 = vpack.c.bf16 %v868_v41, %v868_v41  ;;  %v1379_v46 = vpack.c.bf16 %v894_v42, %v894_v42  ;;  %v739_v47 = vadd.f32 %v1691_v3, %v738_v43  ;;  %v843_v48 = vadd.f32 %v1691_v3, %v842_v44 }
 0x16a   : > { %v740_v49 = vpop.f32.mrf.mxu0  ;;  %v844_v50 = vpop.f32.mrf.mxu1 }
 0x16b   : > { %1119 = vst.msk [vmem:[%s1699_s28 + $0x58] sm:$0xf] %vm1096_vm0, %v1353_v45  ;;  %1145 = vst.msk [vmem:[%s1699_s28 + $0xc0] sm:$0xf] %vm1096_vm0, %v1379_v46  ;;  %v869_v51 = vmax.f32 %v739_v47, 0.0  ;;  %v895_v52 = vmax.f32 %v843_v48, 0.0 }
 0x16c   : > { %v743_v53 = vpop.f32.mrf.mxu0 }
 0x16d   : > { %v1354_v54 = vpack.c.bf16 %v869_v51, %v869_v51  ;;  %v1380_v55 = vpack.c.bf16 %v895_v52, %v895_v52  ;;  %v744_v56 = vadd.f32 %v1691_v3, %v743_v53 }
 0x16e   : > { %v745_v57 = vpop.f32.mrf.mxu0 }
 0x16f   : > { %1120 = vst.msk [vmem:[%s1699_s28 + $0x5c] sm:$0xf] %vm1096_vm0, %v1354_v54  ;;  %1146 = vst.msk [vmem:[%s1699_s28 + $0xc4] sm:$0xf] %vm1096_vm0, %v1380_v55  ;;  %v870_v58 = vmax.f32 %v744_v56, 0.0 }
 0x170   : > { %v746_v59 = vpop.f32.mrf.mxu0 }
 0x171   : > { %v1355_v60 = vpack.c.bf16 %v870_v58, %v870_v58  ;;  %v747_v61 = vadd.f32 %v1691_v3, %v746_v59 }
 0x172   : > { %v748_v62 = vpop.f32.mrf.mxu0 }
 0x173   : > { %1121 = vst.msk [vmem:[%s1699_s28 + $0x60] sm:$0xf] %vm1096_vm0, %v1355_v60  ;;  %v871_v63 = vmax.f32 %v747_v61, 0.0 }
 0x175   : > { %v1356_v0 = vpack.c.bf16 %v871_v63, %v871_v63 }
 0x177   : > { %1122 = vst.msk [vmem:[%s1699_s28 + $0x64] sm:$0xf] %vm1096_vm0, %v1356_v0 }
 0x178 PF: > { %s13_s12 = sadd.s32 1, %s1519_s12  }
 0x179   : > { %p10_p4 = scmp.ge.s32.totalorder %s13_s12, 4  }
 0x17b   :  { %12 = sbr.rel (!%p10_p4) target bundleno = 1 (0x1), region = 62 }

// kernel: cnn_actor_critic_forward.5
= control target key start
LH: loop header
LB: loop body
LE: loop exit
PB: predicated region body
PF: predicated region fallthrough
CT: control target
= control target key end

     0   :  { %vm880_vm0 = vcmask 519168   ;;  %vm901_vm1 = vcmask 516096   ;;  %s1637_s1 = inlined_call_operand.vmem [shape: bf16[512,64], index: 1, kind: input, shape index: {}]   ;;  %s1638_s0 = inlined_call_operand.vmem [shape: bf16[162,512], index: 0, kind: input, shape index: {}]   ;;  %s1639_s2 = inlined_call_operand.vmem [shape: f32[1,64], index: 2, kind: input, shape index: {}]   ;;  %s1640_s3 = inlined_call_operand.vmem [shape: bf16[162,64], index: 3, kind: output, shape index: {}]  }
   0x1   :  { %v1190_v0 = vld [vmem:[%s1637_s1 + $0x78] sm:$0xff]   ;;  %v1194_v4 = vld [vmem:[%s1637_s1 + $0x70] sm:$0xff]   ;;  %v1198_v8 = vld [vmem:[%s1637_s1 + $0x68] sm:$0xff]  }
   0x2   :  { %v1191_v1 = vld [vmem:[%s1637_s1 + $0xf8] sm:$0xff]   ;;  %1026 = vmatprep.subr.bf16.mxu0 %v1190_v0  ;;  %v1195_v5 = vld [vmem:[%s1637_s1 + $0xf0] sm:$0xff]   ;;  %v1199_v9 = vld [vmem:[%s1637_s1 + $0xe8] sm:$0xff]  }
   0x3   :  { %v1192_v2 = vld [vmem:[%s1637_s1 + $0x38] sm:$0xff]   ;;  %1108 = vmatprep.subr.bf16.mxu1 %v1191_v1  ;;  %v1196_v6 = vld [vmem:[%s1637_s1 + $0x30] sm:$0xff]   ;;  %v1200_v10 = vld [vmem:[%s1637_s1 + $0x28] sm:$0xff]  }
   0x4   :  { %v1193_v3 = vld [vmem:[%s1637_s1 + $0xb8] sm:$0xff]   ;;  %1027 = vmatpush3.bf16.msra.mxu0 %v1192_v2  ;;  %v1197_v7 = vld [vmem:[%s1637_s1 + $0xb0] sm:$0xff]   ;;  %v1201_v11 = vld [vmem:[%s1637_s1 + $0xa8] sm:$0xff]  }
   0x5   :  { %1109 = vmatpush3.bf16.msra.mxu1 %v1193_v3  ;;  %1028 = vmatprep.subr.bf16.mxu0 %v1194_v4  ;;  %v1202_v12 = vld [vmem:[%s1637_s1 + $0x60] sm:$0xff]   ;;  %v1206_v16 = vld [vmem:[%s1637_s1 + $0x58] sm:$0xff]   ;;  %v1210_v20 = vld [vmem:[%s1637_s1 + $0x50] sm:$0xff]  }
   0x6   :  { %1110 = vmatprep.subr.bf16.mxu1 %v1195_v5  ;;  %v1203_v13 = vld [vmem:[%s1637_s1 + $0xe0] sm:$0xff]   ;;  %v1207_v17 = vld [vmem:[%s1637_s1 + $0xd8] sm:$0xff]   ;;  %v1211_v21 = vld [vmem:[%s1637_s1 + $0xd0] sm:$0xff]  }
   0x7   :  { %v1204_v14 = vld [vmem:[%s1637_s1 + $0x20] sm:$0xff]   ;;  %v1208_v18 = vld [vmem:[%s1637_s1 + $0x18] sm:$0xff]   ;;  %v1212_v22 = vld [vmem:[%s1637_s1 + $0x10] sm:$0xff]  }
   0x8   :  { %1029 = vmatpush3.bf16.msra.mxu0 %v1196_v6  ;;  %v1205_v15 = vld [vmem:[%s1637_s1 + $0xa0] sm:$0xff]   ;;  %v1209_v19 = vld [vmem:[%s1637_s1 + $0x98] sm:$0xff]   ;;  %v1213_v23 = vld [vmem:[%s1637_s1 + $0x90] sm:$0xff]  }
   0x9   :  { %1111 = vmatpush3.bf16.msra.mxu1 %v1197_v7  ;;  %1030 = vmatprep.subr.bf16.mxu0 %v1198_v8  ;;  %v1214_v24 = vld [vmem:[%s1637_s1 + $0x48] sm:$0xff]   ;;  %v1218_v28 = vld [vmem:[%s1637_s1 + $0x40] sm:$0xff]  }
   0xa   :  { %1112 = vmatprep.subr.bf16.mxu1 %v1199_v9  ;;  %v1215_v25 = vld [vmem:[%s1637_s1 + $0xc8] sm:$0xff]   ;;  %v1219_v29 = vld [vmem:[%s1637_s1 + $0xc0] sm:$0xff]  }
   0xb   :  { %v1216_v26 = vld [vmem:[%s1637_s1 + $0x8] sm:$0xff]   ;;  %v1220_v30 = vld [vmem:[%s1637_s1] sm:$0xff]  }
   0xc   :  { %1031 = vmatpush3.bf16.msra.mxu0 %v1200_v10  ;;  %v1217_v27 = vld [vmem:[%s1637_s1 + $0x88] sm:$0xff]   ;;  %v1221_v31 = vld [vmem:[%s1637_s1 + $0x80] sm:$0xff]  }
   0xd   :  { %1113 = vmatpush3.bf16.msra.mxu1 %v1201_v11  ;;  %1032 = vmatprep.subr.bf16.mxu0 %v1202_v12  ;;  %v1222_v32 = vld [vmem:[%s1638_s0] ss:$16 sps:$4 sm:$0xff]   ;;  %v1224_v33 = vld [vmem:[%s1638_s0 + $0x4] ss:$16 sps:$4 sm:$0xff]   ;;  %v1225_v34 = vld [vmem:[%s1638_s0 + $0x8] ss:$16 sps:$4 sm:$0xff]  }
   0xe   :  { %1114 = vmatprep.subr.bf16.mxu1 %v1203_v13  ;;  %v1227_v35 = vld [vmem:[%s1638_s0 + $0xc] ss:$16 sps:$4 sm:$0xff]   ;;  %566 = vmatprep.mubr.bf16.mxu0 %v1224_v33  ;;  %v1228_v36 = vld [vmem:[%s1638_s0 + $0x24] ss:$16 sps:$4 sm:$0xff]   ;;  %v1232_v38 = vld [vmem:[%s1638_s0 + $0x20] ss:$16 sps:$4 sm:$0xff]  }
   0xf   :  { %686 = vmatprep.mubr.bf16.mxu1 %v1227_v35  ;;  %v1230_v37 = vld [vmem:[%s1638_s0 + $0x2c] ss:$16 sps:$4 sm:$0xff]   ;;  %v1233_v39 = vld [vmem:[%s1638_s0 + $0x28] ss:$16 sps:$4 sm:$0xff]   ;;  %v1234_v40 = vld [vmem:[%s1638_s0 + $0x44] ss:$16 sps:$4 sm:$0xff]  }
  0x10   :  { %1033 = vmatpush3.bf16.msra.mxu0 %v1204_v14  ;;  %v1236_v41 = vld [vmem:[%s1638_s0 + $0x4c] ss:$16 sps:$4 sm:$0xff]   ;;  %v1238_v42 = vld [vmem:[%s1638_s0 + $0x40] ss:$16 sps:$4 sm:$0xff]   ;;  %v1239_v43 = vld [vmem:[%s1638_s0 + $0x48] ss:$16 sps:$4 sm:$0xff]  }
  0x11   :  { %1115 = vmatpush3.bf16.msra.mxu1 %v1205_v15  ;;  %1034 = vmatprep.subr.bf16.mxu0 %v1206_v16  ;;  %v1240_v44 = vld [vmem:[%s1638_s0 + $0x64] ss:$16 sps:$4 sm:$0xff]   ;;  %v1242_v45 = vld [vmem:[%s1638_s0 + $0x6c] ss:$16 sps:$4 sm:$0xff]   ;;  %v1244_v46 = vld [vmem:[%s1638_s0 + $0x60] ss:$16 sps:$4 sm:$0xff]  }
  0x12   :  { %1116 = vmatprep.subr.bf16.mxu1 %v1207_v17  ;;  %v1245_v47 = vld [vmem:[%s1638_s0 + $0x68] ss:$16 sps:$4 sm:$0xff]   ;;  %v1246_v48 = vld [vmem:[%s1638_s0 + $0x84] ss:$16 sps:$4 sm:$0xff]   ;;  %v1248_v49 = vld [vmem:[%s1638_s0 + $0x8c] ss:$16 sps:$4 sm:$0xff]  }
  0x13   :  { %v1250_v50 = vld [vmem:[%s1638_s0 + $0x80] ss:$16 sps:$4 sm:$0xff]   ;;  %v1251_v51 = vld [vmem:[%s1638_s0 + $0x88] ss:$16 sps:$4 sm:$0xff]   ;;  %v1252_v52 = vld [vmem:[%s1638_s0 + $0xa4] ss:$16 sps:$4 sm:$0xff]  }
  0x14   :  { %1035 = vmatpush3.bf16.msra.mxu0 %v1208_v18  ;;  %v1254_v53 = vld [vmem:[%s1638_s0 + $0xac] ss:$16 sps:$4 sm:$0xff]   ;;  %v1256_v54 = vld [vmem:[%s1638_s0 + $0xa0] ss:$16 sps:$4 sm:$0xff]   ;;  %v1257_v55 = vld [vmem:[%s1638_s0 + $0xa8] ss:$16 sps:$4 sm:$0xff]  }
  0x15   :  { %1117 = vmatpush3.bf16.msra.mxu1 %v1209_v19  ;;  %1036 = vmatprep.subr.bf16.mxu0 %v1210_v20  ;;  %v1258_v56 = vld [vmem:[%s1638_s0 + $0xc4] ss:$16 sps:$4 sm:$0xff]   ;;  %v1260_v57 = vld [vmem:[%s1638_s0 + $0xcc] ss:$16 sps:$4 sm:$0xff]   ;;  %v1262_v58 = vld [vmem:[%s1638_s0 + $0xc0] ss:$16 sps:$4 sm:$0xff]  }
  0x16   :  { %1118 = vmatprep.subr.bf16.mxu1 %v1211_v21  ;;  %v1263_v59 = vld [vmem:[%s1638_s0 + $0xc8] ss:$16 sps:$4 sm:$0xff]   ;;  %v1264_v60 = vld [vmem:[%s1638_s0 + $0xe4] ss:$16 sps:$4 sm:$0xff]   ;;  %v1266_v61 = vld [vmem:[%s1638_s0 + $0xec] ss:$16 sps:$4 sm:$0xff]  }
  0x17   :  { %v1268_v62 = vld [vmem:[%s1638_s0 + $0xe0] ss:$16 sps:$4 sm:$0xff]   ;;  %v1269_v63 = vld [vmem:[%s1638_s0 + $0xe8] ss:$16 sps:$4 sm:$0xff]   ;;  %v1270_v0 = vld [vmem:[%s1638_s0 + $0x104] ss:$16 sps:$4 sm:$0xff]  }
  0x18   :  { %1037 = vmatpush3.bf16.msra.mxu0 %v1212_v22  ;;  %v1272_v1 = vld [vmem:[%s1638_s0 + $0x10c] ss:$16 sps:$4 sm:$0xff]   ;;  %v1274_v2 = vld [vmem:[%s1638_s0 + $0x100] ss:$16 sps:$4 sm:$0xff]   ;;  %v1275_v3 = vld [vmem:[%s1638_s0 + $0x108] ss:$16 sps:$4 sm:$0xff]  }
  0x19   :  { %1119 = vmatpush3.bf16.msra.mxu1 %v1213_v23  ;;  %1038 = vmatprep.subr.bf16.mxu0 %v1214_v24  ;;  %v1276_v4 = vld [vmem:[%s1638_s0 + $0x124] ss:$16 sps:$4 sm:$0xff]   ;;  %v1278_v5 = vld [vmem:[%s1638_s0 + $0x12c] ss:$16 sps:$4 sm:$0xff]   ;;  %v1280_v8 = vld [vmem:[%s1638_s0 + $0x120] ss:$16 sps:$4 sm:$0xff]  }
  0x1a   :  { %1120 = vmatprep.subr.bf16.mxu1 %v1215_v25  ;;  %v55_v6 = vld [vmem:[%s1638_s0 + $0x140] sm:$0x11]  ;;  %v56_v7 = vld [vmem:[%s1638_s0 + $0x148] sm:$0x11] }
  0x1b   :  { %v1281_v9 = vld [vmem:[%s1638_s0 + $0x128] ss:$16 sps:$4 sm:$0xff]   ;;  %v949_v10 = vcombine.high %v55_v6, %v55_v6  ;;  %v951_v11 = vcombine.high %v56_v7, %v56_v7  ;;  %v948_v12 = vcombine.low %v55_v6, %v55_v6  ;;  %v950_v13 = vcombine.low %v56_v7, %v56_v7  ;;  %v1531_v16 = vld [vmem:[%s1639_s2] ss:$0 sm:$0xff] }
  0x1c   :  { %1039 = vmatpush3.bf16.msra.mxu0 %v1216_v26 }
  0x1d   :  { %1121 = vmatpush3.bf16.msra.mxu1 %v1217_v27  ;;  %1040 = vmatprep.subr.bf16.mxu0 %v1218_v28 }
  0x1e   :  { %1122 = vmatprep.subr.bf16.mxu1 %v1219_v29 }
  0x20   :  { %1041 = vmatpush3.bf16.msra.mxu0 %v1220_v30 }
  0x21   :  { %1123 = vmatpush3.bf16.msra.mxu1 %v1221_v31 }
  0x23   :  { %567 = vmatmul.mubr.bf16.vlgmr.msra.gmra.mxu0 %v1222_v32 }
  0x24   :  { %687 = vmatmul.mubr.bf16.vlgmr.msra.gmra.mxu1 %v1225_v34  ;;  %574 = vmatprep.mubr.bf16.mxu0 %v1228_v36 }
  0x25   :  { %694 = vmatprep.mubr.bf16.mxu1 %v1230_v37 }
  0x2b   :  { %575 = vmatmul.mubr.bf16.gmra.mxu0 %v1232_v38 }
  0x2c   :  { %695 = vmatmul.mubr.bf16.gmra.mxu1 %v1233_v39  ;;  %582 = vmatprep.mubr.bf16.mxu0 %v1234_v40 }
  0x2d   :  { %702 = vmatprep.mubr.bf16.mxu1 %v1236_v41 }
  0x33   :  { %583 = vmatmul.mubr.bf16.gmra.mxu0 %v1238_v42 }
  0x34   :  { %703 = vmatmul.mubr.bf16.gmra.mxu1 %v1239_v43  ;;  %590 = vmatprep.mubr.bf16.mxu0 %v1240_v44 }
  0x35   :  { %710 = vmatprep.mubr.bf16.mxu1 %v1242_v45 }
  0x3b   :  { %591 = vmatmul.mubr.bf16.gmra.mxu0 %v1244_v46 }
  0x3c   :  { %711 = vmatmul.mubr.bf16.gmra.mxu1 %v1245_v47  ;;  %598 = vmatprep.mubr.bf16.mxu0 %v1246_v48 }
  0x3d   :  { %718 = vmatprep.mubr.bf16.mxu1 %v1248_v49 }
  0x43   :  { %599 = vmatmul.mubr.bf16.gmra.mxu0 %v1250_v50 }
  0x44   :  { %719 = vmatmul.mubr.bf16.gmra.mxu1 %v1251_v51  ;;  %606 = vmatprep.mubr.bf16.mxu0 %v1252_v52 }
  0x45   :  { %726 = vmatprep.mubr.bf16.mxu1 %v1254_v53 }
  0x4b   :  { %607 = vmatmul.mubr.bf16.gmra.mxu0 %v1256_v54 }
  0x4c   :  { %727 = vmatmul.mubr.bf16.gmra.mxu1 %v1257_v55  ;;  %614 = vmatprep.mubr.bf16.mxu0 %v1258_v56 }
  0x4d   :  { %734 = vmatprep.mubr.bf16.mxu1 %v1260_v57 }
  0x53   :  { %615 = vmatmul.mubr.bf16.gmra.mxu0 %v1262_v58 }
  0x54   :  { %735 = vmatmul.mubr.bf16.gmra.mxu1 %v1263_v59  ;;  %622 = vmatprep.mubr.bf16.mxu0 %v1264_v60 }
  0x55   :  { %742 = vmatprep.mubr.bf16.mxu1 %v1266_v61 }
  0x5b   :  { %623 = vmatmul.mubr.bf16.gmra.mxu0 %v1268_v62 }
  0x5c   :  { %743 = vmatmul.mubr.bf16.gmra.mxu1 %v1269_v63  ;;  %630 = vmatprep.mubr.bf16.mxu0 %v1270_v0 }
  0x5d   :  { %750 = vmatprep.mubr.bf16.mxu1 %v1272_v1 }
  0x63   :  { %631 = vmatmul.mubr.bf16.gmra.mxu0 %v1274_v2 }
  0x64   :  { %751 = vmatmul.mubr.bf16.gmra.mxu1 %v1275_v3  ;;  %638 = vmatprep.mubr.bf16.mxu0 %v1276_v4 }
  0x65   :  { %758 = vmatprep.mubr.bf16.mxu1 %v1278_v5 }
  0x6b   :  { %639 = vmatmul.mubr.bf16.gmra.mxu0 %v1280_v8 }
  0x6c   :  { %759 = vmatmul.mubr.bf16.gmra.mxu1 %v1281_v9  ;;  %646 = vmatprep.mubr.bf16.mxu0 %v949_v10 }
  0x6d   :  { %766 = vmatprep.mubr.bf16.mxu1 %v951_v11 }
  0x73   :  { %647 = vmatmul.mubr.bf16.gmra.mxu0 %v948_v12 }
  0x74   :  { %767 = vmatmul.mubr.bf16.gmra.mxu1 %v950_v13 }
  0xe3   :  { %v1042_v14 = vpop.f32.mrf.mxu0 }
  0xe4   :  { %v1124_v15 = vpop.f32.mrf.mxu1 }
  0xe5   :  { %v1043_v17 = vpop.f32.mrf.mxu0 }
  0xe6   :  { %v1044_v18 = vadd.f32 %v1043_v17, %v1042_v14  ;;  %v1125_v19 = vpop.f32.mrf.mxu1 }
  0xe7   :  { %v1045_v20 = vpop.f32.mrf.mxu0  ;;  %v1126_v22 = vadd.f32 %v1125_v19, %v1124_v15 }
  0xe8   :  { %v569_v21 = vadd.f32 %v1044_v18, %v1531_v16  ;;  %v1127_v23 = vpop.f32.mrf.mxu1 }
  0xe9   :  { %v1046_v24 = vpop.f32.mrf.mxu0 }
  0xea   :  { %v689_v25 = vadd.f32 %v1126_v22, %v569_v21  ;;  %v1047_v26 = vadd.f32 %v1046_v24, %v1045_v20  ;;  %v1128_v27 = vpop.f32.mrf.mxu1 }
  0xeb   :  { %v1048_v28 = vpop.f32.mrf.mxu0  ;;  %v1129_v31 = vadd.f32 %v1128_v27, %v1127_v23 }
  0xec   :  { %v774_v29 = vmax.f32 %v689_v25, 0.0  ;;  %v572_v30 = vadd.f32 %v1047_v26, %v1531_v16  ;;  %v1130_v32 = vpop.f32.mrf.mxu1 }
  0xed   :  { %v1049_v33 = vpop.f32.mrf.mxu0 }
  0xee   :  { %v1005_v34 = vpack.c.bf16 %v774_v29, %v774_v29  ;;  %v692_v35 = vadd.f32 %v1129_v31, %v572_v30  ;;  %v1050_v36 = vadd.f32 %v1049_v33, %v1048_v28  ;;  %v1131_v37 = vpop.f32.mrf.mxu1 }
  0xef   :  { %v1051_v38 = vpop.f32.mrf.mxu0  ;;  %v1132_v41 = vadd.f32 %v1131_v37, %v1130_v32 }
  0xf0   :  { %881 = vst.msk [vmem:[%s1640_s3] sm:$0xf] %vm880_vm0, %v1005_v34  ;;  %v775_v39 = vmax.f32 %v692_v35, 0.0  ;;  %v577_v40 = vadd.f32 %v1050_v36, %v1531_v16  ;;  %v1133_v42 = vpop.f32.mrf.mxu1 }
  0xf1   :  { %v1052_v43 = vpop.f32.mrf.mxu0 }
  0xf2   :  { %v1006_v44 = vpack.c.bf16 %v775_v39, %v775_v39  ;;  %v697_v45 = vadd.f32 %v1132_v41, %v577_v40  ;;  %v1053_v46 = vadd.f32 %v1052_v43, %v1051_v38  ;;  %v1134_v47 = vpop.f32.mrf.mxu1 }
  0xf3   :  { %v1054_v48 = vpop.f32.mrf.mxu0  ;;  %v1135_v51 = vadd.f32 %v1134_v47, %v1133_v42 }
  0xf4   :  { %882 = vst.msk [vmem:[%s1640_s3 + $0x4] sm:$0xf] %vm880_vm0, %v1006_v44  ;;  %v776_v49 = vmax.f32 %v697_v45, 0.0  ;;  %v580_v50 = vadd.f32 %v1053_v46, %v1531_v16  ;;  %v1136_v52 = vpop.f32.mrf.mxu1 }
  0xf5   :  { %v1055_v53 = vpop.f32.mrf.mxu0 }
  0xf6   :  { %v1007_v54 = vpack.c.bf16 %v776_v49, %v776_v49  ;;  %v700_v55 = vadd.f32 %v1135_v51, %v580_v50  ;;  %v1056_v56 = vadd.f32 %v1055_v53, %v1054_v48  ;;  %v1137_v57 = vpop.f32.mrf.mxu1 }
  0xf7   :  { %v1057_v58 = vpop.f32.mrf.mxu0  ;;  %v1138_v61 = vadd.f32 %v1137_v57, %v1136_v52 }
  0xf8   :  { %883 = vst.msk [vmem:[%s1640_s3 + $0x8] sm:$0xf] %vm880_vm0, %v1007_v54  ;;  %v777_v59 = vmax.f32 %v700_v55, 0.0  ;;  %v585_v60 = vadd.f32 %v1056_v56, %v1531_v16  ;;  %v1139_v62 = vpop.f32.mrf.mxu1 }
  0xf9   :  { %v1058_v63 = vpop.f32.mrf.mxu0 }
  0xfa   :  { %v1008_v0 = vpack.c.bf16 %v777_v59, %v777_v59  ;;  %v705_v1 = vadd.f32 %v1138_v61, %v585_v60  ;;  %v1059_v2 = vadd.f32 %v1058_v63, %v1057_v58  ;;  %v1140_v3 = vpop.f32.mrf.mxu1 }
  0xfb   :  { %v1060_v4 = vpop.f32.mrf.mxu0  ;;  %v1141_v7 = vadd.f32 %v1140_v3, %v1139_v62 }
  0xfc   :  { %884 = vst.msk [vmem:[%s1640_s3 + $0xc] sm:$0xf] %vm880_vm0, %v1008_v0  ;;  %v778_v5 = vmax.f32 %v705_v1, 0.0  ;;  %v588_v6 = vadd.f32 %v1059_v2, %v1531_v16  ;;  %v1142_v8 = vpop.f32.mrf.mxu1 }
  0xfd   :  { %v1061_v9 = vpop.f32.mrf.mxu0 }
  0xfe   :  { %v1009_v10 = vpack.c.bf16 %v778_v5, %v778_v5  ;;  %v708_v11 = vadd.f32 %v1141_v7, %v588_v6  ;;  %v1062_v12 = vadd.f32 %v1061_v9, %v1060_v4  ;;  %v1143_v13 = vpop.f32.mrf.mxu1 }
  0xff   :  { %v1063_v14 = vpop.f32.mrf.mxu0  ;;  %v1144_v18 = vadd.f32 %v1143_v13, %v1142_v8 }
 0x100   :  { %885 = vst.msk [vmem:[%s1640_s3 + $0x10] sm:$0xf] %vm880_vm0, %v1009_v10  ;;  %v779_v15 = vmax.f32 %v708_v11, 0.0  ;;  %v593_v17 = vadd.f32 %v1062_v12, %v1531_v16  ;;  %v1145_v19 = vpop.f32.mrf.mxu1 }
 0x101   :  { %v1064_v20 = vpop.f32.mrf.mxu0 }
 0x102   :  { %v1010_v21 = vpack.c.bf16 %v779_v15, %v779_v15  ;;  %v713_v22 = vadd.f32 %v1144_v18, %v593_v17  ;;  %v1065_v23 = vadd.f32 %v1064_v20, %v1063_v14  ;;  %v1146_v24 = vpop.f32.mrf.mxu1 }
 0x103   :  { %v1066_v25 = vpop.f32.mrf.mxu0  ;;  %v1147_v28 = vadd.f32 %v1146_v24, %v1145_v19 }
 0x104   :  { %886 = vst.msk [vmem:[%s1640_s3 + $0x14] sm:$0xf] %vm880_vm0, %v1010_v21  ;;  %v780_v26 = vmax.f32 %v713_v22, 0.0  ;;  %v596_v27 = vadd.f32 %v1065_v23, %v1531_v16  ;;  %v1148_v29 = vpop.f32.mrf.mxu1 }
 0x105   :  { %v1067_v30 = vpop.f32.mrf.mxu0 }
 0x106   :  { %v1011_v31 = vpack.c.bf16 %v780_v26, %v780_v26  ;;  %v716_v32 = vadd.f32 %v1147_v28, %v596_v27  ;;  %v1068_v33 = vadd.f32 %v1067_v30, %v1066_v25  ;;  %v1149_v34 = vpop.f32.mrf.mxu1 }
 0x107   :  { %v1069_v35 = vpop.f32.mrf.mxu0  ;;  %v1150_v38 = vadd.f32 %v1149_v34, %v1148_v29 }
 0x108   :  { %887 = vst.msk [vmem:[%s1640_s3 + $0x18] sm:$0xf] %vm880_vm0, %v1011_v31  ;;  %v781_v36 = vmax.f32 %v716_v32, 0.0  ;;  %v601_v37 = vadd.f32 %v1068_v33, %v1531_v16  ;;  %v1151_v39 = vpop.f32.mrf.mxu1 }
 0x109   :  { %v1070_v40 = vpop.f32.mrf.mxu0 }
 0x10a   :  { %v1012_v41 = vpack.c.bf16 %v781_v36, %v781_v36  ;;  %v721_v42 = vadd.f32 %v1150_v38, %v601_v37  ;;  %v1071_v43 = vadd.f32 %v1070_v40, %v1069_v35  ;;  %v1152_v44 = vpop.f32.mrf.mxu1 }
 0x10b   :  { %v1072_v45 = vpop.f32.mrf.mxu0  ;;  %v1153_v48 = vadd.f32 %v1152_v44, %v1151_v39 }
 0x10c   :  { %888 = vst.msk [vmem:[%s1640_s3 + $0x1c] sm:$0xf] %vm880_vm0, %v1012_v41  ;;  %v782_v46 = vmax.f32 %v721_v42, 0.0  ;;  %v604_v47 = vadd.f32 %v1071_v43, %v1531_v16  ;;  %v1154_v49 = vpop.f32.mrf.mxu1 }
 0x10d   :  { %v1073_v50 = vpop.f32.mrf.mxu0 }
 0x10e   :  { %v1013_v51 = vpack.c.bf16 %v782_v46, %v782_v46  ;;  %v724_v52 = vadd.f32 %v1153_v48, %v604_v47  ;;  %v1074_v53 = vadd.f32 %v1073_v50, %v1072_v45  ;;  %v1155_v54 = vpop.f32.mrf.mxu1 }
 0x10f   :  { %v1075_v55 = vpop.f32.mrf.mxu0  ;;  %v1156_v58 = vadd.f32 %v1155_v54, %v1154_v49 }
 0x110   :  { %889 = vst.msk [vmem:[%s1640_s3 + $0x20] sm:$0xf] %vm880_vm0, %v1013_v51  ;;  %v783_v56 = vmax.f32 %v724_v52, 0.0  ;;  %v609_v57 = vadd.f32 %v1074_v53, %v1531_v16  ;;  %v1157_v59 = vpop.f32.mrf.mxu1 }
 0x111   :  { %v1076_v60 = vpop.f32.mrf.mxu0 }
 0x112   :  { %v1014_v61 = vpack.c.bf16 %v783_v56, %v783_v56  ;;  %v729_v62 = vadd.f32 %v1156_v58, %v609_v57  ;;  %v1077_v63 = vadd.f32 %v1076_v60, %v1075_v55  ;;  %v1158_v0 = vpop.f32.mrf.mxu1 }
 0x113   :  { %v1078_v1 = vpop.f32.mrf.mxu0  ;;  %v1159_v4 = vadd.f32 %v1158_v0, %v1157_v59 }
 0x114   :  { %890 = vst.msk [vmem:[%s1640_s3 + $0x24] sm:$0xf] %vm880_vm0, %v1014_v61  ;;  %v784_v2 = vmax.f32 %v729_v62, 0.0  ;;  %v612_v3 = vadd.f32 %v1077_v63, %v1531_v16  ;;  %v1160_v5 = vpop.f32.mrf.mxu1 }
 0x115   :  { %v1079_v6 = vpop.f32.mrf.mxu0 }
 0x116   :  { %v1015_v7 = vpack.c.bf16 %v784_v2, %v784_v2  ;;  %v732_v8 = vadd.f32 %v1159_v4, %v612_v3  ;;  %v1080_v9 = vadd.f32 %v1079_v6, %v1078_v1  ;;  %v1161_v10 = vpop.f32.mrf.mxu1 }
 0x117   :  { %v1081_v11 = vpop.f32.mrf.mxu0  ;;  %v1162_v14 = vadd.f32 %v1161_v10, %v1160_v5 }
 0x118   :  { %891 = vst.msk [vmem:[%s1640_s3 + $0x28] sm:$0xf] %vm880_vm0, %v1015_v7  ;;  %v785_v12 = vmax.f32 %v732_v8, 0.0  ;;  %v617_v13 = vadd.f32 %v1080_v9, %v1531_v16  ;;  %v1163_v15 = vpop.f32.mrf.mxu1 }
 0x119   :  { %v1082_v17 = vpop.f32.mrf.mxu0 }
 0x11a   :  { %v1016_v18 = vpack.c.bf16 %v785_v12, %v785_v12  ;;  %v737_v19 = vadd.f32 %v1162_v14, %v617_v13  ;;  %v1083_v20 = vadd.f32 %v1082_v17, %v1081_v11  ;;  %v1164_v21 = vpop.f32.mrf.mxu1 }
 0x11b   :  { %v1084_v22 = vpop.f32.mrf.mxu0  ;;  %v1165_v25 = vadd.f32 %v1164_v21, %v1163_v15 }
 0x11c   :  { %892 = vst.msk [vmem:[%s1640_s3 + $0x2c] sm:$0xf] %vm880_vm0, %v1016_v18  ;;  %v786_v23 = vmax.f32 %v737_v19, 0.0  ;;  %v620_v24 = vadd.f32 %v1083_v20, %v1531_v16  ;;  %v1166_v26 = vpop.f32.mrf.mxu1 }
 0x11d   :  { %v1085_v27 = vpop.f32.mrf.mxu0 }
 0x11e   :  { %v1017_v28 = vpack.c.bf16 %v786_v23, %v786_v23  ;;  %v740_v29 = vadd.f32 %v1165_v25, %v620_v24  ;;  %v1086_v30 = vadd.f32 %v1085_v27, %v1084_v22  ;;  %v1167_v31 = vpop.f32.mrf.mxu1 }
 0x11f   :  { %v1087_v32 = vpop.f32.mrf.mxu0  ;;  %v1168_v35 = vadd.f32 %v1167_v31, %v1166_v26 }
 0x120   :  { %893 = vst.msk [vmem:[%s1640_s3 + $0x30] sm:$0xf] %vm880_vm0, %v1017_v28  ;;  %v787_v33 = vmax.f32 %v740_v29, 0.0  ;;  %v625_v34 = vadd.f32 %v1086_v30, %v1531_v16  ;;  %v1169_v36 = vpop.f32.mrf.mxu1 }
 0x121   :  { %v1088_v37 = vpop.f32.mrf.mxu0 }
 0x122   :  { %v1018_v38 = vpack.c.bf16 %v787_v33, %v787_v33  ;;  %v745_v39 = vadd.f32 %v1168_v35, %v625_v34  ;;  %v1089_v40 = vadd.f32 %v1088_v37, %v1087_v32  ;;  %v1170_v41 = vpop.f32.mrf.mxu1 }
 0x123   :  { %v1090_v42 = vpop.f32.mrf.mxu0  ;;  %v1171_v45 = vadd.f32 %v1170_v41, %v1169_v36 }
 0x124   :  { %894 = vst.msk [vmem:[%s1640_s3 + $0x34] sm:$0xf] %vm880_vm0, %v1018_v38  ;;  %v788_v43 = vmax.f32 %v745_v39, 0.0  ;;  %v628_v44 = vadd.f32 %v1089_v40, %v1531_v16  ;;  %v1172_v46 = vpop.f32.mrf.mxu1 }
 0x125   :  { %v1091_v47 = vpop.f32.mrf.mxu0 }
 0x126   :  { %v1019_v48 = vpack.c.bf16 %v788_v43, %v788_v43  ;;  %v748_v49 = vadd.f32 %v1171_v45, %v628_v44  ;;  %v1092_v50 = vadd.f32 %v1091_v47, %v1090_v42  ;;  %v1173_v51 = vpop.f32.mrf.mxu1 }
 0x127   :  { %v1093_v52 = vpop.f32.mrf.mxu0  ;;  %v1174_v55 = vadd.f32 %v1173_v51, %v1172_v46 }
 0x128   :  { %895 = vst.msk [vmem:[%s1640_s3 + $0x38] sm:$0xf] %vm880_vm0, %v1019_v48  ;;  %v789_v53 = vmax.f32 %v748_v49, 0.0  ;;  %v633_v54 = vadd.f32 %v1092_v50, %v1531_v16  ;;  %v1175_v56 = vpop.f32.mrf.mxu1 }
 0x129   :  { %v1094_v57 = vpop.f32.mrf.mxu0 }
 0x12a   :  { %v1020_v58 = vpack.c.bf16 %v789_v53, %v789_v53  ;;  %v753_v59 = vadd.f32 %v1174_v55, %v633_v54  ;;  %v1095_v60 = vadd.f32 %v1094_v57, %v1093_v52  ;;  %v1176_v61 = vpop.f32.mrf.mxu1 }
 0x12b   :  { %v1096_v62 = vpop.f32.mrf.mxu0  ;;  %v1177_v1 = vadd.f32 %v1176_v61, %v1175_v56 }
 0x12c   :  { %896 = vst.msk [vmem:[%s1640_s3 + $0x3c] sm:$0xf] %vm880_vm0, %v1020_v58  ;;  %v790_v63 = vmax.f32 %v753_v59, 0.0  ;;  %v636_v0 = vadd.f32 %v1095_v60, %v1531_v16  ;;  %v1178_v2 = vpop.f32.mrf.mxu1 }
 0x12d   :  { %v1097_v3 = vpop.f32.mrf.mxu0 }
 0x12e   :  { %v1021_v4 = vpack.c.bf16 %v790_v63, %v790_v63  ;;  %v756_v5 = vadd.f32 %v1177_v1, %v636_v0  ;;  %v1098_v6 = vadd.f32 %v1097_v3, %v1096_v62  ;;  %v1179_v7 = vpop.f32.mrf.mxu1 }
 0x12f   :  { %v1099_v8 = vpop.f32.mrf.mxu0  ;;  %v1180_v11 = vadd.f32 %v1179_v7, %v1178_v2 }
 0x130   :  { %897 = vst.msk [vmem:[%s1640_s3 + $0x40] sm:$0xf] %vm880_vm0, %v1021_v4  ;;  %v791_v9 = vmax.f32 %v756_v5, 0.0  ;;  %v641_v10 = vadd.f32 %v1098_v6, %v1531_v16  ;;  %v1181_v12 = vpop.f32.mrf.mxu1 }
 0x131   :  { %v1100_v13 = vpop.f32.mrf.mxu0 }
 0x132   :  { %v1022_v14 = vpack.c.bf16 %v791_v9, %v791_v9  ;;  %v761_v15 = vadd.f32 %v1180_v11, %v641_v10  ;;  %v1101_v17 = vadd.f32 %v1100_v13, %v1099_v8  ;;  %v1182_v18 = vpop.f32.mrf.mxu1 }
 0x133   :  { %v1102_v19 = vpop.f32.mrf.mxu0  ;;  %v1183_v22 = vadd.f32 %v1182_v18, %v1181_v12 }
 0x134   :  { %898 = vst.msk [vmem:[%s1640_s3 + $0x44] sm:$0xf] %vm880_vm0, %v1022_v14  ;;  %v792_v20 = vmax.f32 %v761_v15, 0.0  ;;  %v644_v21 = vadd.f32 %v1101_v17, %v1531_v16  ;;  %v1184_v23 = vpop.f32.mrf.mxu1 }
 0x135   :  { %v1103_v24 = vpop.f32.mrf.mxu0 }
 0x136   :  { %v1023_v25 = vpack.c.bf16 %v792_v20, %v792_v20  ;;  %v764_v26 = vadd.f32 %v1183_v22, %v644_v21  ;;  %v1104_v27 = vadd.f32 %v1103_v24, %v1102_v19  ;;  %v1185_v28 = vpop.f32.mrf.mxu1 }
 0x137   :  { %v1105_v29 = vpop.f32.mrf.mxu0  ;;  %v1186_v32 = vadd.f32 %v1185_v28, %v1184_v23 }
 0x138   :  { %899 = vst.msk [vmem:[%s1640_s3 + $0x48] sm:$0xf] %vm880_vm0, %v1023_v25  ;;  %v793_v30 = vmax.f32 %v764_v26, 0.0  ;;  %v649_v31 = vadd.f32 %v1104_v27, %v1531_v16  ;;  %v1187_v33 = vpop.f32.mrf.mxu1 }
 0x139   :  { %v1106_v34 = vpop.f32.mrf.mxu0 }
 0x13a   :  { %v1024_v35 = vpack.c.bf16 %v793_v30, %v793_v30  ;;  %v769_v36 = vadd.f32 %v1186_v32, %v649_v31  ;;  %v1188_v37 = vpop.f32.mrf.mxu1 }
 0x13c   :  { %900 = vst.msk [vmem:[%s1640_s3 + $0x4c] sm:$0xf] %vm880_vm0, %v1024_v35  ;;  %v794_v38 = vmax.f32 %v769_v36, 0.0 }
 0x13e   :  { %v1025_v39 = vpack.c.bf16 %v794_v38, %v794_v38 }
 0x140   :  { %902 = vst.msk [vmem:[%s1640_s3 + $0x50] sm:$0x1] %vm901_vm1, %v1025_v39 }

// kernel: cnn_actor_critic_forward.6
= control target key start
LH: loop header
LB: loop body
LE: loop exit
PB: predicated region body
PF: predicated region fallthrough
CT: control target
= control target key end

     0   :  { %v1248_v34 = vmov 0.0   ;;  %vm1249_vm0 = vmmov 0   ;;  %vm516_vm1 = vcmask 523264   ;;  %vm868_vm2 = vcmask 519168   ;;  %s1647_s1 = inlined_call_operand.vmem [shape: bf16[576,64], index: 1, kind: input, shape index: {}]   ;;  %s1648_s0 = inlined_call_operand.vmem [shape: bf16[98,576], index: 0, kind: input, shape index: {}]   ;;  %s1649_s2 = inlined_call_operand.vmem [shape: f32[1,64], index: 2, kind: input, shape index: {}]   ;;  %s1650_s3 = inlined_call_operand.vmem [shape: bf16[98,64], index: 3, kind: output, shape index: {}]  }
   0x1   :  { %v1165_v0 = vld [vmem:[%s1647_s1 + $0x78] sm:$0xff]   ;;  %v1169_v4 = vld [vmem:[%s1647_s1 + $0x70] sm:$0xff]   ;;  %v1173_v8 = vld [vmem:[%s1647_s1 + $0x68] sm:$0xff]   ;;  %vm881_vm3 = vcmask 516096  }
   0x2   :  { %v1166_v1 = vld [vmem:[%s1647_s1 + $0xf8] sm:$0xff]   ;;  %992 = vmatprep.subr.bf16.mxu0 %v1165_v0  ;;  %v1170_v5 = vld [vmem:[%s1647_s1 + $0xf0] sm:$0xff]   ;;  %v1174_v9 = vld [vmem:[%s1647_s1 + $0xe8] sm:$0xff]  }
   0x3   :  { %v1167_v2 = vld [vmem:[%s1647_s1 + $0x38] sm:$0xff]   ;;  %1050 = vmatprep.subr.bf16.mxu1 %v1166_v1  ;;  %v1171_v6 = vld [vmem:[%s1647_s1 + $0x30] sm:$0xff]   ;;  %v1175_v10 = vld [vmem:[%s1647_s1 + $0x28] sm:$0xff]  }
   0x4   :  { %v1168_v3 = vld [vmem:[%s1647_s1 + $0xb8] sm:$0xff]   ;;  %993 = vmatpush3.bf16.msra.mxu0 %v1167_v2  ;;  %v1172_v7 = vld [vmem:[%s1647_s1 + $0xb0] sm:$0xff]   ;;  %v1176_v11 = vld [vmem:[%s1647_s1 + $0xa8] sm:$0xff]  }
   0x5   :  { %1051 = vmatpush3.bf16.msra.mxu1 %v1168_v3  ;;  %994 = vmatprep.subr.bf16.mxu0 %v1169_v4  ;;  %v1177_v12 = vld [vmem:[%s1647_s1 + $0x60] sm:$0xff]   ;;  %v1181_v16 = vld [vmem:[%s1647_s1 + $0x58] sm:$0xff]   ;;  %v1185_v20 = vld [vmem:[%s1647_s1 + $0x50] sm:$0xff]  }
   0x6   :  { %1052 = vmatprep.subr.bf16.mxu1 %v1170_v5  ;;  %v1178_v13 = vld [vmem:[%s1647_s1 + $0xe0] sm:$0xff]   ;;  %v1182_v17 = vld [vmem:[%s1647_s1 + $0xd8] sm:$0xff]   ;;  %v1186_v21 = vld [vmem:[%s1647_s1 + $0xd0] sm:$0xff]  }
   0x7   :  { %v1179_v14 = vld [vmem:[%s1647_s1 + $0x20] sm:$0xff]   ;;  %v1183_v18 = vld [vmem:[%s1647_s1 + $0x18] sm:$0xff]   ;;  %v1187_v22 = vld [vmem:[%s1647_s1 + $0x10] sm:$0xff]  }
   0x8   :  { %995 = vmatpush3.bf16.msra.mxu0 %v1171_v6  ;;  %v1180_v15 = vld [vmem:[%s1647_s1 + $0xa0] sm:$0xff]   ;;  %v1184_v19 = vld [vmem:[%s1647_s1 + $0x98] sm:$0xff]   ;;  %v1188_v23 = vld [vmem:[%s1647_s1 + $0x90] sm:$0xff]  }
   0x9   :  { %1053 = vmatpush3.bf16.msra.mxu1 %v1172_v7  ;;  %996 = vmatprep.subr.bf16.mxu0 %v1173_v8  ;;  %v1189_v24 = vld [vmem:[%s1647_s1 + $0x48] sm:$0xff]   ;;  %v1193_v28 = vld [vmem:[%s1647_s1 + $0x40] sm:$0xff]   ;;  %v1203_v37 = vld [vmem:[%s1647_s1 + $0x118] sm:$0xff]  }
   0xa   :  { %1054 = vmatprep.subr.bf16.mxu1 %v1174_v9  ;;  %v1190_v25 = vld [vmem:[%s1647_s1 + $0xc8] sm:$0xff]   ;;  %v1194_v29 = vld [vmem:[%s1647_s1 + $0xc0] sm:$0xff]   ;;  %v1214_v43 = vld [vmem:[%s1647_s1 + $0x110] sm:$0xff]  }
   0xb   :  { %v1191_v26 = vld [vmem:[%s1647_s1 + $0x8] sm:$0xff]   ;;  %v1195_v30 = vld [vmem:[%s1647_s1] sm:$0xff]   ;;  %v1212_v44 = vld [vmem:[%s1648_s0 + $0x5c] ss:$20 sps:$4 sm:$0xff]  }
   0xc   :  { %997 = vmatpush3.bf16.msra.mxu0 %v1175_v10  ;;  %v1192_v27 = vld [vmem:[%s1647_s1 + $0x88] sm:$0xff]   ;;  %v1196_v31 = vld [vmem:[%s1647_s1 + $0x80] sm:$0xff]   ;;  %v1217_v48 = vld [vmem:[%s1648_s0 + $0x7c] ss:$20 sps:$4 sm:$0xff]  }
   0xd   :  { %1055 = vmatpush3.bf16.msra.mxu1 %v1176_v11  ;;  %998 = vmatprep.subr.bf16.mxu0 %v1177_v12  ;;  %v1197_v32 = vld [vmem:[%s1648_s0] ss:$20 sps:$4 sm:$0xff]   ;;  %v1199_v33 = vld [vmem:[%s1648_s0 + $0x4] ss:$20 sps:$4 sm:$0xff]   ;;  %v1200_v35 = vld [vmem:[%s1648_s0 + $0x8] ss:$20 sps:$4 sm:$0xff]  }
   0xe   :  { %1056 = vmatprep.subr.bf16.mxu1 %v1178_v13  ;;  %v1202_v36 = vld [vmem:[%s1648_s0 + $0xc] ss:$20 sps:$4 sm:$0xff]   ;;  %570 = vmatprep.mubr.bf16.mxu0 %v1199_v33  ;;  %v1206_v39 = vld [vmem:[%s1648_s0 + $0x34] ss:$20 sps:$4 sm:$0xff]   ;;  %v1209_v41 = vld [vmem:[%s1648_s0 + $0x30] ss:$20 sps:$4 sm:$0xff]  }
   0xf   :  { %658 = vmatprep.mubr.bf16.mxu1 %v1202_v36  ;;  %v1204_v38 = vld [vmem:[%s1648_s0 + $0x2c] ss:$20 sps:$4 sm:$0xff]   ;;  %v1208_v40 = vld [vmem:[%s1648_s0 + $0x28] ss:$20 sps:$4 sm:$0xff]   ;;  %v1215_v46 = vld [vmem:[%s1648_s0 + $0x50] ss:$20 sps:$4 sm:$0xff]  }
  0x10   :  { %999 = vmatpush3.bf16.msra.mxu0 %v1179_v14  ;;  %v1210_v42 = vld [vmem:[%s1648_s0 + $0x54] ss:$20 sps:$4 sm:$0xff]   ;;  %v1216_v47 = vld [vmem:[%s1648_s0 + $0x58] ss:$20 sps:$4 sm:$0xff]   ;;  %v1236_v50 = vld [vmem:[%s1647_s1 + $0x100] sm:$0xff]  }
  0x11   :  { %1057 = vmatpush3.bf16.msra.mxu1 %v1180_v15  ;;  %1000 = vmatprep.subr.bf16.mxu0 %v1181_v16  ;;  %v1223_v45 = vld [vmem:[%s1647_s1 + $0x108] sm:$0xff]   ;;  %v1219_v49 = vld [vmem:[%s1648_s0 + $0x84] ss:$20 sps:$4 sm:$0xff]   ;;  %v1222_v52 = vld [vmem:[%s1648_s0 + $0x80] ss:$20 sps:$4 sm:$0xff]  }
  0x12   :  { %1058 = vmatprep.subr.bf16.mxu1 %v1182_v17  ;;  %v1221_v51 = vld [vmem:[%s1648_s0 + $0x78] ss:$20 sps:$4 sm:$0xff]   ;;  %v1228_v55 = vld [vmem:[%s1648_s0 + $0xa0] ss:$20 sps:$4 sm:$0xff]   ;;  %v1229_v56 = vld [vmem:[%s1648_s0 + $0xa8] ss:$20 sps:$4 sm:$0xff]  }
  0x13   :  { %v1224_v53 = vld [vmem:[%s1648_s0 + $0xa4] ss:$20 sps:$4 sm:$0xff]   ;;  %v1226_v54 = vld [vmem:[%s1648_s0 + $0xac] ss:$20 sps:$4 sm:$0xff]   ;;  %v1232_v58 = vld [vmem:[%s1648_s0 + $0xd4] ss:$20 sps:$4 sm:$0xff]  }
  0x14   :  { %1001 = vmatpush3.bf16.msra.mxu0 %v1183_v18  ;;  %v1230_v57 = vld [vmem:[%s1648_s0 + $0xcc] ss:$20 sps:$4 sm:$0xff]   ;;  %v51_v59 = vld [vmem:[%s1648_s0 + $0xf0] sm:$0x11]  ;;  %v52_v60 = vld [vmem:[%s1648_s0 + $0xf8] sm:$0x11] }
  0x15   :  { %1059 = vmatpush3.bf16.msra.mxu1 %v1184_v19  ;;  %1002 = vmatprep.subr.bf16.mxu0 %v1185_v20  ;;  %v1234_v61 = vld [vmem:[%s1648_s0 + $0xc8] ss:$20 sps:$4 sm:$0xff]   ;;  %v1235_v62 = vld [vmem:[%s1648_s0 + $0xd0] ss:$20 sps:$4 sm:$0xff]   ;;  %v919_v63 = vcombine.high %v51_v59, %v51_v59  ;;  %v921_v0 = vcombine.high %v52_v60, %v52_v60  ;;  %v918_v1 = vcombine.low %v51_v59, %v51_v59  ;;  %v1243_v5 = vld [vmem:[%s1648_s0 + $0x38] ss:$20 sps:$4 sm:$0xff]  }
  0x16   :  { %1060 = vmatprep.subr.bf16.mxu1 %v1186_v21  ;;  %v920_v2 = vcombine.low %v52_v60, %v52_v60  ;;  %v1241_v3 = vld [vmem:[%s1648_s0 + $0x10] ss:$20 sps:$4 sm:$0xff]   ;;  %v1244_v6 = vld [vmem:[%s1648_s0 + $0xd8] ss:$20 sps:$4 sm:$0xff]   ;;  %v1245_v7 = vld [vmem:[%s1648_s0 + $0x60] ss:$20 sps:$4 sm:$0xff]  }
  0x17   :  { %v1242_v4 = vld [vmem:[%s1648_s0 + $0xb0] ss:$20 sps:$4 sm:$0xff]   ;;  %v1246_v8 = vld [vmem:[%s1648_s0 + $0x100] ss:$0 sps:$4 sm:$0x11]  }
  0x18   :  { %1003 = vmatpush3.bf16.msra.mxu0 %v1187_v22  ;;  %v1247_v9 = vld [vmem:[%s1648_s0 + $0x88] ss:$20 sps:$4 sm:$0xff]   ;;  %v1553_v59 = vld [vmem:[%s1649_s2] ss:$0 sm:$0xff] }
  0x19   :  { %1061 = vmatpush3.bf16.msra.mxu1 %v1188_v23  ;;  %1004 = vmatprep.subr.bf16.mxu0 %v1189_v24 }
  0x1a   :  { %1062 = vmatprep.subr.bf16.mxu1 %v1190_v25 }
  0x1c   :  { %1005 = vmatpush3.bf16.msra.mxu0 %v1191_v26 }
  0x1d   :  { %1063 = vmatpush3.bf16.msra.mxu1 %v1192_v27  ;;  %1006 = vmatprep.subr.bf16.mxu0 %v1193_v28 }
  0x1e   :  { %1064 = vmatprep.subr.bf16.mxu1 %v1194_v29 }
  0x20   :  { %1007 = vmatpush3.bf16.msra.mxu0 %v1195_v30 }
  0x21   :  { %1065 = vmatpush3.bf16.msra.mxu1 %v1196_v31  ;;  %1119 = vmatprep.subr.bf16.mxu0 %v1248_v34 }
  0x22   :  { %1155 = vmatprep.subr.bf16.mxu1 %v1248_v34 }
  0x23   :  { %571 = vmatmul.mubr.bf16.vlgmr.msra.gmra.mxu0 %v1197_v32 }
  0x24   :  { %659 = vmatmul.mubr.bf16.vlgmr.msra.gmra.mxu1 %v1200_v35  ;;  %1120 = vmatpush3.bf16.msra.mxu0 %v1203_v37 }
  0x25   :  { %578 = vmatprep.mubr.bf16.mxu0 %v1204_v38  ;;  %1159 = vmatpush3.bf16.msra.mxu1 %v1203_v37 }
  0x26   :  { %666 = vmatprep.mubr.bf16.mxu1 %v1206_v39  ;;  %1121 = vmatprep.subr.bf16.mxu0 %v1248_v34 }
  0x27   :  { %1156 = vmatprep.subr.bf16.mxu1 %v1248_v34 }
  0x28   :  { %1122 = vmatpush3.bf16.msra.mxu0 %v1214_v43 }
  0x29   :  { %1160 = vmatpush3.bf16.msra.mxu1 %v1214_v43  ;;  %1123 = vmatprep.subr.bf16.mxu0 %v1248_v34 }
  0x2a   :  { %1157 = vmatprep.subr.bf16.mxu1 %v1248_v34 }
  0x2b   :  { %579 = vmatmul.mubr.bf16.gmra.mxu0 %v1208_v40 }
  0x2c   :  { %667 = vmatmul.mubr.bf16.gmra.mxu1 %v1209_v41  ;;  %586 = vmatprep.mubr.bf16.mxu0 %v1210_v42 }
  0x2d   :  { %674 = vmatprep.mubr.bf16.mxu1 %v1212_v44  ;;  %1124 = vmatpush3.bf16.msra.mxu0 %v1223_v45 }
  0x2e   :  { %1161 = vmatpush3.bf16.msra.mxu1 %v1223_v45  ;;  %1125 = vmatprep.subr.bf16.mxu0 %v1248_v34 }
  0x2f   :  { %1158 = vmatprep.subr.bf16.mxu1 %v1248_v34 }
  0x31   :  { %1126 = vmatpush3.bf16.msra.mxu0 %v1236_v50 }
  0x32   :  { %1162 = vmatpush3.bf16.msra.mxu1 %v1236_v50 }
  0x33   :  { %587 = vmatmul.mubr.bf16.gmra.mxu0 %v1215_v46 }
  0x34   :  { %675 = vmatmul.mubr.bf16.gmra.mxu1 %v1216_v47  ;;  %594 = vmatprep.mubr.bf16.mxu0 %v1217_v48 }
  0x35   :  { %682 = vmatprep.mubr.bf16.mxu1 %v1219_v49 }
  0x3b   :  { %595 = vmatmul.mubr.bf16.gmra.mxu0 %v1221_v51 }
  0x3c   :  { %683 = vmatmul.mubr.bf16.gmra.mxu1 %v1222_v52  ;;  %602 = vmatprep.mubr.bf16.mxu0 %v1224_v53 }
  0x3d   :  { %690 = vmatprep.mubr.bf16.mxu1 %v1226_v54 }
  0x43   :  { %603 = vmatmul.mubr.bf16.gmra.mxu0 %v1228_v55 }
  0x44   :  { %691 = vmatmul.mubr.bf16.gmra.mxu1 %v1229_v56  ;;  %610 = vmatprep.mubr.bf16.mxu0 %v1230_v57 }
  0x45   :  { %698 = vmatprep.mubr.bf16.mxu1 %v1232_v58 }
  0x4b   :  { %611 = vmatmul.mubr.bf16.gmra.mxu0 %v1234_v61 }
  0x4c   :  { %699 = vmatmul.mubr.bf16.gmra.mxu1 %v1235_v62  ;;  %618 = vmatprep.mubr.bf16.mxu0 %v919_v63 }
  0x4d   :  { %706 = vmatprep.mubr.bf16.mxu1 %v921_v0 }
  0x53   :  { %619 = vmatmul.mubr.bf16.gmra.mxu0 %v918_v1 }
  0x54   :  { %707 = vmatmul.mubr.bf16.gmra.mxu1 %v920_v2  ;;  %1127 = vmatprep.mubr.msk.bf16.mxu0 %vm1249_vm0, %v1248_v34 }
  0x55   :  { %1143 = vmatprep.mubr.msk.bf16.mxu1 %vm1249_vm0, %v1248_v34 }
  0x5b   :  { %1128 = vmatmul.mubr.msk.bf16.vlgmr.msra.gmra.mxu0 %vm516_vm1, %v1241_v3 }
  0x5c   :  { %1144 = vmatmul.mubr.msk.bf16.vlgmr.msra.gmra.mxu1 %vm516_vm1, %v1242_v4  ;;  %1131 = vmatprep.mubr.msk.bf16.mxu0 %vm1249_vm0, %v1248_v34 }
  0x5d   :  { %1147 = vmatprep.mubr.msk.bf16.mxu1 %vm1249_vm0, %v1248_v34 }
  0x63   :  { %1132 = vmatmul.mubr.msk.bf16.gmra.mxu0 %vm516_vm1, %v1243_v5 }
  0x64   :  { %1148 = vmatmul.mubr.msk.bf16.gmra.mxu1 %vm516_vm1, %v1244_v6  ;;  %1135 = vmatprep.mubr.msk.bf16.mxu0 %vm1249_vm0, %v1248_v34 }
  0x65   :  { %1151 = vmatprep.mubr.msk.bf16.mxu1 %vm1249_vm0, %v1248_v34 }
  0x6b   :  { %1136 = vmatmul.mubr.msk.bf16.gmra.mxu0 %vm516_vm1, %v1245_v7 }
  0x6c   :  { %1152 = vmatmul.mubr.msk.bf16.gmra.mxu1 %vm516_vm1, %v1246_v8  ;;  %1139 = vmatprep.mubr.msk.bf16.mxu0 %vm1249_vm0, %v1248_v34 }
  0x73   :  { %1140 = vmatmul.mubr.msk.bf16.gmra.mxu0 %vm516_vm1, %v1247_v9 }
  0xe3   :  { %v1008_v10 = vpop.f32.mrf.mxu0 }
  0xe4   :  { %v1066_v11 = vpop.f32.mrf.mxu1 }
  0xe5   :  { %v1009_v12 = vpop.f32.mrf.mxu0 }
  0xe6   :  { %v1067_v13 = vpop.f32.mrf.mxu1  ;;  %v1010_v57 = vadd.f32 %v1009_v12, %v1008_v10 }
  0xe7   :  { %v1011_v14 = vpop.f32.mrf.mxu0  ;;  %v1068_v2 = vadd.f32 %v1067_v13, %v1066_v11 }
  0xe8   :  { %v1069_v15 = vpop.f32.mrf.mxu1  ;;  %v573_v1 = vadd.f32 %v1010_v57, %v1553_v59 }
  0xe9   :  { %v1012_v16 = vpop.f32.mrf.mxu0 }
  0xea   :  { %v1070_v17 = vpop.f32.mrf.mxu1  ;;  %v1013_v63 = vadd.f32 %v1012_v16, %v1011_v14  ;;  %v661_v14 = vadd.f32 %v1068_v2, %v573_v1 }
  0xeb   :  { %v1014_v18 = vpop.f32.mrf.mxu0  ;;  %v1071_v10 = vadd.f32 %v1070_v17, %v1069_v15 }
  0xec   :  { %v1506_v19 = vpop.f32.mrf.mxu1  ;;  %v576_v9 = vadd.f32 %v1013_v63, %v1553_v59 }
  0xed   :  { %v1015_v20 = vpop.f32.mrf.mxu0 }
  0xee   :  { %v1508_v21 = vpop.f32.mrf.mxu1  ;;  %v1016_v12 = vadd.f32 %v1015_v20, %v1014_v18  ;;  %v664_v15 = vadd.f32 %v1071_v10, %v576_v9 }
  0xef   :  { %v1510_v22 = vpop.f32.mrf.mxu0 }
  0xf0   :  { %v1512_v23 = vpop.f32.mrf.mxu1 }
  0xf1   :  { %v1514_v24 = vpop.f32.mrf.mxu0 }
  0xf2   :  { %v1516_v25 = vpop.f32.mrf.mxu1  ;;  %v1019_v17 = vadd.f32 %v1514_v24, %v1510_v22 }
  0xf3   :  { %v1518_v26 = vpop.f32.mrf.mxu0 }
  0xf4   :  { %v1520_v27 = vpop.f32.mrf.mxu1  ;;  %v584_v24 = vadd.f32 %v1019_v17, %v1553_v59 }
  0xf5   :  { %v1522_v28 = vpop.f32.mrf.mxu0 }
  0xf6   :  { %v1524_v29 = vpop.f32.mrf.mxu1 }
  0xf7   :  { %v1526_v30 = vpop.f32.mrf.mxu0 }
  0xf8   :  { %v1528_v31 = vpop.f32.mrf.mxu1 }
  0xf9   :  { %v1530_v32 = vpop.f32.mrf.mxu0 }
  0xfa   :  { %v1532_v33 = vpop.f32.mrf.mxu1 }
  0xfb   :  { %v1534_v34 = vpop.f32.mrf.mxu0 }
  0xfc   :  { %v1536_v35 = vpop.f32.mrf.mxu1 }
  0xfd   :  { %v1538_v36 = vpop.f32.mrf.mxu0 }
  0xfe   :  { %v1540_v37 = vpop.f32.mrf.mxu1 }
  0xff   :  { %v1542_v38 = vpop.f32.mrf.mxu0 }
 0x100   :  { %v1544_v39 = vpop.f32.mrf.mxu1 }
 0x101   :  { %1651 = vst [vmem:[#allocation2_spill] sm:$0xff] %v1544_v39  ;;  %v1546_v40 = vpop.f32.mrf.mxu0 }
 0x102   :  { %1652 = vst [vmem:[#allocation3_spill] sm:$0xff] %v1546_v40  ;;  %v1548_v41 = vpop.f32.mrf.mxu1 }
 0x103   :  { %1653 = vst [vmem:[#allocation4_spill] sm:$0xff] %v1548_v41  ;;  %v1032_v42 = vpop.f32.mrf.mxu0 }
 0x104   :  { %v1090_v43 = vpop.f32.mrf.mxu1 }
 0x105   :  { %v1033_v44 = vpop.f32.mrf.mxu0 }
 0x106   :  { %v1091_v45 = vpop.f32.mrf.mxu1  ;;  %v1034_v60 = vadd.f32 %v1033_v44, %v1032_v42 }
 0x107   :  { %v1035_v46 = vpop.f32.mrf.mxu0  ;;  %v1092_v5 = vadd.f32 %v1091_v45, %v1090_v43  ;;  %v581_v43 = vadd.f32 %v1016_v12, %v1553_v59  ;;  %v1074_v45 = vadd.f32 %v1508_v21, %v1506_v19  ;;  %v1077_v19 = vadd.f32 %v1516_v25, %v1512_v23 }
 0x108   :  { %v1093_v47 = vpop.f32.mrf.mxu1  ;;  %v605_v4 = vadd.f32 %v1034_v60, %v1553_v59 }
 0x109   :  { %v1036_v48 = vpop.f32.mrf.mxu0  ;;  %v669_v22 = vadd.f32 %v1074_v45, %v581_v43 }
 0x10a   :  { %v1094_v49 = vpop.f32.mrf.mxu1  ;;  %v1037_v6 = vadd.f32 %v1036_v48, %v1035_v46  ;;  %v693_v13 = vadd.f32 %v1092_v5, %v605_v4 }
 0x10b   :  { %v1038_v50 = vpop.f32.mrf.mxu0  ;;  %v1095_v57 = vadd.f32 %v1094_v49, %v1093_v47 }
 0x10c   :  { %v1096_v51 = vpop.f32.mrf.mxu1  ;;  %v608_v16 = vadd.f32 %v1037_v6, %v1553_v59 }
 0x10d   :  { %v1039_v52 = vpop.f32.mrf.mxu0 }
 0x10e   :  { %v1097_v53 = vpop.f32.mrf.mxu1  ;;  %v1040_v44 = vadd.f32 %v1039_v52, %v1038_v50  ;;  %v696_v60 = vadd.f32 %v1095_v57, %v608_v16 }
 0x10f   :  { %v1041_v54 = vpop.f32.mrf.mxu0  ;;  %v1098_v20 = vadd.f32 %v1097_v53, %v1096_v51 }
 0x110   :  { %v1099_v55 = vpop.f32.mrf.mxu1  ;;  %v613_v18 = vadd.f32 %v1040_v44, %v1553_v59 }
 0x111   :  { %v1042_v56 = vpop.f32.mrf.mxu0 }
 0x112   :  { %v1100_v58 = vpop.f32.mrf.mxu1  ;;  %v1043_v49 = vadd.f32 %v1042_v56, %v1041_v54  ;;  %v701_v54 = vadd.f32 %v1098_v20, %v613_v18 }
 0x113   :  { %v1044_v61 = vpop.f32.mrf.mxu0  ;;  %v1101_v23 = vadd.f32 %v1100_v58, %v1099_v55  ;;  %v1080_v55 = vadd.f32 %v1524_v29, %v1520_v27 }
 0x114   :  { %v1555_v62 = vpop.f32.mrf.mxu1  ;;  %v616_v56 = vadd.f32 %v1043_v49, %v1553_v59 }
 0x115   :  { %v1045_v0 = vpop.f32.mrf.mxu0 }
 0x116   :  { %v1558_v3 = vpop.f32.mrf.mxu1  ;;  %v1046_v25 = vadd.f32 %v1045_v0, %v1044_v61  ;;  %v672_v0 = vadd.f32 %v1077_v19, %v584_v24  ;;  %v704_v29 = vadd.f32 %v1101_v23, %v616_v56  ;;  %v1655_v24 = vld [vmem:[#allocation2_spill] sm:$0xff] }
 0x117   :  { %v1047_v7 = vpop.f32.mrf.mxu0 }
 0x118   :  { %v1105_v8 = vpop.f32.mrf.mxu1  ;;  %v621_v44 = vadd.f32 %v1046_v25, %v1553_v59 }
 0x119   :  { %v1048_v42 = vpop.f32.mrf.mxu0  ;;  %v1025_v8 = vadd.f32 %v1530_v32, %v1526_v30  ;;  %v1104_v30 = vadd.f32 %v1558_v3, %v1555_v62  ;;  %v1028_v62 = vadd.f32 %v1538_v36, %v1534_v34 }
 0x11a   :  { %v1106_v41 = vpop.f32.mrf.mxu1 }
 0x11b   :  { %v748_v11 = vpop.f32.mrf.mxu0  ;;  %v709_v17 = vadd.f32 %v1104_v30, %v621_v44 }
 0x11c   :  { %v749_v39 = vadd.f32 %v748_v11, %v661_v14  ;;  %v780_v40 = vpop.f32.mrf.mxu1  ;;  %v592_v11 = vadd.f32 %v1025_v8, %v1553_v59 }
 0x11d   :  { %v781_v46 = vadd.f32 %v780_v40, %v693_v13  ;;  %v1129_v48 = vpop.f32.mrf.mxu0  ;;  %v1083_v13 = vadd.f32 %v1532_v33, %v1528_v31 }
 0x11e   :  { %v802_v41 = vmax.f32 %v749_v39, 0.0  ;;  %v1145_v47 = vpop.f32.mrf.mxu1  ;;  %v1022_v39 = vadd.f32 %v1522_v28, %v1518_v26 }
 0x11f   :  { %v810_v50 = vmax.f32 %v781_v46, 0.0  ;;  %v751_v52 = vpop.f32.mrf.mxu0  ;;  %v680_v49 = vadd.f32 %v1083_v13, %v592_v11 }
 0x120   :  { %v979_v63 = vpack.c.bf16 %v802_v41, %v802_v41  ;;  %v752_v1 = vadd.f32 %v751_v52, %v664_v15  ;;  %v783_v2 = vpop.f32.mrf.mxu1  ;;  %v589_v42 = vadd.f32 %v1022_v39, %v1553_v59  ;;  %v1086_v52 = vadd.f32 %v1540_v37, %v1536_v35  ;;  %v1656_v39 = vld [vmem:[#allocation4_spill] sm:$0xff] }
 0x121   :  { %v987_v21 = vpack.c.bf16 %v810_v50, %v810_v50  ;;  %v784_v40 = vadd.f32 %v783_v2, %v696_v60  ;;  %v1130_v4 = vpop.f32.mrf.mxu0  ;;  %v597_v50 = vadd.f32 %v1028_v62, %v1553_v59  ;;  %v1654_v60 = vld [vmem:[#allocation3_spill] sm:$0xff] }
 0x122   :  { %869 = vst.msk [vmem:[%s1650_s3] sm:$0xf] %vm868_vm2, %v979_v63  ;;  %v803_v51 = vmax.f32 %v752_v1, 0.0  ;;  %v1146_v53 = vpop.f32.mrf.mxu1  ;;  %v677_v15 = vadd.f32 %v1080_v55, %v589_v42  ;;  %v1031_v63 = vadd.f32 %v1654_v60, %v1542_v38 }
 0x123   :  { %877 = vst.msk [vmem:[%s1650_s3 + $0x20] sm:$0xf] %vm868_vm2, %v987_v21  ;;  %v811_v5 = vmax.f32 %v784_v40, 0.0  ;;  %v756_v6 = vpop.f32.mrf.mxu0 }
 0x124   :  { %v980_v26 = vpack.c.bf16 %v803_v51, %v803_v51  ;;  %v757_v28 = vadd.f32 %v756_v6, %v669_v22  ;;  %v788_v7 = vpop.f32.mrf.mxu1  ;;  %v600_v22 = vadd.f32 %v1031_v63, %v1553_v59  ;;  %v1089_v51 = vadd.f32 %v1656_v39, %v1655_v24 }
 0x125   :  { %v988_v9 = vpack.c.bf16 %v811_v5, %v811_v5  ;;  %v789_v10 = vadd.f32 %v788_v7, %v701_v54  ;;  %v1133_v12 = vpop.f32.mrf.mxu0  ;;  %v685_v54 = vadd.f32 %v1086_v52, %v597_v50 }
 0x126   :  { %870 = vst.msk [vmem:[%s1650_s3 + $0x4] sm:$0xf] %vm868_vm2, %v980_v26  ;;  %v804_v58 = vmax.f32 %v757_v28, 0.0  ;;  %v1149_v61 = vpop.f32.mrf.mxu1  ;;  %v688_v26 = vadd.f32 %v1089_v51, %v600_v22 }
 0x127   :  { %878 = vst.msk [vmem:[%s1650_s3 + $0x24] sm:$0xf] %vm868_vm2, %v988_v9  ;;  %v812_v32 = vmax.f32 %v789_v10, 0.0  ;;  %v759_v27 = vpop.f32.mrf.mxu0 }
 0x128   :  { %v981_v14 = vpack.c.bf16 %v804_v58, %v804_v58  ;;  %v760_v16 = vadd.f32 %v759_v27, %v672_v0  ;;  %v791_v57 = vpop.f32.mrf.mxu1 }
 0x129   :  { %v989_v43 = vpack.c.bf16 %v812_v32, %v812_v32  ;;  %v792_v45 = vadd.f32 %v791_v57, %v704_v29  ;;  %v1134_v46 = vpop.f32.mrf.mxu0 }
 0x12a   :  { %871 = vst.msk [vmem:[%s1650_s3 + $0x8] sm:$0xf] %vm868_vm2, %v981_v14  ;;  %v805_v3 = vmax.f32 %v760_v16, 0.0  ;;  %v1150_v48 = vpop.f32.mrf.mxu1 }
 0x12b   :  { %879 = vst.msk [vmem:[%s1650_s3 + $0x28] sm:$0xf] %vm868_vm2, %v989_v43  ;;  %v813_v31 = vmax.f32 %v792_v45, 0.0  ;;  %v764_v33 = vpop.f32.mrf.mxu0 }
 0x12c   :  { %v982_v18 = vpack.c.bf16 %v805_v3, %v805_v3  ;;  %v765_v20 = vadd.f32 %v764_v33, %v677_v15  ;;  %v796_v41 = vpop.f32.mrf.mxu1 }
 0x12d   :  { %v990_v34 = vpack.c.bf16 %v813_v31, %v813_v31  ;;  %v797_v36 = vadd.f32 %v796_v41, %v709_v17  ;;  %v1137_v47 = vpop.f32.mrf.mxu0 }
 0x12e   :  { %872 = vst.msk [vmem:[%s1650_s3 + $0xc] sm:$0xf] %vm868_vm2, %v982_v18  ;;  %v806_v1 = vmax.f32 %v765_v20, 0.0  ;;  %v1153_v2 = vpop.f32.mrf.mxu1 }
 0x12f   :  { %880 = vst.msk [vmem:[%s1650_s3 + $0x2c] sm:$0xf] %vm868_vm2, %v990_v34  ;;  %v814_v19 = vmax.f32 %v797_v36, 0.0  ;;  %v767_v21 = vpop.f32.mrf.mxu0 }
 0x130   :  { %v983_v40 = vpack.c.bf16 %v806_v1, %v806_v1  ;;  %v768_v35 = vadd.f32 %v767_v21, %v680_v49  ;;  %v799_v37 = vpop.f32.mrf.mxu1 }
 0x131   :  { %v991_v4 = vpack.c.bf16 %v814_v19, %v814_v19  ;;  %v1138_v38 = vpop.f32.mrf.mxu0 }
 0x132   :  { %873 = vst.msk [vmem:[%s1650_s3 + $0x10] sm:$0xf] %vm868_vm2, %v983_v40  ;;  %v807_v53 = vmax.f32 %v768_v35, 0.0  ;;  %v1154_v56 = vpop.f32.mrf.mxu1 }
 0x133   :  { %882 = vst.msk [vmem:[%s1650_s3 + $0x30] sm:$0x1] %vm881_vm3, %v991_v4  ;;  %v772_v23 = vpop.f32.mrf.mxu0 }
 0x134   :  { %v984_v25 = vpack.c.bf16 %v807_v53, %v807_v53  ;;  %v773_v5 = vadd.f32 %v772_v23, %v685_v54 }
 0x135   :  { %v1141_v6 = vpop.f32.mrf.mxu0 }
 0x136   :  { %874 = vst.msk [vmem:[%s1650_s3 + $0x14] sm:$0xf] %vm868_vm2, %v984_v25  ;;  %v808_v59 = vmax.f32 %v773_v5, 0.0 }
 0x137   :  { %v775_v28 = vpop.f32.mrf.mxu0 }
 0x138   :  { %v985_v7 = vpack.c.bf16 %v808_v59, %v808_v59  ;;  %v776_v8 = vadd.f32 %v775_v28, %v688_v26 }
 0x139   :  { %v1142_v9 = vpop.f32.mrf.mxu0 }
 0x13a   :  { %875 = vst.msk [vmem:[%s1650_s3 + $0x18] sm:$0xf] %vm868_vm2, %v985_v7  ;;  %v809_v10 = vmax.f32 %v776_v8, 0.0 }
 0x13c   :  { %v986_v12 = vpack.c.bf16 %v809_v10, %v809_v10 }
 0x13e   :  { %876 = vst.msk [vmem:[%s1650_s3 + $0x1c] sm:$0xf] %vm868_vm2, %v986_v12 }

// kernel: cnn_actor_critic_forward.7
= control target key start
LH: loop header
LB: loop body
LE: loop exit
PB: predicated region body
PF: predicated region fallthrough
CT: control target
= control target key end

     0   :  { %v440_v36 = vlaneseq  ;;  %v7917_v37 = vmov 1966171168   ;;  %vm2599_vm0 = vcmask 523264   ;;  %s10411_s0 = inlined_call_operand.vmem [shape: bf16[2,3136], index: 0, kind: input, shape index: {}]   ;;  %s10412_s1 = inlined_call_operand.vmem [shape: bf16[3136,256], index: 1, kind: input, shape index: {}]   ;;  %s10413_s2 = inlined_call_operand.vmem [shape: f32[1,256], index: 2, kind: input, shape index: {}]   ;;  %s10414_s3 = inlined_call_operand.vmem [shape: bf16[256,448], index: 3, kind: input, shape index: {}]   ;;  %s10415_s4 = inlined_call_operand.vmem [shape: f32[1,448], index: 4, kind: input, shape index: {}]   ;;  %s10416_s5 = inlined_call_operand.vmem [shape: bf16[448,448], index: 5, kind: input, shape index: {}]   ;;  %s10417_s6 = inlined_call_operand.vmem [shape: f32[1,448], index: 6, kind: input, shape index: {}]   ;;  %s10418_s7 = inlined_call_operand.vmem [shape: bf16[448,448], index: 7, kind: input, shape index: {}]   ;;  %s10419_s8 = inlined_call_operand.vmem [shape: f32[1,448], index: 8, kind: input, shape index: {}]   ;;  %s10420_s9 = inlined_call_operand.vmem [shape: bf16[448,128], index: 9, kind: input, shape index: {}]   ;;  %s10421_s10 = inlined_call_operand.vmem [shape: f32[1,128], index: 10, kind: input, shape index: {}]   ;;  %s10422_s11 = inlined_call_operand.hbm [shape: f32[2,128], index: 11, kind: output, shape index: {0}]   ;;  %s10423_s12 = inlined_call_operand.vmem [shape: f32[2,128], index: 12, kind: output, shape index: {1}]  }
   0x1   :  { %v6816_v0 = vld [vmem:[%s10412_s1 + $0x74] ss:$8 sps:$4 sm:$0xff]   ;;  %v6820_v2 = vld [vmem:[%s10412_s1 + $0x70] ss:$8 sps:$4 sm:$0xff]   ;;  %v6822_v4 = vld [vmem:[%s10412_s1 + $0x64] ss:$8 sps:$4 sm:$0xff]   ;;  %v456_v38 = vunpack.c.l.s4 %v7917_v37 }
   0x2   :  { %v6818_v1 = vld [vmem:[%s10412_s1 + $0x174] ss:$8 sps:$4 sm:$0xff]   ;;  %2603 = vmatprep.subr.bf16.mxu0 %v6816_v0  ;;  %v6821_v3 = vld [vmem:[%s10412_s1 + $0x170] ss:$8 sps:$4 sm:$0xff]   ;;  %v6824_v5 = vld [vmem:[%s10412_s1 + $0x164] ss:$8 sps:$4 sm:$0xff]  }
   0x3   :  { %2644 = vmatprep.subr.bf16.mxu1 %v6818_v1  ;;  %2604 = vmatpush1.bf16.msra.mxu0 %v6820_v2  ;;  %v6826_v6 = vld [vmem:[%s10412_s1 + $0x60] ss:$8 sps:$4 sm:$0xff]   ;;  %v6828_v8 = vld [vmem:[%s10412_s1 + $0x54] ss:$8 sps:$4 sm:$0xff]   ;;  %v6832_v10 = vld [vmem:[%s10412_s1 + $0x50] ss:$8 sps:$4 sm:$0xff]   ;;  %v457_v43 = vunpack.c.0.s8 %v456_v38 }
   0x4   :  { %2645 = vmatpush1.bf16.msra.mxu1 %v6821_v3  ;;  %2605 = vmatprep.subr.bf16.mxu0 %v6822_v4  ;;  %v6827_v7 = vld [vmem:[%s10412_s1 + $0x160] ss:$8 sps:$4 sm:$0xff]   ;;  %v6830_v9 = vld [vmem:[%s10412_s1 + $0x154] ss:$8 sps:$4 sm:$0xff]   ;;  %v6833_v11 = vld [vmem:[%s10412_s1 + $0x150] ss:$8 sps:$4 sm:$0xff]  }
   0x5   :  { %2646 = vmatprep.subr.bf16.mxu1 %v6824_v5  ;;  %v6834_v12 = vld [vmem:[%s10412_s1 + $0x44] ss:$8 sps:$4 sm:$0xff]   ;;  %v6838_v14 = vld [vmem:[%s10412_s1 + $0x40] ss:$8 sps:$4 sm:$0xff]   ;;  %v6840_v16 = vld [vmem:[%s10412_s1 + $0x34] ss:$8 sps:$4 sm:$0xff]  }
   0x6   :  { %v6836_v13 = vld [vmem:[%s10412_s1 + $0x144] ss:$8 sps:$4 sm:$0xff]   ;;  %v6839_v15 = vld [vmem:[%s10412_s1 + $0x140] ss:$8 sps:$4 sm:$0xff]   ;;  %v6842_v17 = vld [vmem:[%s10412_s1 + $0x134] ss:$8 sps:$4 sm:$0xff]  }
   0x7   :  { %2606 = vmatpush1.bf16.msra.mxu0 %v6826_v6  ;;  %v6844_v18 = vld [vmem:[%s10412_s1 + $0x30] ss:$8 sps:$4 sm:$0xff]   ;;  %v6846_v20 = vld [vmem:[%s10412_s1 + $0x24] ss:$8 sps:$4 sm:$0xff]   ;;  %v6850_v22 = vld [vmem:[%s10412_s1 + $0x20] ss:$8 sps:$4 sm:$0xff]  }
   0x8   :  { %2647 = vmatpush1.bf16.msra.mxu1 %v6827_v7  ;;  %2607 = vmatprep.subr.bf16.mxu0 %v6828_v8  ;;  %v6845_v19 = vld [vmem:[%s10412_s1 + $0x130] ss:$8 sps:$4 sm:$0xff]   ;;  %v6848_v21 = vld [vmem:[%s10412_s1 + $0x124] ss:$8 sps:$4 sm:$0xff]   ;;  %v6851_v23 = vld [vmem:[%s10412_s1 + $0x120] ss:$8 sps:$4 sm:$0xff]  }
   0x9   :  { %2648 = vmatprep.subr.bf16.mxu1 %v6830_v9  ;;  %v6852_v24 = vld [vmem:[%s10412_s1 + $0x14] ss:$8 sps:$4 sm:$0xff]   ;;  %v6856_v26 = vld [vmem:[%s10412_s1 + $0x10] ss:$8 sps:$4 sm:$0xff]   ;;  %v6858_v28 = vld [vmem:[%s10412_s1 + $0x4] ss:$8 sps:$4 sm:$0xff]  }
   0xa   :  { %v6854_v25 = vld [vmem:[%s10412_s1 + $0x114] ss:$8 sps:$4 sm:$0xff]   ;;  %v6857_v27 = vld [vmem:[%s10412_s1 + $0x110] ss:$8 sps:$4 sm:$0xff]   ;;  %v6860_v29 = vld [vmem:[%s10412_s1 + $0x104] ss:$8 sps:$4 sm:$0xff]  }
   0xb   :  { %2608 = vmatpush1.bf16.msra.mxu0 %v6832_v10  ;;  %v6862_v30 = vld [vmem:[%s10412_s1] ss:$8 sps:$4 sm:$0xff]   ;;  %v6864_v32 = vld [vmem:[%s10412_s1 + $0xf4] ss:$8 sps:$4 sm:$0xff]   ;;  %v6868_v34 = vld [vmem:[%s10412_s1 + $0xf0] ss:$8 sps:$4 sm:$0xff]  }
   0xc   :  { %2649 = vmatpush1.bf16.msra.mxu1 %v6833_v11  ;;  %2609 = vmatprep.subr.bf16.mxu0 %v6834_v12  ;;  %v6863_v31 = vld [vmem:[%s10412_s1 + $0x100] ss:$8 sps:$4 sm:$0xff]   ;;  %v6866_v33 = vld [vmem:[%s10412_s1 + $0x1f4] ss:$8 sps:$4 sm:$0xff]   ;;  %v6869_v35 = vld [vmem:[%s10412_s1 + $0x1f0] ss:$8 sps:$4 sm:$0xff]  }
   0xd   :  { %2650 = vmatprep.subr.bf16.mxu1 %v6836_v13  ;;  %v6870_v39 = vld [vmem:[%s10412_s1 + $0xe4] ss:$8 sps:$4 sm:$0xff]   ;;  %v6874_v41 = vld [vmem:[%s10412_s1 + $0xe0] ss:$8 sps:$4 sm:$0xff]   ;;  %v8102_v42 = vshrl.u32 %v440_v36, 7 }
   0xe   :  { %v6872_v40 = vld [vmem:[%s10412_s1 + $0x1e4] ss:$8 sps:$4 sm:$0xff]   ;;  %v6875_v44 = vld [vmem:[%s10412_s1 + $0x1e0] ss:$8 sps:$4 sm:$0xff]   ;;  %v6876_v45 = vld [vmem:[%s10412_s1 + $0xd4] ss:$8 sps:$4 sm:$0xff]  }
   0xf   :  { %2610 = vmatpush1.bf16.msra.mxu0 %v6838_v14  ;;  %v6878_v46 = vld [vmem:[%s10412_s1 + $0x1d4] ss:$8 sps:$4 sm:$0xff]   ;;  %v6880_v47 = vld [vmem:[%s10412_s1 + $0xd0] ss:$8 sps:$4 sm:$0xff]   ;;  %v8120_v49 = vsub.s32 %v457_v43, %v8102_v42  ;;  %v6882_v50 = vld [vmem:[%s10412_s1 + $0xc4] ss:$8 sps:$4 sm:$0xff]  }
  0x10   :  { %2651 = vmatpush1.bf16.msra.mxu1 %v6839_v15  ;;  %2611 = vmatprep.subr.bf16.mxu0 %v6840_v16  ;;  %v6881_v48 = vld [vmem:[%s10412_s1 + $0x1d0] ss:$8 sps:$4 sm:$0xff]   ;;  %v6884_v51 = vld [vmem:[%s10412_s1 + $0x1c4] ss:$8 sps:$4 sm:$0xff]   ;;  %v6886_v53 = vld [vmem:[%s10412_s1 + $0xc0] ss:$8 sps:$4 sm:$0xff]  }
  0x11   :  { %2652 = vmatprep.subr.bf16.mxu1 %v6842_v17  ;;  %v42_v52 = vld [vmem:[%s10411_s0] sm:$0xff]  ;;  %v6888_v56 = vld [vmem:[%s10412_s1 + $0xb4] ss:$8 sps:$4 sm:$0xff]   ;;  %v6892_v59 = vld [vmem:[%s10412_s1 + $0xb0] ss:$8 sps:$4 sm:$0xff]  }
  0x12   :  { %v461_v54 = vrot.slane %v42_v52, %v8120_v49  ;;  %v6887_v55 = vld [vmem:[%s10412_s1 + $0x1c0] ss:$8 sps:$4 sm:$0xff]   ;;  %v6890_v57 = vld [vmem:[%s10412_s1 + $0x1b4] ss:$8 sps:$4 sm:$0xff]   ;;  %v6893_v61 = vld [vmem:[%s10412_s1 + $0x1b0] ss:$8 sps:$4 sm:$0xff]   ;;  %v454_v1 = vcombine.high %v42_v52, %v42_v52 }
  0x13   :  { %2612 = vmatpush1.bf16.msra.mxu0 %v6844_v18  ;;  %v6894_v62 = vld [vmem:[%s10412_s1 + $0xa4] ss:$8 sps:$4 sm:$0xff]   ;;  %v6898_v2 = vld [vmem:[%s10412_s1 + $0xa0] ss:$8 sps:$4 sm:$0xff]   ;;  %v6900_v4 = vld [vmem:[%s10412_s1 + $0x94] ss:$8 sps:$4 sm:$0xff]  }
  0x14   :  { %2653 = vmatpush1.bf16.msra.mxu1 %v6845_v19  ;;  %2613 = vmatprep.subr.bf16.mxu0 %v6846_v20  ;;  %v469_v58 = vcombine.high %v461_v54, %v461_v54  ;;  %v6896_v63 = vld [vmem:[%s10412_s1 + $0x1a4] ss:$8 sps:$4 sm:$0xff]   ;;  %v6899_v3 = vld [vmem:[%s10412_s1 + $0x1a0] ss:$8 sps:$4 sm:$0xff]   ;;  %v6902_v5 = vld [vmem:[%s10412_s1 + $0x194] ss:$8 sps:$4 sm:$0xff]   ;;  %v8170_v6 = vrot.slane %v454_v1, %v8120_v49  ;;  %v477_v13 = vrot.slane %v461_v54, %v8120_v49 }
  0x15   :  { %2654 = vmatprep.subr.bf16.mxu1 %v6848_v21  ;;  %v6904_v7 = vld [vmem:[%s10412_s1 + $0x90] ss:$8 sps:$4 sm:$0xff]   ;;  %v6906_v9 = vld [vmem:[%s10412_s1 + $0x84] ss:$8 sps:$4 sm:$0xff]   ;;  %v6910_v12 = vld [vmem:[%s10412_s1 + $0x80] ss:$8 sps:$4 sm:$0xff]  }
  0x16   :  { %v491_v60 = vrot.slane %v469_v58, %v8120_v49  ;;  %v6905_v8 = vld [vmem:[%s10412_s1 + $0x190] ss:$8 sps:$4 sm:$0xff]   ;;  %v6908_v10 = vld [vmem:[%s10412_s1 + $0x184] ss:$8 sps:$4 sm:$0xff]   ;;  %v470_v11 = vcombine.high %v8170_v6, %v8170_v6  ;;  %v6911_v14 = vld [vmem:[%s10412_s1 + $0x180] ss:$8 sps:$4 sm:$0xff]   ;;  %v499_v18 = vcombine.high %v477_v13, %v477_v13 }
  0x17   :  { %2614 = vmatpush1.bf16.msra.mxu0 %v6850_v22  ;;  %v6915_v15 = vld [vmem:[%s10412_s1 + $0x274] ss:$8 sps:$4 sm:$0xff]   ;;  %v6913_v19 = vld [vmem:[%s10412_s1 + $0x270] ss:$8 sps:$4 sm:$0xff]   ;;  %v6921_v21 = vld [vmem:[%s10412_s1 + $0x264] ss:$8 sps:$4 sm:$0xff]  }
  0x18   :  { %2655 = vmatpush1.bf16.msra.mxu1 %v6851_v23  ;;  %2615 = vmatprep.subr.bf16.mxu0 %v6852_v24  ;;  %v501_v0 = vcombine.high %v491_v60, %v491_v60  ;;  %v6918_v16 = vld [vmem:[%s10412_s1 + $0x374] ss:$8 sps:$4 sm:$0xff]   ;;  %v498_v17 = vrot.slane %v470_v11, %v8120_v49  ;;  %v6916_v20 = vld [vmem:[%s10412_s1 + $0x370] ss:$8 sps:$4 sm:$0xff]   ;;  %v6924_v22 = vld [vmem:[%s10412_s1 + $0x364] ss:$8 sps:$4 sm:$0xff]  }
  0x19   :  { %2656 = vmatprep.subr.bf16.mxu1 %v6854_v25  ;;  %2635 = vmatprep.mubr.bf16.mxu0 %v491_v60  ;;  %v6919_v24 = vld [vmem:[%s10412_s1 + $0x260] ss:$8 sps:$4 sm:$0xff]   ;;  %v6937_v36 = vld [vmem:[%s10412_s1 + $0x230] ss:$8 sps:$4 sm:$0xff]   ;;  %v6945_v38 = vld [vmem:[%s10412_s1 + $0x224] ss:$8 sps:$4 sm:$0xff]  }
  0x1a   :  { %2676 = vmatprep.mubr.bf16.mxu1 %v501_v0  ;;  %v502_v23 = vcombine.high %v498_v17, %v498_v17  ;;  %v6922_v25 = vld [vmem:[%s10412_s1 + $0x360] ss:$8 sps:$4 sm:$0xff]   ;;  %v6940_v37 = vld [vmem:[%s10412_s1 + $0x330] ss:$8 sps:$4 sm:$0xff]   ;;  %v6951_v43 = vld [vmem:[%s10412_s1 + $0x214] ss:$8 sps:$4 sm:$0xff]  }
  0x1b   :  { %2616 = vmatpush1.bf16.msra.mxu0 %v6856_v26  ;;  %v6927_v26 = vld [vmem:[%s10412_s1 + $0x254] ss:$8 sps:$4 sm:$0xff]   ;;  %v6961_v54 = vld [vmem:[%s10412_s1 + $0x2f0] ss:$8 sps:$4 sm:$0xff]   ;;  %v6967_v58 = vld [vmem:[%s10412_s1 + $0x2e0] ss:$8 sps:$4 sm:$0xff]  }
  0x1c   :  { %2657 = vmatpush1.bf16.msra.mxu1 %v6857_v27  ;;  %2617 = vmatprep.subr.bf16.mxu0 %v6858_v28  ;;  %v6930_v27 = vld [vmem:[%s10412_s1 + $0x354] ss:$8 sps:$4 sm:$0xff]   ;;  %v6925_v28 = vld [vmem:[%s10412_s1 + $0x250] ss:$8 sps:$4 sm:$0xff]   ;;  %v6981_v0 = vld [vmem:[%s10412_s1 + $0x2c4] ss:$8 sps:$4 sm:$0xff]  }
  0x1d   :  { %2658 = vmatprep.subr.bf16.mxu1 %v6860_v29  ;;  %v6928_v29 = vld [vmem:[%s10412_s1 + $0x350] ss:$8 sps:$4 sm:$0xff]   ;;  %v6963_v52 = vld [vmem:[%s10412_s1 + $0x2f4] ss:$8 sps:$4 sm:$0xff]   ;;  %v6984_v1 = vld [vmem:[%s10412_s1 + $0x3c4] ss:$8 sps:$4 sm:$0xff]  }
  0x1e   :  { %v6975_v60 = vld [vmem:[%s10412_s1 + $0x2d4] ss:$8 sps:$4 sm:$0xff]   ;;  %v6991_v11 = vld [vmem:[%s10412_s1 + $0x2a0] ss:$8 sps:$4 sm:$0xff]  }
  0x1f   :  { %2618 = vmatpush1.bf16.msra.mxu0 %v6862_v30  ;;  %v6933_v30 = vld [vmem:[%s10412_s1 + $0x244] ss:$8 sps:$4 sm:$0xff]  }
  0x20   :  { %2659 = vmatpush1.bf16.msra.mxu1 %v6863_v31  ;;  %2619 = vmatprep.subr.bf16.mxu0 %v6864_v32  ;;  %v6936_v31 = vld [vmem:[%s10412_s1 + $0x344] ss:$8 sps:$4 sm:$0xff]   ;;  %v6931_v32 = vld [vmem:[%s10412_s1 + $0x240] ss:$8 sps:$4 sm:$0xff]  }
  0x21   :  { %2660 = vmatprep.subr.bf16.mxu1 %v6866_v33  ;;  %v6934_v33 = vld [vmem:[%s10412_s1 + $0x340] ss:$8 sps:$4 sm:$0xff]  }
  0x23   :  { %2620 = vmatpush2.bf16.msra.mxu0 %v6868_v34  ;;  %v6939_v34 = vld [vmem:[%s10412_s1 + $0x234] ss:$8 sps:$4 sm:$0xff]  }
  0x24   :  { %2661 = vmatpush2.bf16.msra.mxu1 %v6869_v35  ;;  %2621 = vmatprep.subr.bf16.mxu0 %v6870_v39  ;;  %v6942_v35 = vld [vmem:[%s10412_s1 + $0x334] ss:$8 sps:$4 sm:$0xff]   ;;  %v6948_v39 = vld [vmem:[%s10412_s1 + $0x324] ss:$8 sps:$4 sm:$0xff]  }
  0x25   :  { %2662 = vmatprep.subr.bf16.mxu1 %v6872_v40  ;;  %v6943_v40 = vld [vmem:[%s10412_s1 + $0x220] ss:$8 sps:$4 sm:$0xff]  }
  0x27   :  { %2622 = vmatpush2.bf16.msra.mxu0 %v6874_v41  ;;  %v6946_v41 = vld [vmem:[%s10412_s1 + $0x320] ss:$8 sps:$4 sm:$0xff]  }
  0x28   :  { %2663 = vmatpush2.bf16.msra.mxu1 %v6875_v44  ;;  %2623 = vmatprep.subr.bf16.mxu0 %v6876_v45  ;;  %v6954_v44 = vld [vmem:[%s10412_s1 + $0x314] ss:$8 sps:$4 sm:$0xff]   ;;  %v6949_v45 = vld [vmem:[%s10412_s1 + $0x210] ss:$8 sps:$4 sm:$0xff]  }
  0x29   :  { %2664 = vmatprep.subr.bf16.mxu1 %v6878_v46  ;;  %v6952_v46 = vld [vmem:[%s10412_s1 + $0x310] ss:$8 sps:$4 sm:$0xff]  }
  0x2b   :  { %2624 = vmatpush2.bf16.msra.mxu0 %v6880_v47  ;;  %v6957_v47 = vld [vmem:[%s10412_s1 + $0x204] ss:$8 sps:$4 sm:$0xff]  }
  0x2c   :  { %2665 = vmatpush2.bf16.msra.mxu1 %v6881_v48  ;;  %2625 = vmatprep.subr.bf16.mxu0 %v6882_v50  ;;  %v6960_v48 = vld [vmem:[%s10412_s1 + $0x304] ss:$8 sps:$4 sm:$0xff]   ;;  %v6955_v50 = vld [vmem:[%s10412_s1 + $0x200] ss:$8 sps:$4 sm:$0xff]  }
  0x2d   :  { %2666 = vmatprep.subr.bf16.mxu1 %v6884_v51  ;;  %v6958_v51 = vld [vmem:[%s10412_s1 + $0x300] ss:$8 sps:$4 sm:$0xff]  }
  0x2f   :  { %2626 = vmatpush2.bf16.msra.mxu0 %v6886_v53  ;;  %v6966_v53 = vld [vmem:[%s10412_s1 + $0x3f4] ss:$8 sps:$4 sm:$0xff]  }
  0x30   :  { %2667 = vmatpush2.bf16.msra.mxu1 %v6887_v55  ;;  %2627 = vmatprep.subr.bf16.mxu0 %v6888_v56  ;;  %v6964_v55 = vld [vmem:[%s10412_s1 + $0x3f0] ss:$8 sps:$4 sm:$0xff]   ;;  %v6969_v56 = vld [vmem:[%s10412_s1 + $0x2e4] ss:$8 sps:$4 sm:$0xff]  }
  0x31   :  { %2668 = vmatprep.subr.bf16.mxu1 %v6890_v57  ;;  %v6972_v57 = vld [vmem:[%s10412_s1 + $0x3e4] ss:$8 sps:$4 sm:$0xff]  }
  0x33   :  { %2628 = vmatpush2.bf16.msra.mxu0 %v6892_v59  ;;  %v6970_v59 = vld [vmem:[%s10412_s1 + $0x3e0] ss:$8 sps:$4 sm:$0xff]  }
  0x34   :  { %2669 = vmatpush2.bf16.msra.mxu1 %v6893_v61  ;;  %2629 = vmatprep.subr.bf16.mxu0 %v6894_v62  ;;  %v6978_v61 = vld [vmem:[%s10412_s1 + $0x3d4] ss:$8 sps:$4 sm:$0xff]   ;;  %v6973_v62 = vld [vmem:[%s10412_s1 + $0x2d0] ss:$8 sps:$4 sm:$0xff]  }
  0x35   :  { %2670 = vmatprep.subr.bf16.mxu1 %v6896_v63  ;;  %v6976_v63 = vld [vmem:[%s10412_s1 + $0x3d0] ss:$8 sps:$4 sm:$0xff]  }
  0x37   :  { %2630 = vmatpush2.bf16.msra.mxu0 %v6898_v2  ;;  %v6979_v2 = vld [vmem:[%s10412_s1 + $0x2c0] ss:$8 sps:$4 sm:$0xff]  }
  0x38   :  { %2671 = vmatpush2.bf16.msra.mxu1 %v6899_v3  ;;  %2631 = vmatprep.subr.bf16.mxu0 %v6900_v4  ;;  %v6982_v3 = vld [vmem:[%s10412_s1 + $0x3c0] ss:$8 sps:$4 sm:$0xff]   ;;  %v6987_v4 = vld [vmem:[%s10412_s1 + $0x2b4] ss:$8 sps:$4 sm:$0xff]  }
  0x39   :  { %2672 = vmatprep.subr.bf16.mxu1 %v6902_v5  ;;  %v6990_v5 = vld [vmem:[%s10412_s1 + $0x3b4] ss:$8 sps:$4 sm:$0xff]  }
  0x3b   :  { %2632 = vmatpush2.bf16.msra.mxu0 %v6904_v7  ;;  %v6985_v7 = vld [vmem:[%s10412_s1 + $0x2b0] ss:$8 sps:$4 sm:$0xff]  }
  0x3c   :  { %2673 = vmatpush2.bf16.msra.mxu1 %v6905_v8  ;;  %2633 = vmatprep.subr.bf16.mxu0 %v6906_v9  ;;  %v6988_v8 = vld [vmem:[%s10412_s1 + $0x3b0] ss:$8 sps:$4 sm:$0xff]   ;;  %v6993_v9 = vld [vmem:[%s10412_s1 + $0x2a4] ss:$8 sps:$4 sm:$0xff]  }
  0x3d   :  { %2674 = vmatprep.subr.bf16.mxu1 %v6908_v10  ;;  %v6996_v10 = vld [vmem:[%s10412_s1 + $0x3a4] ss:$8 sps:$4 sm:$0xff]  }
  0x3f   :  { %2634 = vmatpush2.bf16.msra.mxu0 %v6910_v12  ;;  %v6994_v12 = vld [vmem:[%s10412_s1 + $0x3a0] ss:$8 sps:$4 sm:$0xff]  }
  0x40   :  { %2675 = vmatpush2.bf16.msra.mxu1 %v6911_v14  ;;  %2685 = vmatprep.subr.bf16.mxu0 %v6915_v15  ;;  %v7002_v14 = vld [vmem:[%s10412_s1 + $0x394] ss:$8 sps:$4 sm:$0xff]   ;;  %v6997_v15 = vld [vmem:[%s10412_s1 + $0x290] ss:$8 sps:$4 sm:$0xff]  }
  0x41   :  { %2726 = vmatprep.subr.bf16.mxu1 %v6918_v16  ;;  %v7000_v16 = vld [vmem:[%s10412_s1 + $0x390] ss:$8 sps:$4 sm:$0xff]  }
  0x42   :  { %2636 = vmatmul.mubr.bf16.vlgmr.msra.gmra.mxu0 %v477_v13  ;;  %v6999_v13 = vld [vmem:[%s10412_s1 + $0x294] ss:$8 sps:$4 sm:$0xff]  }
  0x43   :  { %2677 = vmatmul.mubr.bf16.vlgmr.msra.gmra.mxu1 %v499_v18  ;;  %2686 = vmatpush1.bf16.msra.mxu0 %v6913_v19  ;;  %v7008_v18 = vld [vmem:[%s10412_s1 + $0x384] ss:$8 sps:$4 sm:$0xff]   ;;  %v7003_v19 = vld [vmem:[%s10412_s1 + $0x280] ss:$8 sps:$4 sm:$0xff]  }
  0x44   :  { %2727 = vmatpush1.bf16.msra.mxu1 %v6916_v20  ;;  %2687 = vmatprep.subr.bf16.mxu0 %v6921_v21  ;;  %v484_v20 = vrot.slane %v8170_v6, %v8120_v49  ;;  %v7006_v21 = vld [vmem:[%s10412_s1 + $0x380] ss:$8 sps:$4 sm:$0xff]   ;;  %v7009_v6 = vld [vmem:[%s10412_s1 + $0x470] ss:$8 sps:$4 sm:$0xff]  }
  0x45   :  { %2728 = vmatprep.subr.bf16.mxu1 %v6924_v22  ;;  %2717 = vmatprep.mubr.bf16.mxu0 %v498_v17  ;;  %v7005_v17 = vld [vmem:[%s10412_s1 + $0x284] ss:$8 sps:$4 sm:$0xff]   ;;  %v7011_v22 = vld [vmem:[%s10412_s1 + $0x474] ss:$8 sps:$4 sm:$0xff]  }
  0x46   :  { %2758 = vmatprep.mubr.bf16.mxu1 %v502_v23  ;;  %v7014_v23 = vld [vmem:[%s10412_s1 + $0x574] ss:$8 sps:$4 sm:$0xff]  }
  0x47   :  { %2688 = vmatpush1.bf16.msra.mxu0 %v6919_v24  ;;  %v500_v24 = vcombine.high %v484_v20, %v484_v20 }
  0x48   :  { %2729 = vmatpush1.bf16.msra.mxu1 %v6922_v25  ;;  %2689 = vmatprep.subr.bf16.mxu0 %v6927_v26  ;;  %v7012_v25 = vld [vmem:[%s10412_s1 + $0x570] ss:$8 sps:$4 sm:$0xff]   ;;  %v8403_v26 = vld [vmem:[%s10411_s0 + $0x8] sm:$0xff] }
  0x49   :  { %2730 = vmatprep.subr.bf16.mxu1 %v6930_v27  ;;  %v7017_v27 = vld [vmem:[%s10412_s1 + $0x464] ss:$8 sps:$4 sm:$0xff]  }
  0x4b   :  { %2690 = vmatpush1.bf16.msra.mxu0 %v6925_v28  ;;  %v7020_v28 = vld [vmem:[%s10412_s1 + $0x564] ss:$8 sps:$4 sm:$0xff]  }
  0x4c   :  { %2731 = vmatpush1.bf16.msra.mxu1 %v6928_v29  ;;  %2691 = vmatprep.subr.bf16.mxu0 %v6933_v30  ;;  %v8413_v29 = vrot.slane %v8403_v26, %v8120_v49 }
  0x4d   :  { %2732 = vmatprep.subr.bf16.mxu1 %v6936_v31  ;;  %v7015_v31 = vld [vmem:[%s10412_s1 + $0x460] ss:$8 sps:$4 sm:$0xff]  }
  0x4e   :  { %v518_v30 = vcombine.high %v8413_v29, %v8413_v29 }
  0x4f   :  { %2692 = vmatpush1.bf16.msra.mxu0 %v6931_v32  ;;  %v7018_v32 = vld [vmem:[%s10412_s1 + $0x560] ss:$8 sps:$4 sm:$0xff]  }
  0x50   :  { %2733 = vmatpush1.bf16.msra.mxu1 %v6934_v33  ;;  %2693 = vmatprep.subr.bf16.mxu0 %v6939_v34  ;;  %v7023_v33 = vld [vmem:[%s10412_s1 + $0x454] ss:$8 sps:$4 sm:$0xff]  }
  0x51   :  { %2734 = vmatprep.subr.bf16.mxu1 %v6942_v35  ;;  %v7026_v34 = vld [vmem:[%s10412_s1 + $0x554] ss:$8 sps:$4 sm:$0xff]   ;;  %v540_v35 = vrot.slane %v518_v30, %v8120_v49 }
  0x53   :  { %2694 = vmatpush1.bf16.msra.mxu0 %v6937_v36  ;;  %v550_v36 = vcombine.high %v540_v35, %v540_v35 }
  0x54   :  { %2735 = vmatpush1.bf16.msra.mxu1 %v6940_v37  ;;  %2695 = vmatprep.subr.bf16.mxu0 %v6945_v38  ;;  %v7021_v37 = vld [vmem:[%s10412_s1 + $0x450] ss:$8 sps:$4 sm:$0xff]  }
  0x55   :  { %2736 = vmatprep.subr.bf16.mxu1 %v6948_v39  ;;  %v7024_v38 = vld [vmem:[%s10412_s1 + $0x550] ss:$8 sps:$4 sm:$0xff]   ;;  %v7029_v39 = vld [vmem:[%s10412_s1 + $0x444] ss:$8 sps:$4 sm:$0xff]  }
  0x57   :  { %2696 = vmatpush1.bf16.msra.mxu0 %v6943_v40  ;;  %v7032_v40 = vld [vmem:[%s10412_s1 + $0x544] ss:$8 sps:$4 sm:$0xff]  }
  0x58   :  { %2737 = vmatpush1.bf16.msra.mxu1 %v6946_v41  ;;  %2697 = vmatprep.subr.bf16.mxu0 %v6951_v43  ;;  %v7027_v41 = vld [vmem:[%s10412_s1 + $0x440] ss:$8 sps:$4 sm:$0xff]  }
  0x59   :  { %2738 = vmatprep.subr.bf16.mxu1 %v6954_v44  ;;  %v7030_v43 = vld [vmem:[%s10412_s1 + $0x540] ss:$8 sps:$4 sm:$0xff]   ;;  %v7035_v44 = vld [vmem:[%s10412_s1 + $0x434] ss:$8 sps:$4 sm:$0xff]  }
  0x5b   :  { %2698 = vmatpush1.bf16.msra.mxu0 %v6949_v45  ;;  %v7038_v45 = vld [vmem:[%s10412_s1 + $0x534] ss:$8 sps:$4 sm:$0xff]  }
  0x5c   :  { %2739 = vmatpush1.bf16.msra.mxu1 %v6952_v46  ;;  %2699 = vmatprep.subr.bf16.mxu0 %v6957_v47  ;;  %v7033_v46 = vld [vmem:[%s10412_s1 + $0x430] ss:$8 sps:$4 sm:$0xff]  }
  0x5d   :  { %2740 = vmatprep.subr.bf16.mxu1 %v6960_v48  ;;  %v7036_v47 = vld [vmem:[%s10412_s1 + $0x530] ss:$8 sps:$4 sm:$0xff]   ;;  %v7041_v48 = vld [vmem:[%s10412_s1 + $0x424] ss:$8 sps:$4 sm:$0xff]  }
  0x5f   :  { %2700 = vmatpush1.bf16.msra.mxu0 %v6955_v50  ;;  %v7044_v50 = vld [vmem:[%s10412_s1 + $0x524] ss:$8 sps:$4 sm:$0xff]  }
  0x60   :  { %2741 = vmatpush1.bf16.msra.mxu1 %v6958_v51  ;;  %2701 = vmatprep.subr.bf16.mxu0 %v6963_v52  ;;  %v7039_v51 = vld [vmem:[%s10412_s1 + $0x420] ss:$8 sps:$4 sm:$0xff]  }
  0x61   :  { %2742 = vmatprep.subr.bf16.mxu1 %v6966_v53  ;;  %v7042_v52 = vld [vmem:[%s10412_s1 + $0x520] ss:$8 sps:$4 sm:$0xff]   ;;  %v7047_v53 = vld [vmem:[%s10412_s1 + $0x414] ss:$8 sps:$4 sm:$0xff]  }
  0x63   :  { %2702 = vmatpush2.bf16.msra.mxu0 %v6961_v54  ;;  %v7050_v54 = vld [vmem:[%s10412_s1 + $0x514] ss:$8 sps:$4 sm:$0xff]  }
  0x64   :  { %2743 = vmatpush2.bf16.msra.mxu1 %v6964_v55  ;;  %2703 = vmatprep.subr.bf16.mxu0 %v6969_v56  ;;  %v7045_v55 = vld [vmem:[%s10412_s1 + $0x410] ss:$8 sps:$4 sm:$0xff]  }
  0x65   :  { %2744 = vmatprep.subr.bf16.mxu1 %v6972_v57  ;;  %v7048_v56 = vld [vmem:[%s10412_s1 + $0x510] ss:$8 sps:$4 sm:$0xff]   ;;  %v7053_v57 = vld [vmem:[%s10412_s1 + $0x404] ss:$8 sps:$4 sm:$0xff]  }
  0x67   :  { %2704 = vmatpush2.bf16.msra.mxu0 %v6967_v58  ;;  %v7056_v58 = vld [vmem:[%s10412_s1 + $0x504] ss:$8 sps:$4 sm:$0xff]  }
  0x68   :  { %2745 = vmatpush2.bf16.msra.mxu1 %v6970_v59  ;;  %2705 = vmatprep.subr.bf16.mxu0 %v6975_v60  ;;  %v7051_v59 = vld [vmem:[%s10412_s1 + $0x400] ss:$8 sps:$4 sm:$0xff]  }
  0x69   :  { %2746 = vmatprep.subr.bf16.mxu1 %v6978_v61  ;;  %v7054_v60 = vld [vmem:[%s10412_s1 + $0x500] ss:$8 sps:$4 sm:$0xff]   ;;  %v7059_v61 = vld [vmem:[%s10412_s1 + $0x4f4] ss:$8 sps:$4 sm:$0xff]  }
  0x6b   :  { %2706 = vmatpush2.bf16.msra.mxu0 %v6973_v62  ;;  %v7062_v62 = vld [vmem:[%s10412_s1 + $0x5f4] ss:$8 sps:$4 sm:$0xff]  }
  0x6c   :  { %2747 = vmatpush2.bf16.msra.mxu1 %v6976_v63  ;;  %2707 = vmatprep.subr.bf16.mxu0 %v6981_v0  ;;  %v7057_v63 = vld [vmem:[%s10412_s1 + $0x4f0] ss:$8 sps:$4 sm:$0xff]  }
  0x6d   :  { %2748 = vmatprep.subr.bf16.mxu1 %v6984_v1  ;;  %v7060_v0 = vld [vmem:[%s10412_s1 + $0x5f0] ss:$8 sps:$4 sm:$0xff]   ;;  %v7065_v1 = vld [vmem:[%s10412_s1 + $0x4e4] ss:$8 sps:$4 sm:$0xff]  }
  0x6f   :  { %2708 = vmatpush2.bf16.msra.mxu0 %v6979_v2  ;;  %v7068_v2 = vld [vmem:[%s10412_s1 + $0x5e4] ss:$8 sps:$4 sm:$0xff]  }
  0x70   :  { %2749 = vmatpush2.bf16.msra.mxu1 %v6982_v3  ;;  %2709 = vmatprep.subr.bf16.mxu0 %v6987_v4  ;;  %v7063_v3 = vld [vmem:[%s10412_s1 + $0x4e0] ss:$8 sps:$4 sm:$0xff]  }
  0x71   :  { %2750 = vmatprep.subr.bf16.mxu1 %v6990_v5  ;;  %v7066_v4 = vld [vmem:[%s10412_s1 + $0x5e0] ss:$8 sps:$4 sm:$0xff]   ;;  %v7071_v5 = vld [vmem:[%s10412_s1 + $0x4d4] ss:$8 sps:$4 sm:$0xff]  }
  0x73   :  { %2710 = vmatpush2.bf16.msra.mxu0 %v6985_v7  ;;  %v7074_v7 = vld [vmem:[%s10412_s1 + $0x5d4] ss:$8 sps:$4 sm:$0xff]  }
  0x74   :  { %2751 = vmatpush2.bf16.msra.mxu1 %v6988_v8  ;;  %2711 = vmatprep.subr.bf16.mxu0 %v6993_v9  ;;  %v7069_v8 = vld [vmem:[%s10412_s1 + $0x4d0] ss:$8 sps:$4 sm:$0xff]  }
  0x75   :  { %2752 = vmatprep.subr.bf16.mxu1 %v6996_v10  ;;  %v7072_v9 = vld [vmem:[%s10412_s1 + $0x5d0] ss:$8 sps:$4 sm:$0xff]   ;;  %v7077_v10 = vld [vmem:[%s10412_s1 + $0x4c4] ss:$8 sps:$4 sm:$0xff]  }
  0x77   :  { %2712 = vmatpush2.bf16.msra.mxu0 %v6991_v11  ;;  %v7080_v11 = vld [vmem:[%s10412_s1 + $0x5c4] ss:$8 sps:$4 sm:$0xff]  }
  0x78   :  { %2753 = vmatpush2.bf16.msra.mxu1 %v6994_v12  ;;  %2713 = vmatprep.subr.bf16.mxu0 %v6999_v13  ;;  %v7075_v12 = vld [vmem:[%s10412_s1 + $0x4c0] ss:$8 sps:$4 sm:$0xff]  }
  0x79   :  { %2754 = vmatprep.subr.bf16.mxu1 %v7002_v14  ;;  %v7078_v13 = vld [vmem:[%s10412_s1 + $0x5c0] ss:$8 sps:$4 sm:$0xff]   ;;  %v7083_v14 = vld [vmem:[%s10412_s1 + $0x4b4] ss:$8 sps:$4 sm:$0xff]  }
  0x7b   :  { %2714 = vmatpush2.bf16.msra.mxu0 %v6997_v15  ;;  %v7086_v15 = vld [vmem:[%s10412_s1 + $0x5b4] ss:$8 sps:$4 sm:$0xff]  }
  0x7c   :  { %2755 = vmatpush2.bf16.msra.mxu1 %v7000_v16  ;;  %2715 = vmatprep.subr.bf16.mxu0 %v7005_v17  ;;  %v7081_v16 = vld [vmem:[%s10412_s1 + $0x4b0] ss:$8 sps:$4 sm:$0xff]  }
  0x7d   :  { %2756 = vmatprep.subr.bf16.mxu1 %v7008_v18  ;;  %v7084_v17 = vld [vmem:[%s10412_s1 + $0x5b0] ss:$8 sps:$4 sm:$0xff]   ;;  %v7089_v18 = vld [vmem:[%s10412_s1 + $0x4a4] ss:$8 sps:$4 sm:$0xff]  }
  0x7f   :  { %2716 = vmatpush2.bf16.msra.mxu0 %v7003_v19  ;;  %v7092_v19 = vld [vmem:[%s10412_s1 + $0x5a4] ss:$8 sps:$4 sm:$0xff]  }
  0x80   :  { %2757 = vmatpush2.bf16.msra.mxu1 %v7006_v21  ;;  %2767 = vmatprep.subr.bf16.mxu0 %v7011_v22  ;;  %v7087_v21 = vld [vmem:[%s10412_s1 + $0x4a0] ss:$8 sps:$4 sm:$0xff]  }
  0x81   :  { %2808 = vmatprep.subr.bf16.mxu1 %v7014_v23  ;;  %v7090_v22 = vld [vmem:[%s10412_s1 + $0x5a0] ss:$8 sps:$4 sm:$0xff]   ;;  %v7095_v23 = vld [vmem:[%s10412_s1 + $0x494] ss:$8 sps:$4 sm:$0xff]  }
  0x82   :  { %2718 = vmatmul.mubr.bf16.vlgmr.msra.gmra.mxu0 %v484_v20  ;;  %v503_v20 = vcombine.high %v8403_v26, %v8403_v26  ;;  %v7096_v26 = vld [vmem:[%s10412_s1 + $0x590] ss:$8 sps:$4 sm:$0xff]  }
  0x83   :  { %2759 = vmatmul.mubr.bf16.vlgmr.msra.gmra.mxu1 %v500_v24  ;;  %2768 = vmatpush1.bf16.msra.mxu0 %v7009_v6  ;;  %v7098_v24 = vld [vmem:[%s10412_s1 + $0x594] ss:$8 sps:$4 sm:$0xff]  }
  0x84   :  { %2809 = vmatpush1.bf16.msra.mxu1 %v7012_v25  ;;  %2769 = vmatprep.subr.bf16.mxu0 %v7017_v27  ;;  %v8577_v6 = vrot.slane %v503_v20, %v8120_v49  ;;  %v7093_v25 = vld [vmem:[%s10412_s1 + $0x490] ss:$8 sps:$4 sm:$0xff]   ;;  %v7101_v27 = vld [vmem:[%s10412_s1 + $0x484] ss:$8 sps:$4 sm:$0xff]  }
  0x85   :  { %2810 = vmatprep.subr.bf16.mxu1 %v7020_v28  ;;  %2799 = vmatprep.mubr.bf16.mxu0 %v540_v35  ;;  %v7104_v28 = vld [vmem:[%s10412_s1 + $0x584] ss:$8 sps:$4 sm:$0xff]   ;;  %v7110_v35 = vld [vmem:[%s10412_s1 + $0x774] ss:$8 sps:$4 sm:$0xff]  }
  0x86   :  { %2840 = vmatprep.mubr.bf16.mxu1 %v550_v36  ;;  %v519_v30 = vcombine.high %v8577_v6, %v8577_v6  ;;  %v7176_v20 = vld [vmem:[%s10412_s1 + $0x7c4] ss:$8 sps:$4 sm:$0xff]  }
  0x87   :  { %2770 = vmatpush1.bf16.msra.mxu0 %v7015_v31  ;;  %v7099_v31 = vld [vmem:[%s10412_s1 + $0x480] ss:$8 sps:$4 sm:$0xff]  }
  0x88   :  { %2811 = vmatpush1.bf16.msra.mxu1 %v7018_v32  ;;  %2771 = vmatprep.subr.bf16.mxu0 %v7023_v33  ;;  %v526_v32 = vrot.slane %v8413_v29, %v8120_v49  ;;  %v7102_v33 = vld [vmem:[%s10412_s1 + $0x580] ss:$8 sps:$4 sm:$0xff]   ;;  %v547_v36 = vrot.slane %v519_v30, %v8120_v49  ;;  %v7105_v29 = vld [vmem:[%s10412_s1 + $0x670] ss:$8 sps:$4 sm:$0xff]  }
  0x89   :  { %2812 = vmatprep.subr.bf16.mxu1 %v7026_v34  ;;  %v7107_v34 = vld [vmem:[%s10412_s1 + $0x674] ss:$8 sps:$4 sm:$0xff]   ;;  %v7183_v30 = vld [vmem:[%s10412_s1 + $0x6a0] ss:$8 sps:$4 sm:$0xff]  }
  0x8b   :  { %2772 = vmatpush1.bf16.msra.mxu0 %v7021_v37  ;;  %v548_v37 = vcombine.high %v526_v32, %v526_v32 }
  0x8c   :  { %2813 = vmatpush1.bf16.msra.mxu1 %v7024_v38  ;;  %2773 = vmatprep.subr.bf16.mxu0 %v7029_v39  ;;  %v7108_v38 = vld [vmem:[%s10412_s1 + $0x770] ss:$8 sps:$4 sm:$0xff]   ;;  %v7113_v39 = vld [vmem:[%s10412_s1 + $0x664] ss:$8 sps:$4 sm:$0xff]  }
  0x8d   :  { %2814 = vmatprep.subr.bf16.mxu1 %v7032_v40  ;;  %v7116_v40 = vld [vmem:[%s10412_s1 + $0x764] ss:$8 sps:$4 sm:$0xff]  }
  0x8f   :  { %2774 = vmatpush1.bf16.msra.mxu0 %v7027_v41  ;;  %v551_v41 = vcombine.high %v547_v36, %v547_v36 }
  0x90   :  { %2815 = vmatpush1.bf16.msra.mxu1 %v7030_v43  ;;  %2775 = vmatprep.subr.bf16.mxu0 %v7035_v44  ;;  %v7111_v43 = vld [vmem:[%s10412_s1 + $0x660] ss:$8 sps:$4 sm:$0xff]  }
  0x91   :  { %2816 = vmatprep.subr.bf16.mxu1 %v7038_v45  ;;  %v7114_v44 = vld [vmem:[%s10412_s1 + $0x760] ss:$8 sps:$4 sm:$0xff]   ;;  %v7119_v45 = vld [vmem:[%s10412_s1 + $0x654] ss:$8 sps:$4 sm:$0xff]  }
  0x93   :  { %2776 = vmatpush1.bf16.msra.mxu0 %v7033_v46  ;;  %v7122_v46 = vld [vmem:[%s10412_s1 + $0x754] ss:$8 sps:$4 sm:$0xff]  }
  0x94   :  { %2817 = vmatpush1.bf16.msra.mxu1 %v7036_v47  ;;  %2777 = vmatprep.subr.bf16.mxu0 %v7041_v48  ;;  %v7117_v47 = vld [vmem:[%s10412_s1 + $0x650] ss:$8 sps:$4 sm:$0xff]  }
  0x95   :  { %2818 = vmatprep.subr.bf16.mxu1 %v7044_v50  ;;  %v7120_v48 = vld [vmem:[%s10412_s1 + $0x750] ss:$8 sps:$4 sm:$0xff]   ;;  %v7125_v50 = vld [vmem:[%s10412_s1 + $0x644] ss:$8 sps:$4 sm:$0xff]  }
  0x97   :  { %2778 = vmatpush1.bf16.msra.mxu0 %v7039_v51  ;;  %v7128_v51 = vld [vmem:[%s10412_s1 + $0x744] ss:$8 sps:$4 sm:$0xff]  }
  0x98   :  { %2819 = vmatpush1.bf16.msra.mxu1 %v7042_v52  ;;  %2779 = vmatprep.subr.bf16.mxu0 %v7047_v53  ;;  %v7123_v52 = vld [vmem:[%s10412_s1 + $0x640] ss:$8 sps:$4 sm:$0xff]  }
  0x99   :  { %2820 = vmatprep.subr.bf16.mxu1 %v7050_v54  ;;  %v7126_v53 = vld [vmem:[%s10412_s1 + $0x740] ss:$8 sps:$4 sm:$0xff]   ;;  %v7131_v54 = vld [vmem:[%s10412_s1 + $0x634] ss:$8 sps:$4 sm:$0xff]  }
  0x9b   :  { %2780 = vmatpush1.bf16.msra.mxu0 %v7045_v55  ;;  %v7134_v55 = vld [vmem:[%s10412_s1 + $0x734] ss:$8 sps:$4 sm:$0xff]  }
  0x9c   :  { %2821 = vmatpush1.bf16.msra.mxu1 %v7048_v56  ;;  %2781 = vmatprep.subr.bf16.mxu0 %v7053_v57  ;;  %v7129_v56 = vld [vmem:[%s10412_s1 + $0x630] ss:$8 sps:$4 sm:$0xff]  }
  0x9d   :  { %2822 = vmatprep.subr.bf16.mxu1 %v7056_v58  ;;  %v7132_v57 = vld [vmem:[%s10412_s1 + $0x730] ss:$8 sps:$4 sm:$0xff]   ;;  %v7137_v58 = vld [vmem:[%s10412_s1 + $0x624] ss:$8 sps:$4 sm:$0xff]  }
  0x9f   :  { %2782 = vmatpush1.bf16.msra.mxu0 %v7051_v59  ;;  %v7140_v59 = vld [vmem:[%s10412_s1 + $0x724] ss:$8 sps:$4 sm:$0xff]  }
  0xa0   :  { %2823 = vmatpush1.bf16.msra.mxu1 %v7054_v60  ;;  %2783 = vmatprep.subr.bf16.mxu0 %v7059_v61  ;;  %v7135_v60 = vld [vmem:[%s10412_s1 + $0x620] ss:$8 sps:$4 sm:$0xff]  }
  0xa1   :  { %2824 = vmatprep.subr.bf16.mxu1 %v7062_v62  ;;  %v7138_v61 = vld [vmem:[%s10412_s1 + $0x720] ss:$8 sps:$4 sm:$0xff]   ;;  %v7143_v62 = vld [vmem:[%s10412_s1 + $0x614] ss:$8 sps:$4 sm:$0xff]  }
  0xa3   :  { %2784 = vmatpush2.bf16.msra.mxu0 %v7057_v63  ;;  %v7146_v63 = vld [vmem:[%s10412_s1 + $0x714] ss:$8 sps:$4 sm:$0xff]  }
  0xa4   :  { %2825 = vmatpush2.bf16.msra.mxu1 %v7060_v0  ;;  %2785 = vmatprep.subr.bf16.mxu0 %v7065_v1  ;;  %v7141_v0 = vld [vmem:[%s10412_s1 + $0x610] ss:$8 sps:$4 sm:$0xff]  }
  0xa5   :  { %2826 = vmatprep.subr.bf16.mxu1 %v7068_v2  ;;  %v7144_v1 = vld [vmem:[%s10412_s1 + $0x710] ss:$8 sps:$4 sm:$0xff]   ;;  %v7149_v2 = vld [vmem:[%s10412_s1 + $0x604] ss:$8 sps:$4 sm:$0xff]  }
  0xa7   :  { %2786 = vmatpush2.bf16.msra.mxu0 %v7063_v3  ;;  %v7152_v3 = vld [vmem:[%s10412_s1 + $0x704] ss:$8 sps:$4 sm:$0xff]  }
  0xa8   :  { %2827 = vmatpush2.bf16.msra.mxu1 %v7066_v4  ;;  %2787 = vmatprep.subr.bf16.mxu0 %v7071_v5  ;;  %v7147_v4 = vld [vmem:[%s10412_s1 + $0x600] ss:$8 sps:$4 sm:$0xff]  }
  0xa9   :  { %2828 = vmatprep.subr.bf16.mxu1 %v7074_v7  ;;  %v7150_v5 = vld [vmem:[%s10412_s1 + $0x700] ss:$8 sps:$4 sm:$0xff]   ;;  %v7155_v7 = vld [vmem:[%s10412_s1 + $0x6f4] ss:$8 sps:$4 sm:$0xff]  }
  0xab   :  { %2788 = vmatpush2.bf16.msra.mxu0 %v7069_v8  ;;  %v7158_v8 = vld [vmem:[%s10412_s1 + $0x7f4] ss:$8 sps:$4 sm:$0xff]  }
  0xac   :  { %2829 = vmatpush2.bf16.msra.mxu1 %v7072_v9  ;;  %2789 = vmatprep.subr.bf16.mxu0 %v7077_v10  ;;  %v7153_v9 = vld [vmem:[%s10412_s1 + $0x6f0] ss:$8 sps:$4 sm:$0xff]  }
  0xad   :  { %2830 = vmatprep.subr.bf16.mxu1 %v7080_v11  ;;  %v7156_v10 = vld [vmem:[%s10412_s1 + $0x7f0] ss:$8 sps:$4 sm:$0xff]   ;;  %v7161_v11 = vld [vmem:[%s10412_s1 + $0x6e4] ss:$8 sps:$4 sm:$0xff]  }
  0xaf   :  { %2790 = vmatpush2.bf16.msra.mxu0 %v7075_v12  ;;  %v7164_v12 = vld [vmem:[%s10412_s1 + $0x7e4] ss:$8 sps:$4 sm:$0xff]  }
  0xb0   :  { %2831 = vmatpush2.bf16.msra.mxu1 %v7078_v13  ;;  %2791 = vmatprep.subr.bf16.mxu0 %v7083_v14  ;;  %v7159_v13 = vld [vmem:[%s10412_s1 + $0x6e0] ss:$8 sps:$4 sm:$0xff]  }
  0xb1   :  { %2832 = vmatprep.subr.bf16.mxu1 %v7086_v15  ;;  %v7162_v14 = vld [vmem:[%s10412_s1 + $0x7e0] ss:$8 sps:$4 sm:$0xff]   ;;  %v7167_v15 = vld [vmem:[%s10412_s1 + $0x6d4] ss:$8 sps:$4 sm:$0xff]  }
  0xb3   :  { %2792 = vmatpush2.bf16.msra.mxu0 %v7081_v16  ;;  %v7170_v16 = vld [vmem:[%s10412_s1 + $0x7d4] ss:$8 sps:$4 sm:$0xff]  }
  0xb4   :  { %2833 = vmatpush2.bf16.msra.mxu1 %v7084_v17  ;;  %2793 = vmatprep.subr.bf16.mxu0 %v7089_v18  ;;  %v7165_v17 = vld [vmem:[%s10412_s1 + $0x6d0] ss:$8 sps:$4 sm:$0xff]  }
  0xb5   :  { %2834 = vmatprep.subr.bf16.mxu1 %v7092_v19  ;;  %v7168_v18 = vld [vmem:[%s10412_s1 + $0x7d0] ss:$8 sps:$4 sm:$0xff]   ;;  %v7173_v19 = vld [vmem:[%s10412_s1 + $0x6c4] ss:$8 sps:$4 sm:$0xff]  }
  0xb7   :  { %2794 = vmatpush2.bf16.msra.mxu0 %v7087_v21  ;;  %v7171_v21 = vld [vmem:[%s10412_s1 + $0x6c0] ss:$8 sps:$4 sm:$0xff]  }
  0xb8   :  { %2835 = vmatpush2.bf16.msra.mxu1 %v7090_v22  ;;  %2795 = vmatprep.subr.bf16.mxu0 %v7095_v23  ;;  %v7174_v22 = vld [vmem:[%s10412_s1 + $0x7c0] ss:$8 sps:$4 sm:$0xff]   ;;  %v7179_v23 = vld [vmem:[%s10412_s1 + $0x6b4] ss:$8 sps:$4 sm:$0xff]  }
  0xb9   :  { %2836 = vmatprep.subr.bf16.mxu1 %v7098_v24  ;;  %v7182_v24 = vld [vmem:[%s10412_s1 + $0x7b4] ss:$8 sps:$4 sm:$0xff]  }
  0xbb   :  { %2796 = vmatpush2.bf16.msra.mxu0 %v7093_v25  ;;  %v7177_v25 = vld [vmem:[%s10412_s1 + $0x6b0] ss:$8 sps:$4 sm:$0xff]  }
  0xbc   :  { %2837 = vmatpush2.bf16.msra.mxu1 %v7096_v26  ;;  %2797 = vmatprep.subr.bf16.mxu0 %v7101_v27  ;;  %v7180_v26 = vld [vmem:[%s10412_s1 + $0x7b0] ss:$8 sps:$4 sm:$0xff]   ;;  %v7185_v27 = vld [vmem:[%s10412_s1 + $0x6a4] ss:$8 sps:$4 sm:$0xff]  }
  0xbd   :  { %2838 = vmatprep.subr.bf16.mxu1 %v7104_v28  ;;  %v7188_v28 = vld [vmem:[%s10412_s1 + $0x7a4] ss:$8 sps:$4 sm:$0xff]  }
  0xbf   :  { %2798 = vmatpush2.bf16.msra.mxu0 %v7099_v31  ;;  %v7186_v31 = vld [vmem:[%s10412_s1 + $0x7a0] ss:$8 sps:$4 sm:$0xff]  }
  0xc0   :  { %2839 = vmatpush2.bf16.msra.mxu1 %v7102_v33  ;;  %2849 = vmatprep.subr.bf16.mxu0 %v7107_v34  ;;  %v7191_v33 = vld [vmem:[%s10412_s1 + $0x694] ss:$8 sps:$4 sm:$0xff]  }
  0xc1   :  { %2890 = vmatprep.subr.bf16.mxu1 %v7110_v35  ;;  %v7194_v34 = vld [vmem:[%s10412_s1 + $0x794] ss:$8 sps:$4 sm:$0xff]  }
  0xc2   :  { %2800 = vmatmul.mubr.bf16.vlgmr.msra.gmra.mxu0 %v526_v32  ;;  %v8773_v32 = vld [vmem:[%s10411_s0 + $0x10] sm:$0xff] }
  0xc3   :  { %2841 = vmatmul.mubr.bf16.vlgmr.msra.gmra.mxu1 %v548_v37  ;;  %2850 = vmatpush1.bf16.msra.mxu0 %v7105_v29  ;;  %v8783_v35 = vrot.slane %v8773_v32, %v8120_v49  ;;  %v7192_v37 = vld [vmem:[%s10412_s1 + $0x790] ss:$8 sps:$4 sm:$0xff]   ;;  %v7197_v29 = vld [vmem:[%s10412_s1 + $0x684] ss:$8 sps:$4 sm:$0xff]  }
  0xc4   :  { %2891 = vmatpush1.bf16.msra.mxu1 %v7108_v38  ;;  %2851 = vmatprep.subr.bf16.mxu0 %v7113_v39  ;;  %v7200_v38 = vld [vmem:[%s10412_s1 + $0x784] ss:$8 sps:$4 sm:$0xff]   ;;  %v7195_v39 = vld [vmem:[%s10412_s1 + $0x680] ss:$8 sps:$4 sm:$0xff]  }
  0xc5   :  { %2892 = vmatprep.subr.bf16.mxu1 %v7116_v40  ;;  %2881 = vmatprep.mubr.bf16.mxu0 %v547_v36  ;;  %v7189_v36 = vld [vmem:[%s10412_s1 + $0x690] ss:$8 sps:$4 sm:$0xff]   ;;  %v567_v40 = vcombine.high %v8783_v35, %v8783_v35 }
  0xc6   :  { %2922 = vmatprep.mubr.bf16.mxu1 %v551_v41  ;;  %v7198_v41 = vld [vmem:[%s10412_s1 + $0x780] ss:$8 sps:$4 sm:$0xff]  }
  0xc7   :  { %2852 = vmatpush1.bf16.msra.mxu0 %v7111_v43  ;;  %v438_v43 = vld [vmem:[%s10413_s2] sm:$0x3] }
  0xc8   :  { %2893 = vmatpush1.bf16.msra.mxu1 %v7114_v44  ;;  %2853 = vmatprep.subr.bf16.mxu0 %v7119_v45  ;;  %v533_v44 = vrot.slane %v8577_v6, %v8120_v49  ;;  %v8811_v45 = vsub.s32 0, %v8102_v42  ;;  %v589_v6 = vrot.slane %v567_v40, %v8120_v49  ;;  %v7261_v40 = vld [vmem:[%s10412_s1 + $0x9e4] ss:$8 sps:$4 sm:$0xff]  }
  0xc9   :  { %2894 = vmatprep.subr.bf16.mxu1 %v7122_v46  ;;  %v7204_v46 = vld [vmem:[%s10412_s1 + $0x874] ss:$8 sps:$4 sm:$0xff]  }
  0xcb   :  { %2854 = vmatpush1.bf16.msra.mxu0 %v7117_v47  ;;  %v7207_v47 = vld [vmem:[%s10412_s1 + $0x974] ss:$8 sps:$4 sm:$0xff]  }
  0xcc   :  { %2895 = vmatpush1.bf16.msra.mxu1 %v7120_v48  ;;  %2855 = vmatprep.subr.bf16.mxu0 %v7125_v50  ;;  %v8820_v48 = vsub.s32 1, %v8102_v42  ;;  %v549_v50 = vcombine.high %v533_v44, %v533_v44 }
  0xcd   :  { %2896 = vmatprep.subr.bf16.mxu1 %v7128_v51  ;;  %v7202_v51 = vld [vmem:[%s10412_s1 + $0x870] ss:$8 sps:$4 sm:$0xff]  }
  0xcf   :  { %2856 = vmatpush1.bf16.msra.mxu0 %v7123_v52  ;;  %v7205_v52 = vld [vmem:[%s10412_s1 + $0x970] ss:$8 sps:$4 sm:$0xff]  }
  0xd0   :  { %2897 = vmatpush1.bf16.msra.mxu1 %v7126_v53  ;;  %2857 = vmatprep.subr.bf16.mxu0 %v7131_v54  ;;  %v443_v53 = vrot.slane %v438_v43, %v8811_v45  ;;  %v7210_v54 = vld [vmem:[%s10412_s1 + $0x864] ss:$8 sps:$4 sm:$0xff]  }
  0xd1   :  { %2898 = vmatprep.subr.bf16.mxu1 %v7134_v55  ;;  %v7213_v55 = vld [vmem:[%s10412_s1 + $0x964] ss:$8 sps:$4 sm:$0xff]  }
  0xd3   :  { %2858 = vmatpush1.bf16.msra.mxu0 %v7129_v56  ;;  %v447_v56 = vrot.slane %v438_v43, %v8820_v48  ;;  %v7259_v43 = vld [vmem:[%s10412_s1 + $0x9e0] ss:$8 sps:$4 sm:$0xff]  }
  0xd4   :  { %2899 = vmatpush1.bf16.msra.mxu1 %v7132_v57  ;;  %2859 = vmatprep.subr.bf16.mxu0 %v7137_v58  ;;  %v7208_v57 = vld [vmem:[%s10412_s1 + $0x860] ss:$8 sps:$4 sm:$0xff]  }
  0xd5   :  { %2900 = vmatprep.subr.bf16.mxu1 %v7140_v59  ;;  %v7211_v58 = vld [vmem:[%s10412_s1 + $0x960] ss:$8 sps:$4 sm:$0xff]   ;;  %v599_v59 = vcombine.high %v589_v6, %v589_v6 }
  0xd7   :  { %2860 = vmatpush1.bf16.msra.mxu0 %v7135_v60 }
  0xd8   :  { %2901 = vmatpush1.bf16.msra.mxu1 %v7138_v61  ;;  %2861 = vmatprep.subr.bf16.mxu0 %v7143_v62  ;;  %v7216_v62 = vld [vmem:[%s10412_s1 + $0x854] ss:$8 sps:$4 sm:$0xff]  }
  0xd9   :  { %2902 = vmatprep.subr.bf16.mxu1 %v7146_v63 }
  0xdb   :  { %2862 = vmatpush1.bf16.msra.mxu0 %v7141_v0 }
  0xdc   :  { %2903 = vmatpush1.bf16.msra.mxu1 %v7144_v1  ;;  %2863 = vmatprep.subr.bf16.mxu0 %v7149_v2  ;;  %v7219_v2 = vld [vmem:[%s10412_s1 + $0x954] ss:$8 sps:$4 sm:$0xff]  }
  0xdd   :  { %2904 = vmatprep.subr.bf16.mxu1 %v7152_v3 }
  0xdf   :  { %2864 = vmatpush1.bf16.msra.mxu0 %v7147_v4 }
  0xe0   :  { %2905 = vmatpush1.bf16.msra.mxu1 %v7150_v5  ;;  %2865 = vmatprep.subr.bf16.mxu0 %v7155_v7  ;;  %v7214_v5 = vld [vmem:[%s10412_s1 + $0x850] ss:$8 sps:$4 sm:$0xff]  }
  0xe1   :  { %2906 = vmatprep.subr.bf16.mxu1 %v7158_v8  ;;  %v7217_v7 = vld [vmem:[%s10412_s1 + $0x950] ss:$8 sps:$4 sm:$0xff]  }
  0xe3   :  { %2866 = vmatpush2.bf16.msra.mxu0 %v7153_v9 }
  0xe4   :  { %2907 = vmatpush2.bf16.msra.mxu1 %v7156_v10  ;;  %2867 = vmatprep.subr.bf16.mxu0 %v7161_v11 }
  0xe5   :  { %2908 = vmatprep.subr.bf16.mxu1 %v7164_v12  ;;  %v7222_v12 = vld [vmem:[%s10412_s1 + $0x844] ss:$8 sps:$4 sm:$0xff]  }
  0xe7   :  { %2868 = vmatpush2.bf16.msra.mxu0 %v7159_v13  ;;  %v7225_v13 = vld [vmem:[%s10412_s1 + $0x944] ss:$8 sps:$4 sm:$0xff]  }
  0xe8   :  { %2909 = vmatpush2.bf16.msra.mxu1 %v7162_v14  ;;  %2869 = vmatprep.subr.bf16.mxu0 %v7167_v15  ;;  %v7220_v15 = vld [vmem:[%s10412_s1 + $0x840] ss:$8 sps:$4 sm:$0xff]  }
  0xe9   :  { %2910 = vmatprep.subr.bf16.mxu1 %v7170_v16  ;;  %v7223_v16 = vld [vmem:[%s10412_s1 + $0x940] ss:$8 sps:$4 sm:$0xff]  }
  0xeb   :  { %2870 = vmatpush2.bf16.msra.mxu0 %v7165_v17  ;;  %v7228_v17 = vld [vmem:[%s10412_s1 + $0x834] ss:$8 sps:$4 sm:$0xff]  }
  0xec   :  { %2911 = vmatpush2.bf16.msra.mxu1 %v7168_v18  ;;  %2871 = vmatprep.subr.bf16.mxu0 %v7173_v19  ;;  %v7231_v18 = vld [vmem:[%s10412_s1 + $0x934] ss:$8 sps:$4 sm:$0xff]   ;;  %v7226_v19 = vld [vmem:[%s10412_s1 + $0x830] ss:$8 sps:$4 sm:$0xff]  }
  0xed   :  { %2912 = vmatprep.subr.bf16.mxu1 %v7176_v20  ;;  %v7229_v20 = vld [vmem:[%s10412_s1 + $0x930] ss:$8 sps:$4 sm:$0xff]  }
  0xef   :  { %2872 = vmatpush2.bf16.msra.mxu0 %v7171_v21  ;;  %v7234_v21 = vld [vmem:[%s10412_s1 + $0x824] ss:$8 sps:$4 sm:$0xff]  }
  0xf0   :  { %2913 = vmatpush2.bf16.msra.mxu1 %v7174_v22  ;;  %2873 = vmatprep.subr.bf16.mxu0 %v7179_v23  ;;  %v7237_v22 = vld [vmem:[%s10412_s1 + $0x924] ss:$8 sps:$4 sm:$0xff]   ;;  %v7232_v23 = vld [vmem:[%s10412_s1 + $0x820] ss:$8 sps:$4 sm:$0xff]  }
  0xf1   :  { %2914 = vmatprep.subr.bf16.mxu1 %v7182_v24  ;;  %v7235_v24 = vld [vmem:[%s10412_s1 + $0x920] ss:$8 sps:$4 sm:$0xff]  }
  0xf3   :  { %2874 = vmatpush2.bf16.msra.mxu0 %v7177_v25  ;;  %v7240_v25 = vld [vmem:[%s10412_s1 + $0x814] ss:$8 sps:$4 sm:$0xff]  }
  0xf4   :  { %2915 = vmatpush2.bf16.msra.mxu1 %v7180_v26  ;;  %2875 = vmatprep.subr.bf16.mxu0 %v7185_v27  ;;  %v7243_v26 = vld [vmem:[%s10412_s1 + $0x914] ss:$8 sps:$4 sm:$0xff]   ;;  %v7238_v27 = vld [vmem:[%s10412_s1 + $0x810] ss:$8 sps:$4 sm:$0xff]  }
  0xf5   :  { %2916 = vmatprep.subr.bf16.mxu1 %v7188_v28  ;;  %v7241_v28 = vld [vmem:[%s10412_s1 + $0x910] ss:$8 sps:$4 sm:$0xff]  }
  0xf7   :  { %2876 = vmatpush2.bf16.msra.mxu0 %v7183_v30  ;;  %v7246_v30 = vld [vmem:[%s10412_s1 + $0x804] ss:$8 sps:$4 sm:$0xff]  }
  0xf8   :  { %2917 = vmatpush2.bf16.msra.mxu1 %v7186_v31  ;;  %2877 = vmatprep.subr.bf16.mxu0 %v7191_v33  ;;  %v7249_v31 = vld [vmem:[%s10412_s1 + $0x904] ss:$8 sps:$4 sm:$0xff]   ;;  %v7244_v33 = vld [vmem:[%s10412_s1 + $0x800] ss:$8 sps:$4 sm:$0xff]  }
  0xf9   :  { %2918 = vmatprep.subr.bf16.mxu1 %v7194_v34  ;;  %v7247_v34 = vld [vmem:[%s10412_s1 + $0x900] ss:$8 sps:$4 sm:$0xff]  }
  0xfb   :  { %2878 = vmatpush2.bf16.msra.mxu0 %v7189_v36  ;;  %v7252_v36 = vld [vmem:[%s10412_s1 + $0x8f4] ss:$8 sps:$4 sm:$0xff]  }
  0xfc   :  { %2919 = vmatpush2.bf16.msra.mxu1 %v7192_v37  ;;  %2879 = vmatprep.subr.bf16.mxu0 %v7197_v29  ;;  %v7255_v37 = vld [vmem:[%s10412_s1 + $0x9f4] ss:$8 sps:$4 sm:$0xff]   ;;  %v7250_v29 = vld [vmem:[%s10412_s1 + $0x8f0] ss:$8 sps:$4 sm:$0xff]  }
  0xfd   :  { %2920 = vmatprep.subr.bf16.mxu1 %v7200_v38  ;;  %v7253_v38 = vld [vmem:[%s10412_s1 + $0x9f0] ss:$8 sps:$4 sm:$0xff]  }
  0xff   :  { %2880 = vmatpush2.bf16.msra.mxu0 %v7195_v39  ;;  %v7258_v39 = vld [vmem:[%s10412_s1 + $0x8e4] ss:$8 sps:$4 sm:$0xff]  }
 0x100   :  { %2921 = vmatpush2.bf16.msra.mxu1 %v7198_v41  ;;  %2931 = vmatprep.subr.bf16.mxu0 %v7204_v46  ;;  %v7256_v41 = vld [vmem:[%s10412_s1 + $0x8e0] ss:$8 sps:$4 sm:$0xff]   ;;  %v7267_v46 = vld [vmem:[%s10412_s1 + $0x9d4] ss:$8 sps:$4 sm:$0xff]  }
 0x101   :  { %2972 = vmatprep.subr.bf16.mxu1 %v7207_v47  ;;  %v7262_v47 = vld [vmem:[%s10412_s1 + $0x8d0] ss:$8 sps:$4 sm:$0xff]  }
 0x102   :  { %v2637_v60 = vpop.f32.mrf.mxu0  ;;  %2882 = vmatmul.mubr.bf16.vlgmr.msra.gmra.mxu0 %v533_v44  ;;  %v7264_v44 = vld [vmem:[%s10412_s1 + $0x8d4] ss:$8 sps:$4 sm:$0xff]  }
 0x103   :  { %v2678_v61 = vpop.f32.mrf.mxu1  ;;  %2923 = vmatmul.mubr.bf16.vlgmr.msra.gmra.mxu1 %v549_v50  ;;  %v2638_v63 = vadd.f32 %v2637_v60, %v443_v53  ;;  %2932 = vmatpush1.bf16.msra.mxu0 %v7202_v51  ;;  %v7270_v50 = vld [vmem:[%s10412_s1 + $0x8c4] ss:$8 sps:$4 sm:$0xff]   ;;  %v7271_v53 = vld [vmem:[%s10412_s1 + $0x9c0] ss:$8 sps:$4 sm:$0xff]  }
 0x104   :  { %2973 = vmatpush1.bf16.msra.mxu1 %v7205_v52  ;;  %v2639_v0 = vpop.f32.mrf.mxu0  ;;  %2933 = vmatprep.subr.bf16.mxu0 %v7210_v54  ;;  %v7273_v51 = vld [vmem:[%s10412_s1 + $0x9c4] ss:$8 sps:$4 sm:$0xff]   ;;  %v7268_v52 = vld [vmem:[%s10412_s1 + $0x8c0] ss:$8 sps:$4 sm:$0xff]   ;;  %v7276_v54 = vld [vmem:[%s10412_s1 + $0x8b4] ss:$8 sps:$4 sm:$0xff]  }
 0x105   :  { %v2680_v1 = vpop.f32.mrf.mxu1  ;;  %2974 = vmatprep.subr.bf16.mxu1 %v7213_v55  ;;  %v8849_v3 = vadd.f32 %v2678_v61, %v2638_v63  ;;  %v2640_v4 = vadd.f32 %v2639_v0, %v447_v56  ;;  %2963 = vmatprep.mubr.bf16.mxu0 %v589_v6  ;;  %v7265_v6 = vld [vmem:[%s10412_s1 + $0x9d0] ss:$8 sps:$4 sm:$0xff]   ;;  %v7279_v55 = vld [vmem:[%s10412_s1 + $0x9b4] ss:$8 sps:$4 sm:$0xff]   ;;  %v7280_v60 = vld [vmem:[%s10412_s1 + $0x8a0] ss:$8 sps:$4 sm:$0xff]  }
 0x106   :  { %3004 = vmatprep.mubr.bf16.mxu1 %v599_v59  ;;  %v2641_v9 = vpop.f32.mrf.mxu0  ;;  %v7274_v56 = vld [vmem:[%s10412_s1 + $0x8b0] ss:$8 sps:$4 sm:$0xff]   ;;  %v7285_v59 = vld [vmem:[%s10412_s1 + $0x9a4] ss:$8 sps:$4 sm:$0xff]   ;;  %v7283_v61 = vld [vmem:[%s10412_s1 + $0x9a0] ss:$8 sps:$4 sm:$0xff]  }
 0x107   :  { %v2682_v8 = vpop.f32.mrf.mxu1  ;;  %v8857_v10 = vadd.f32 %v2680_v1, %v2640_v4  ;;  %2934 = vmatpush1.bf16.msra.mxu0 %v7208_v57  ;;  %v7277_v57 = vld [vmem:[%s10412_s1 + $0x9b0] ss:$8 sps:$4 sm:$0xff]   ;;  %v7288_v63 = vld [vmem:[%s10412_s1 + $0x894] ss:$8 sps:$4 sm:$0xff]   ;;  %v7294_v4 = vld [vmem:[%s10412_s1 + $0x884] ss:$8 sps:$4 sm:$0xff]  }
 0x108   :  { %2975 = vmatpush1.bf16.msra.mxu1 %v7211_v58  ;;  %2935 = vmatprep.subr.bf16.mxu0 %v7216_v62  ;;  %v2642_v14 = vpop.f32.mrf.mxu0  ;;  %v7282_v58 = vld [vmem:[%s10412_s1 + $0x8a4] ss:$8 sps:$4 sm:$0xff]   ;;  %v552_v62 = vcombine.high %v8773_v32, %v8773_v32  ;;  %v7291_v0 = vld [vmem:[%s10412_s1 + $0x994] ss:$8 sps:$4 sm:$0xff]   ;;  %v7286_v1 = vld [vmem:[%s10412_s1 + $0x890] ss:$8 sps:$4 sm:$0xff]  }
 0x109   :  { %v2683_v11 = vpop.f32.mrf.mxu1  ;;  %2976 = vmatprep.subr.bf16.mxu1 %v7219_v2  ;;  %v7289_v32 = vld [vmem:[%s10412_s1 + $0x990] ss:$8 sps:$4 sm:$0xff]   ;;  %v7295_v8 = vld [vmem:[%s10412_s1 + $0x980] ss:$8 sps:$4 sm:$0xff]  }
 0x10a   :  { %v9006_v2 = vrot.slane %v552_v62, %v8120_v49  ;;  %v575_v11 = vrot.slane %v8783_v35, %v8120_v49  ;;  %v7298_v14 = vld [vmem:[%s10412_s1 + $0xa70] ss:$8 sps:$4 sm:$0xff]   ;;  %v7351_v62 = vld [vmem:[%s10412_s1 + $0xbf4] ss:$8 sps:$4 sm:$0xff]  }
 0x10b   :  { %2936 = vmatpush1.bf16.msra.mxu0 %v7214_v5  ;;  %v7297_v5 = vld [vmem:[%s10412_s1 + $0x984] ss:$8 sps:$4 sm:$0xff]   ;;  %v7301_v35 = vld [vmem:[%s10412_s1 + $0xb70] ss:$8 sps:$4 sm:$0xff]  }
 0x10c   :  { %2977 = vmatpush1.bf16.msra.mxu1 %v7217_v7  ;;  %2937 = vmatprep.subr.bf16.mxu0 %v7222_v12  ;;  %v7292_v7 = vld [vmem:[%s10412_s1 + $0x880] ss:$8 sps:$4 sm:$0xff]   ;;  %v568_v9 = vcombine.high %v9006_v2, %v9006_v2  ;;  %v7300_v12 = vld [vmem:[%s10412_s1 + $0xa74] ss:$8 sps:$4 sm:$0xff]  }
 0x10d   :  { %2978 = vmatprep.subr.bf16.mxu1 %v7225_v13  ;;  %v7303_v13 = vld [vmem:[%s10412_s1 + $0xb74] ss:$8 sps:$4 sm:$0xff]  }
 0x10f   :  { %2938 = vmatpush1.bf16.msra.mxu0 %v7220_v15  ;;  %v596_v15 = vrot.slane %v568_v9, %v8120_v49  ;;  %v7358_v9 = vld [vmem:[%s10412_s1 + $0xad0] ss:$8 sps:$4 sm:$0xff]  }
 0x110   :  { %2979 = vmatpush1.bf16.msra.mxu1 %v7223_v16  ;;  %2939 = vmatprep.subr.bf16.mxu0 %v7228_v17  ;;  %v597_v16 = vcombine.high %v575_v11, %v575_v11  ;;  %v7306_v17 = vld [vmem:[%s10412_s1 + $0xa64] ss:$8 sps:$4 sm:$0xff]  }
 0x111   :  { %2980 = vmatprep.subr.bf16.mxu1 %v7231_v18  ;;  %v7309_v18 = vld [vmem:[%s10412_s1 + $0xb64] ss:$8 sps:$4 sm:$0xff]  }
 0x113   :  { %2940 = vmatpush1.bf16.msra.mxu0 %v7226_v19  ;;  %v7304_v19 = vld [vmem:[%s10412_s1 + $0xa60] ss:$8 sps:$4 sm:$0xff]  }
 0x114   :  { %2981 = vmatpush1.bf16.msra.mxu1 %v7229_v20  ;;  %2941 = vmatprep.subr.bf16.mxu0 %v7234_v21  ;;  %v7307_v20 = vld [vmem:[%s10412_s1 + $0xb60] ss:$8 sps:$4 sm:$0xff]   ;;  %v600_v21 = vcombine.high %v596_v15, %v596_v15 }
 0x115   :  { %2982 = vmatprep.subr.bf16.mxu1 %v7237_v22 }
 0x117   :  { %2942 = vmatpush1.bf16.msra.mxu0 %v7232_v23 }
 0x118   :  { %2983 = vmatpush1.bf16.msra.mxu1 %v7235_v24  ;;  %2943 = vmatprep.subr.bf16.mxu0 %v7240_v25  ;;  %v7312_v24 = vld [vmem:[%s10412_s1 + $0xa54] ss:$8 sps:$4 sm:$0xff]  }
 0x119   :  { %2984 = vmatprep.subr.bf16.mxu1 %v7243_v26  ;;  %v7315_v25 = vld [vmem:[%s10412_s1 + $0xb54] ss:$8 sps:$4 sm:$0xff]  }
 0x11b   :  { %2944 = vmatpush1.bf16.msra.mxu0 %v7238_v27 }
 0x11c   :  { %2985 = vmatpush1.bf16.msra.mxu1 %v7241_v28  ;;  %2945 = vmatprep.subr.bf16.mxu0 %v7246_v30 }
 0x11d   :  { %2986 = vmatprep.subr.bf16.mxu1 %v7249_v31 }
 0x11f   :  { %2946 = vmatpush1.bf16.msra.mxu0 %v7244_v33  ;;  %v7310_v33 = vld [vmem:[%s10412_s1 + $0xa50] ss:$8 sps:$4 sm:$0xff]  }
 0x120   :  { %2987 = vmatpush1.bf16.msra.mxu1 %v7247_v34  ;;  %2947 = vmatprep.subr.bf16.mxu0 %v7252_v36  ;;  %v7313_v34 = vld [vmem:[%s10412_s1 + $0xb50] ss:$8 sps:$4 sm:$0xff]  }
 0x121   :  { %2988 = vmatprep.subr.bf16.mxu1 %v7255_v37  ;;  %v7318_v37 = vld [vmem:[%s10412_s1 + $0xa44] ss:$8 sps:$4 sm:$0xff]  }
 0x123   :  { %2948 = vmatpush2.bf16.msra.mxu0 %v7250_v29 }
 0x124   :  { %2989 = vmatpush2.bf16.msra.mxu1 %v7253_v38  ;;  %2949 = vmatprep.subr.bf16.mxu0 %v7258_v39 }
 0x125   :  { %2990 = vmatprep.subr.bf16.mxu1 %v7261_v40  ;;  %v7316_v40 = vld [vmem:[%s10412_s1 + $0xa40] ss:$8 sps:$4 sm:$0xff]  }
 0x127   :  { %2950 = vmatpush2.bf16.msra.mxu0 %v7256_v41  ;;  %v7319_v41 = vld [vmem:[%s10412_s1 + $0xb40] ss:$8 sps:$4 sm:$0xff]  }
 0x128   :  { %2991 = vmatpush2.bf16.msra.mxu1 %v7259_v43  ;;  %2951 = vmatprep.subr.bf16.mxu0 %v7264_v44  ;;  %v7324_v43 = vld [vmem:[%s10412_s1 + $0xa34] ss:$8 sps:$4 sm:$0xff]  }
 0x129   :  { %2992 = vmatprep.subr.bf16.mxu1 %v7267_v46  ;;  %v7327_v44 = vld [vmem:[%s10412_s1 + $0xb34] ss:$8 sps:$4 sm:$0xff]   ;;  %v7322_v46 = vld [vmem:[%s10412_s1 + $0xa30] ss:$8 sps:$4 sm:$0xff]  }
 0x12b   :  { %2952 = vmatpush2.bf16.msra.mxu0 %v7262_v47  ;;  %v7325_v47 = vld [vmem:[%s10412_s1 + $0xb30] ss:$8 sps:$4 sm:$0xff]  }
 0x12c   :  { %2993 = vmatpush2.bf16.msra.mxu1 %v7265_v6  ;;  %2953 = vmatprep.subr.bf16.mxu0 %v7270_v50  ;;  %v7330_v6 = vld [vmem:[%s10412_s1 + $0xa24] ss:$8 sps:$4 sm:$0xff]  }
 0x12d   :  { %2994 = vmatprep.subr.bf16.mxu1 %v7273_v51  ;;  %v7333_v50 = vld [vmem:[%s10412_s1 + $0xb24] ss:$8 sps:$4 sm:$0xff]   ;;  %v7328_v51 = vld [vmem:[%s10412_s1 + $0xa20] ss:$8 sps:$4 sm:$0xff]  }
 0x12f   :  { %2954 = vmatpush2.bf16.msra.mxu0 %v7268_v52  ;;  %v7331_v52 = vld [vmem:[%s10412_s1 + $0xb20] ss:$8 sps:$4 sm:$0xff]  }
 0x130   :  { %2995 = vmatpush2.bf16.msra.mxu1 %v7271_v53  ;;  %2955 = vmatprep.subr.bf16.mxu0 %v7276_v54  ;;  %v7336_v53 = vld [vmem:[%s10412_s1 + $0xa14] ss:$8 sps:$4 sm:$0xff]  }
 0x131   :  { %2996 = vmatprep.subr.bf16.mxu1 %v7279_v55  ;;  %v7339_v54 = vld [vmem:[%s10412_s1 + $0xb14] ss:$8 sps:$4 sm:$0xff]   ;;  %v7334_v55 = vld [vmem:[%s10412_s1 + $0xa10] ss:$8 sps:$4 sm:$0xff]  }
 0x133   :  { %2956 = vmatpush2.bf16.msra.mxu0 %v7274_v56  ;;  %v7337_v56 = vld [vmem:[%s10412_s1 + $0xb10] ss:$8 sps:$4 sm:$0xff]  }
 0x134   :  { %2997 = vmatpush2.bf16.msra.mxu1 %v7277_v57  ;;  %2957 = vmatprep.subr.bf16.mxu0 %v7282_v58  ;;  %v7342_v57 = vld [vmem:[%s10412_s1 + $0xa04] ss:$8 sps:$4 sm:$0xff]  }
 0x135   :  { %2998 = vmatprep.subr.bf16.mxu1 %v7285_v59  ;;  %v7345_v58 = vld [vmem:[%s10412_s1 + $0xb04] ss:$8 sps:$4 sm:$0xff]   ;;  %v7340_v59 = vld [vmem:[%s10412_s1 + $0xa00] ss:$8 sps:$4 sm:$0xff]  }
 0x137   :  { %2958 = vmatpush2.bf16.msra.mxu0 %v7280_v60  ;;  %v7343_v60 = vld [vmem:[%s10412_s1 + $0xb00] ss:$8 sps:$4 sm:$0xff]  }
 0x138   :  { %2999 = vmatpush2.bf16.msra.mxu1 %v7283_v61  ;;  %2959 = vmatprep.subr.bf16.mxu0 %v7288_v63  ;;  %v7348_v61 = vld [vmem:[%s10412_s1 + $0xaf4] ss:$8 sps:$4 sm:$0xff]   ;;  %v7346_v63 = vld [vmem:[%s10412_s1 + $0xaf0] ss:$8 sps:$4 sm:$0xff]  }
 0x139   :  { %3000 = vmatprep.subr.bf16.mxu1 %v7291_v0  ;;  %v7349_v0 = vld [vmem:[%s10412_s1 + $0xbf0] ss:$8 sps:$4 sm:$0xff]  }
 0x13b   :  { %2960 = vmatpush2.bf16.msra.mxu0 %v7286_v1  ;;  %v7354_v1 = vld [vmem:[%s10412_s1 + $0xae4] ss:$8 sps:$4 sm:$0xff]  }
 0x13c   :  { %3001 = vmatpush2.bf16.msra.mxu1 %v7289_v32  ;;  %2961 = vmatprep.subr.bf16.mxu0 %v7294_v4  ;;  %v7357_v32 = vld [vmem:[%s10412_s1 + $0xbe4] ss:$8 sps:$4 sm:$0xff]   ;;  %v7352_v4 = vld [vmem:[%s10412_s1 + $0xae0] ss:$8 sps:$4 sm:$0xff]  }
 0x13d   :  { %3002 = vmatprep.subr.bf16.mxu1 %v7297_v5  ;;  %v7355_v5 = vld [vmem:[%s10412_s1 + $0xbe0] ss:$8 sps:$4 sm:$0xff]  }
 0x13f   :  { %2962 = vmatpush2.bf16.msra.mxu0 %v7292_v7  ;;  %v7360_v7 = vld [vmem:[%s10412_s1 + $0xad4] ss:$8 sps:$4 sm:$0xff]  }
 0x140   :  { %3003 = vmatpush2.bf16.msra.mxu1 %v7295_v8  ;;  %3013 = vmatprep.subr.bf16.mxu0 %v7300_v12  ;;  %v7363_v8 = vld [vmem:[%s10412_s1 + $0xbd4] ss:$8 sps:$4 sm:$0xff]   ;;  %v7366_v12 = vld [vmem:[%s10412_s1 + $0xac4] ss:$8 sps:$4 sm:$0xff]  }
 0x141   :  { %3054 = vmatprep.subr.bf16.mxu1 %v7303_v13  ;;  %v7369_v13 = vld [vmem:[%s10412_s1 + $0xbc4] ss:$8 sps:$4 sm:$0xff]  }
 0x142   :  { %v2719_v22 = vpop.f32.mrf.mxu0  ;;  %2964 = vmatmul.mubr.bf16.vlgmr.msra.gmra.mxu0 %v575_v11  ;;  %v7361_v11 = vld [vmem:[%s10412_s1 + $0xbd0] ss:$8 sps:$4 sm:$0xff]  }
 0x143   :  { %v2760_v23 = vpop.f32.mrf.mxu1  ;;  %3005 = vmatmul.mubr.bf16.vlgmr.msra.gmra.mxu1 %v597_v16  ;;  %v2720_v26 = vadd.f32 %v2719_v22, %v8849_v3  ;;  %3014 = vmatpush1.bf16.msra.mxu0 %v7298_v14  ;;  %v7364_v14 = vld [vmem:[%s10412_s1 + $0xac0] ss:$8 sps:$4 sm:$0xff]   ;;  %v7375_v16 = vld [vmem:[%s10412_s1 + $0xbb4] ss:$8 sps:$4 sm:$0xff]  }
 0x144   :  { %3055 = vmatpush1.bf16.msra.mxu1 %v7301_v35  ;;  %v2721_v27 = vpop.f32.mrf.mxu0  ;;  %3015 = vmatprep.subr.bf16.mxu0 %v7306_v17  ;;  %v7367_v35 = vld [vmem:[%s10412_s1 + $0xbc0] ss:$8 sps:$4 sm:$0xff]   ;;  %v7370_v17 = vld [vmem:[%s10412_s1 + $0xab0] ss:$8 sps:$4 sm:$0xff]  }
 0x145   :  { %v2762_v28 = vpop.f32.mrf.mxu1  ;;  %3056 = vmatprep.subr.bf16.mxu1 %v7309_v18  ;;  %v9056_v30 = vadd.f32 %v2760_v23, %v2720_v26  ;;  %v2722_v31 = vadd.f32 %v2721_v27, %v8857_v10  ;;  %3045 = vmatprep.mubr.bf16.mxu0 %v596_v15  ;;  %v7321_v10 = vld [vmem:[%s10412_s1 + $0xb44] ss:$8 sps:$4 sm:$0xff]   ;;  %v7372_v15 = vld [vmem:[%s10412_s1 + $0xab4] ss:$8 sps:$4 sm:$0xff]   ;;  %v7373_v18 = vld [vmem:[%s10412_s1 + $0xbb0] ss:$8 sps:$4 sm:$0xff]  }
 0x146   :  { %3086 = vmatprep.mubr.bf16.mxu1 %v600_v21  ;;  %v2723_v36 = vpop.f32.mrf.mxu0  ;;  %v7376_v21 = vld [vmem:[%s10412_s1 + $0xaa0] ss:$8 sps:$4 sm:$0xff]   ;;  %v7384_v23 = vld [vmem:[%s10412_s1 + $0xa94] ss:$8 sps:$4 sm:$0xff]   ;;  %v7385_v26 = vld [vmem:[%s10412_s1 + $0xb90] ss:$8 sps:$4 sm:$0xff]  }
 0x147   :  { %v2764_v3 = vpop.f32.mrf.mxu1  ;;  %v9071_v29 = vadd.f32 %v2762_v28, %v2722_v31  ;;  %3016 = vmatpush1.bf16.msra.mxu0 %v7304_v19  ;;  %v7378_v19 = vld [vmem:[%s10412_s1 + $0xaa4] ss:$8 sps:$4 sm:$0xff]   ;;  %v7379_v22 = vld [vmem:[%s10412_s1 + $0xba0] ss:$8 sps:$4 sm:$0xff]   ;;  %v7395_v36 = vld [vmem:[%s10412_s1 + $0xc30] ss:$8 sps:$4 sm:$0xff]  }
 0x148   :  { %3057 = vmatpush1.bf16.msra.mxu1 %v7307_v20  ;;  %3017 = vmatprep.subr.bf16.mxu0 %v7312_v24  ;;  %v2724_v39 = vpop.f32.mrf.mxu0  ;;  %v7381_v20 = vld [vmem:[%s10412_s1 + $0xba4] ss:$8 sps:$4 sm:$0xff]   ;;  %v7387_v24 = vld [vmem:[%s10412_s1 + $0xb94] ss:$8 sps:$4 sm:$0xff]   ;;  %v7388_v31 = vld [vmem:[%s10412_s1 + $0xa80] ss:$8 sps:$4 sm:$0xff]  }
 0x149   :  { %v2765_v38 = vpop.f32.mrf.mxu1  ;;  %3058 = vmatprep.subr.bf16.mxu1 %v7315_v25  ;;  %v7382_v25 = vld [vmem:[%s10412_s1 + $0xa90] ss:$8 sps:$4 sm:$0xff]   ;;  %v7390_v27 = vld [vmem:[%s10412_s1 + $0xa84] ss:$8 sps:$4 sm:$0xff]   ;;  %v7397_v3 = vld [vmem:[%s10412_s1 + $0xc34] ss:$8 sps:$4 sm:$0xff]  }
 0x14a   :  { %v7393_v28 = vld [vmem:[%s10412_s1 + $0xb84] ss:$8 sps:$4 sm:$0xff]  }
 0x14b   :  { %3018 = vmatpush1.bf16.msra.mxu0 %v7310_v33  ;;  %v7391_v33 = vld [vmem:[%s10412_s1 + $0xb80] ss:$8 sps:$4 sm:$0xff]  }
 0x14c   :  { %3059 = vmatpush1.bf16.msra.mxu1 %v7313_v34  ;;  %3019 = vmatprep.subr.bf16.mxu0 %v7318_v37  ;;  %v582_v34 = vrot.slane %v9006_v2, %v8120_v49  ;;  %v7398_v2 = vld [vmem:[%s10412_s1 + $0xc20] ss:$8 sps:$4 sm:$0xff]  }
 0x14d   :  { %3060 = vmatprep.subr.bf16.mxu1 %v7321_v10  ;;  %v7400_v10 = vld [vmem:[%s10412_s1 + $0xc24] ss:$8 sps:$4 sm:$0xff]  }
 0x14e   :  { %v598_v37 = vcombine.high %v582_v34, %v582_v34 }
 0x14f   :  { %3020 = vmatpush1.bf16.msra.mxu0 %v7316_v40  ;;  %v7403_v40 = vld [vmem:[%s10412_s1 + $0xc14] ss:$8 sps:$4 sm:$0xff]  }
 0x150   :  { %3061 = vmatpush1.bf16.msra.mxu1 %v7319_v41  ;;  %3021 = vmatprep.subr.bf16.mxu0 %v7324_v43  ;;  %v7918_v43 = vmov 0  }
 0x151   :  { %3062 = vmatprep.subr.bf16.mxu1 %v7327_v44 }
 0x153   :  { %3022 = vmatpush1.bf16.msra.mxu0 %v7322_v46 }
 0x154   :  { %3063 = vmatpush1.bf16.msra.mxu1 %v7325_v47  ;;  %3023 = vmatprep.subr.bf16.mxu0 %v7330_v6 }
 0x155   :  { %3064 = vmatprep.subr.bf16.mxu1 %v7333_v50  ;;  %v7401_v50 = vld [vmem:[%s10412_s1 + $0xc10] ss:$8 sps:$4 sm:$0xff]  }
 0x157   :  { %3024 = vmatpush1.bf16.msra.mxu0 %v7328_v51 }
 0x158   :  { %3065 = vmatpush1.bf16.msra.mxu1 %v7331_v52  ;;  %3025 = vmatprep.subr.bf16.mxu0 %v7336_v53 }
 0x159   :  { %3066 = vmatprep.subr.bf16.mxu1 %v7339_v54  ;;  %v7406_v54 = vld [vmem:[%s10412_s1 + $0xc04] ss:$8 sps:$4 sm:$0xff]  }
 0x15b   :  { %3026 = vmatpush1.bf16.msra.mxu0 %v7334_v55 }
 0x15c   :  { %3067 = vmatpush1.bf16.msra.mxu1 %v7337_v56  ;;  %3027 = vmatprep.subr.bf16.mxu0 %v7342_v57  ;;  %v7412_v56 = vld [vmem:[%s10414_s3 + $0xec] ss:$16 sps:$4 sm:$0xff]  }
 0x15d   :  { %3068 = vmatprep.subr.bf16.mxu1 %v7345_v58  ;;  %v7418_v57 = vld [vmem:[%s10414_s3 + $0xcc] ss:$16 sps:$4 sm:$0xff]   ;;  %v7404_v58 = vld [vmem:[%s10412_s1 + $0xc00] ss:$8 sps:$4 sm:$0xff]  }
 0x15f   :  { %3028 = vmatpush1.bf16.msra.mxu0 %v7340_v59  ;;  %v6023_v59 = vld.sshfl [vmem:[%s10411_s0 + $0x18] sm:$0x1 pattern:$0x75316420] }
 0x160   :  { %3069 = vmatpush1.bf16.msra.mxu1 %v7343_v60  ;;  %3029 = vmatprep.subr.bf16.mxu0 %v7348_v61  ;;  %v7409_v60 = vld [vmem:[%s10414_s3 + $0xe4] ss:$16 sps:$4 sm:$0xff]   ;;  %v7416_v61 = vld [vmem:[%s10414_s3 + $0xc8] ss:$16 sps:$4 sm:$0xff]  }
 0x161   :  { %3070 = vmatprep.subr.bf16.mxu1 %v7351_v62  ;;  %v7424_v62 = vld [vmem:[%s10414_s3 + $0xac] ss:$16 sps:$4 sm:$0xff]  }
 0x163   :  { %3030 = vmatpush2.bf16.msra.mxu0 %v7346_v63  ;;  %v614_v63 = vrot.slane %v6023_v59, %v8120_v49  ;;  %v7430_v49 = vld [vmem:[%s10414_s3 + $0x8c] ss:$16 sps:$4 sm:$0xff]  }
 0x164   :  { %3071 = vmatpush2.bf16.msra.mxu1 %v7349_v0  ;;  %3031 = vmatprep.subr.bf16.mxu0 %v7354_v1  ;;  %v7407_v0 = vld [vmem:[%s10414_s3 + $0xe0] ss:$16 sps:$4 sm:$0xff]   ;;  %v7415_v1 = vld [vmem:[%s10414_s3 + $0xc4] ss:$16 sps:$4 sm:$0xff]  }
 0x165   :  { %3072 = vmatprep.subr.bf16.mxu1 %v7357_v32  ;;  %v7422_v32 = vld [vmem:[%s10414_s3 + $0xa8] ss:$16 sps:$4 sm:$0xff]  }
 0x167   :  { %3032 = vmatpush2.bf16.msra.mxu0 %v7352_v4  ;;  %v7413_v4 = vld [vmem:[%s10414_s3 + $0xc0] ss:$16 sps:$4 sm:$0xff]  }
 0x168   :  { %3073 = vmatpush2.bf16.msra.mxu1 %v7355_v5  ;;  %3033 = vmatprep.subr.bf16.mxu0 %v7360_v7  ;;  %v7421_v5 = vld [vmem:[%s10414_s3 + $0xa4] ss:$16 sps:$4 sm:$0xff]   ;;  %v7428_v7 = vld [vmem:[%s10414_s3 + $0x88] ss:$16 sps:$4 sm:$0xff]  }
 0x169   :  { %3074 = vmatprep.subr.bf16.mxu1 %v7363_v8  ;;  %v7419_v8 = vld [vmem:[%s10414_s3 + $0xa0] ss:$16 sps:$4 sm:$0xff]  }
 0x16b   :  { %3034 = vmatpush2.bf16.msra.mxu0 %v7358_v9  ;;  %v7436_v9 = vld [vmem:[%s10414_s3 + $0x6c] ss:$16 sps:$4 sm:$0xff]  }
 0x16c   :  { %3075 = vmatpush2.bf16.msra.mxu1 %v7361_v11  ;;  %3035 = vmatprep.subr.bf16.mxu0 %v7366_v12  ;;  %v7427_v11 = vld [vmem:[%s10414_s3 + $0x84] ss:$16 sps:$4 sm:$0xff]   ;;  %v7434_v12 = vld [vmem:[%s10414_s3 + $0x68] ss:$16 sps:$4 sm:$0xff]  }
 0x16d   :  { %3076 = vmatprep.subr.bf16.mxu1 %v7369_v13  ;;  %v7442_v13 = vld [vmem:[%s10414_s3 + $0x4c] ss:$16 sps:$4 sm:$0xff]  }
 0x16f   :  { %3036 = vmatpush2.bf16.msra.mxu0 %v7364_v14 }
 0x170   :  { %3077 = vmatpush2.bf16.msra.mxu1 %v7367_v35  ;;  %3037 = vmatprep.subr.bf16.mxu0 %v7372_v15 }
 0x171   :  { %3078 = vmatprep.subr.bf16.mxu1 %v7375_v16 }
 0x173   :  { %3038 = vmatpush2.bf16.msra.mxu0 %v7370_v17 }
 0x174   :  { %3079 = vmatpush2.bf16.msra.mxu1 %v7373_v18  ;;  %3039 = vmatprep.subr.bf16.mxu0 %v7378_v19 }
 0x175   :  { %3080 = vmatprep.subr.bf16.mxu1 %v7381_v20 }
 0x177   :  { %3040 = vmatpush2.bf16.msra.mxu0 %v7376_v21 }
 0x178   :  { %3081 = vmatpush2.bf16.msra.mxu1 %v7379_v22  ;;  %3041 = vmatprep.subr.bf16.mxu0 %v7384_v23 }
 0x179   :  { %3082 = vmatprep.subr.bf16.mxu1 %v7387_v24 }
 0x17b   :  { %3042 = vmatpush2.bf16.msra.mxu0 %v7382_v25 }
 0x17c   :  { %3083 = vmatpush2.bf16.msra.mxu1 %v7385_v26  ;;  %3043 = vmatprep.subr.bf16.mxu0 %v7390_v27 }
 0x17d   :  { %3084 = vmatprep.subr.bf16.mxu1 %v7393_v28 }
 0x17f   :  { %3044 = vmatpush2.bf16.msra.mxu0 %v7388_v31 }
 0x180   :  { %3085 = vmatpush2.bf16.msra.mxu1 %v7391_v33  ;;  %3587 = vmatprep.subr.bf16.mxu0 %v7412_v56 }
 0x181   :  { %3103 = vmatprep.subr.bf16.mxu1 %v7397_v3 }
 0x182   :  { %v2801_v38 = vpop.f32.mrf.mxu0  ;;  %3046 = vmatmul.mubr.bf16.vlgmr.msra.gmra.mxu0 %v582_v34 }
 0x183   :  { %v2842_v39 = vpop.f32.mrf.mxu1  ;;  %3087 = vmatmul.mubr.bf16.vlgmr.msra.gmra.mxu1 %v598_v37  ;;  %v2802_v41 = vadd.f32 %v2801_v38, %v9056_v30 }
 0x184   :  { %3104 = vmatpush1.bf16.msra.mxu1 %v7395_v36  ;;  %3127 = vmatprep.mubr.bf16.mxu1 %v7918_v43  ;;  %v2803_v44 = vpop.f32.mrf.mxu0 }
 0x185   :  { %v2844_v46 = vpop.f32.mrf.mxu1  ;;  %3105 = vmatprep.subr.bf16.mxu1 %v7400_v10  ;;  %v9242_v47 = vadd.f32 %v2842_v39, %v2802_v41  ;;  %v2804_v6 = vadd.f32 %v2803_v44, %v9071_v29  ;;  %v7410_v29 = vld [vmem:[%s10414_s3 + $0xe8] ss:$16 sps:$4 sm:$0xff]  }
 0x186   :  { %v2805_v52 = vpop.f32.mrf.mxu0  ;;  %3588 = vmatpush1.bf16.msra.mxu0 %v7410_v29 }
 0x187   :  { %v2846_v51 = vpop.f32.mrf.mxu1  ;;  %v9248_v53 = vadd.f32 %v2844_v46, %v2804_v6  ;;  %3589 = vmatprep.subr.bf16.mxu0 %v7418_v57 }
 0x188   :  { %3106 = vmatpush1.bf16.msra.mxu1 %v7398_v2  ;;  %v2806_v55 = vpop.f32.mrf.mxu0 }
 0x189   :  { %v2847_v30 = vpop.f32.mrf.mxu1  ;;  %3107 = vmatprep.subr.bf16.mxu1 %v7403_v40 }
 0x18a   :  { %3590 = vmatpush1.bf16.msra.mxu0 %v7416_v61 }
 0x18b   :  { %3591 = vmatprep.subr.bf16.mxu0 %v7424_v62 }
 0x18c   :  { %3108 = vmatpush1.bf16.msra.mxu1 %v7401_v50 }
 0x18d   :  { %3109 = vmatprep.subr.bf16.mxu1 %v7406_v54 }
 0x18e   :  { %3592 = vmatpush1.bf16.msra.mxu0 %v7422_v32 }
 0x18f   :  { %3593 = vmatprep.subr.bf16.mxu0 %v7430_v49 }
 0x190   :  { %3110 = vmatpush1.bf16.msra.mxu1 %v7404_v58 }
 0x191   :  { %3546 = vmatprep.subr.bf16.mxu1 %v7409_v60 }
 0x192   :  { %3594 = vmatpush1.bf16.msra.mxu0 %v7428_v7 }
 0x193   :  { %6416 = vmatmul.mubr.msk.bf16.vlgmr.msra.gmra.mxu1 %vm2599_vm0, %v614_v63  ;;  %3595 = vmatprep.subr.bf16.mxu0 %v7436_v9 }
 0x194   :  { %3547 = vmatpush1.bf16.msra.mxu1 %v7407_v0 }
 0x195   :  { %3548 = vmatprep.subr.bf16.mxu1 %v7415_v1 }
 0x198   :  { %3549 = vmatpush1.bf16.msra.mxu1 %v7413_v4 }
 0x199   :  { %3550 = vmatprep.subr.bf16.mxu1 %v7421_v5 }
 0x19a   :  { %18 = vsyncpa [#allocation3], 0  ;;  %v7425_v14 = vld [vmem:[%s10414_s3 + $0x80] ss:$16 sps:$4 sm:$0xff]   ;;  %v7433_v35 = vld [vmem:[%s10414_s3 + $0x64] ss:$16 sps:$4 sm:$0xff]   ;;  %3596 = vmatpush1.bf16.msra.mxu0 %v7434_v12 }
 0x19b   :  { %v7440_v15 = vld [vmem:[%s10414_s3 + $0x48] ss:$16 sps:$4 sm:$0xff]   ;;  %3597 = vmatprep.subr.bf16.mxu0 %v7442_v13  ;;  %v7448_v16 = vld [vmem:[%s10414_s3 + $0x2c] ss:$16 sps:$4 sm:$0xff]   ;;  %v7431_v17 = vld [vmem:[%s10414_s3 + $0x60] ss:$16 sps:$4 sm:$0xff]  }
 0x19c   :  { %3551 = vmatpush1.bf16.msra.mxu1 %v7419_v8  ;;  %v7439_v18 = vld [vmem:[%s10414_s3 + $0x44] ss:$16 sps:$4 sm:$0xff]   ;;  %v7446_v19 = vld [vmem:[%s10414_s3 + $0x28] ss:$16 sps:$4 sm:$0xff]   ;;  %v7454_v20 = vld [vmem:[%s10414_s3 + $0xc] ss:$16 sps:$4 sm:$0xff]  }
 0x19d   :  { %3552 = vmatprep.subr.bf16.mxu1 %v7427_v11  ;;  %v7437_v21 = vld [vmem:[%s10414_s3 + $0x40] ss:$16 sps:$4 sm:$0xff]   ;;  %v7445_v22 = vld [vmem:[%s10414_s3 + $0x24] ss:$16 sps:$4 sm:$0xff]   ;;  %v7452_v23 = vld [vmem:[%s10414_s3 + $0x8] ss:$16 sps:$4 sm:$0xff]  }
 0x19e   :  { %3598 = vmatpush1.bf16.msra.mxu0 %v7440_v15  ;;  %v7460_v24 = vld [vmem:[%s10414_s3 + $0x1ec] ss:$16 sps:$4 sm:$0xff]   ;;  %v7443_v25 = vld [vmem:[%s10414_s3 + $0x20] ss:$16 sps:$4 sm:$0xff]   ;;  %v7451_v26 = vld [vmem:[%s10414_s3 + $0x4] ss:$16 sps:$4 sm:$0xff]  }
 0x19f   :  { %3599 = vmatprep.subr.bf16.mxu0 %v7448_v16  ;;  %v7458_v27 = vld [vmem:[%s10414_s3 + $0x1e8] ss:$16 sps:$4 sm:$0xff]   ;;  %v7466_v28 = vld [vmem:[%s10414_s3 + $0x1cc] ss:$16 sps:$4 sm:$0xff]   ;;  %v7449_v31 = vld [vmem:[%s10414_s3] ss:$16 sps:$4 sm:$0xff]  }
 0x1a0   :  { %3553 = vmatpush1.bf16.msra.mxu1 %v7425_v14  ;;  %v7457_v33 = vld [vmem:[%s10414_s3 + $0x1e4] ss:$16 sps:$4 sm:$0xff]   ;;  %v7464_v34 = vld [vmem:[%s10414_s3 + $0x1c8] ss:$16 sps:$4 sm:$0xff]   ;;  %v7455_v3 = vld [vmem:[%s10414_s3 + $0x1e0] ss:$16 sps:$4 sm:$0xff]  }
 0x1a1   :  { %3554 = vmatprep.subr.bf16.mxu1 %v7433_v35  ;;  %v7463_v36 = vld [vmem:[%s10414_s3 + $0x1c4] ss:$16 sps:$4 sm:$0xff]   ;;  %v7461_v37 = vld [vmem:[%s10414_s3 + $0x1c0] ss:$16 sps:$4 sm:$0xff]   ;;  %v7472_v39 = vld [vmem:[%s10414_s3 + $0x1ac] ss:$16 sps:$4 sm:$0xff]  }
 0x1a2   :  { %3600 = vmatpush1.bf16.msra.mxu0 %v7446_v19  ;;  %v7469_v38 = vld [vmem:[%s10414_s3 + $0x1a4] ss:$16 sps:$4 sm:$0xff]   ;;  %v7467_v41 = vld [vmem:[%s10414_s3 + $0x1a0] ss:$16 sps:$4 sm:$0xff]   ;;  %v7470_v44 = vld [vmem:[%s10414_s3 + $0x1a8] ss:$16 sps:$4 sm:$0xff]  }
 0x1a3   :  { %3601 = vmatprep.subr.bf16.mxu0 %v7454_v20  ;;  %v7478_v54 = vld [vmem:[%s10414_s3 + $0x18c] ss:$16 sps:$4 sm:$0xff]   ;;  %v7473_v29 = vld [vmem:[%s10414_s3 + $0x180] ss:$16 sps:$4 sm:$0xff]   ;;  %v7481_v58 = vld [vmem:[%s10414_s3 + $0x164] ss:$16 sps:$4 sm:$0xff]  }
 0x1a4   :  { %3555 = vmatpush1.bf16.msra.mxu1 %v7431_v17  ;;  %v7479_v59 = vld [vmem:[%s10414_s3 + $0x160] ss:$16 sps:$4 sm:$0xff]   ;;  %v7482_v60 = vld [vmem:[%s10414_s3 + $0x168] ss:$16 sps:$4 sm:$0xff]   ;;  %v7484_v61 = vld [vmem:[%s10414_s3 + $0x16c] ss:$16 sps:$4 sm:$0xff]  }
 0x1a5   :  { %3556 = vmatprep.subr.bf16.mxu1 %v7439_v18  ;;  %v7487_v62 = vld [vmem:[%s10414_s3 + $0x144] ss:$16 sps:$4 sm:$0xff]   ;;  %v7490_v63 = vld [vmem:[%s10414_s3 + $0x14c] ss:$16 sps:$4 sm:$0xff]   ;;  %v7485_v0 = vld [vmem:[%s10414_s3 + $0x140] ss:$16 sps:$4 sm:$0xff]  }
 0x1a6   :  { %3602 = vmatpush1.bf16.msra.mxu0 %v7452_v23  ;;  %v7488_v1 = vld [vmem:[%s10414_s3 + $0x148] ss:$16 sps:$4 sm:$0xff]   ;;  %v7493_v32 = vld [vmem:[%s10414_s3 + $0x124] ss:$16 sps:$4 sm:$0xff]   ;;  %v7496_v49 = vld [vmem:[%s10414_s3 + $0x12c] ss:$16 sps:$4 sm:$0xff]  }
 0x1a7   :  { %3603 = vmatprep.subr.bf16.mxu0 %v7460_v24  ;;  %v7491_v4 = vld [vmem:[%s10414_s3 + $0x120] ss:$16 sps:$4 sm:$0xff]   ;;  %v7494_v5 = vld [vmem:[%s10414_s3 + $0x128] ss:$16 sps:$4 sm:$0xff]   ;;  %v7499_v7 = vld [vmem:[%s10414_s3 + $0x104] ss:$16 sps:$4 sm:$0xff]  }
 0x1a8   :  { %3557 = vmatpush1.bf16.msra.mxu1 %v7437_v21  ;;  %v7502_v8 = vld [vmem:[%s10414_s3 + $0x10c] ss:$16 sps:$4 sm:$0xff]   ;;  %v7497_v9 = vld [vmem:[%s10414_s3 + $0x100] ss:$16 sps:$4 sm:$0xff]   ;;  %v7500_v11 = vld [vmem:[%s10414_s3 + $0x108] ss:$16 sps:$4 sm:$0xff]  }
 0x1a9   :  { %3558 = vmatprep.subr.bf16.mxu1 %v7445_v22  ;;  %v7505_v12 = vld [vmem:[%s10416_s5 + $0xe4] ss:$16 sps:$4 sm:$0xff]   ;;  %s7919_s27 = smov [#allocation2]  }
 0x1aa   :  { %3604 = vmatpush2.bf16.msra.mxu0 %v7458_v27  ;;  %v7520_v13 = vld [vmem:[%s10416_s5 + $0x2e4] ss:$16 sps:$4 sm:$0xff]  }
 0x1ab   :  { %3605 = vmatprep.subr.bf16.mxu0 %v7466_v28 }
 0x1ac   :  { %3559 = vmatpush1.bf16.msra.mxu1 %v7443_v25 }
 0x1ad   :  { %3560 = vmatprep.subr.bf16.mxu1 %v7451_v26 }
 0x1ae   :  { %3606 = vmatpush2.bf16.msra.mxu0 %v7464_v34 }
 0x1af   :  { %3607 = vmatprep.subr.bf16.mxu0 %v7472_v39 }
 0x1b0   :  { %3561 = vmatpush1.bf16.msra.mxu1 %v7449_v31 }
 0x1b1   :  { %3562 = vmatprep.subr.bf16.mxu1 %v7457_v33 }
 0x1b2   :  { %3608 = vmatpush2.bf16.msra.mxu0 %v7470_v44 }
 0x1b3   :  { %3609 = vmatprep.subr.bf16.mxu0 %v7478_v54  ;;  %v7508_v54 = vld [vmem:[%s10416_s5 + $0xc4] ss:$16 sps:$4 sm:$0xff]  }
 0x1b4   :  { %3563 = vmatpush2.bf16.msra.mxu1 %v7455_v3 }
 0x1b5   :  { %3564 = vmatprep.subr.bf16.mxu1 %v7463_v36 }
 0x1b8   :  { %3565 = vmatpush2.bf16.msra.mxu1 %v7461_v37 }
 0x1b9   :  { %3566 = vmatprep.subr.bf16.mxu1 %v7469_v38 }
 0x1bc   :  { %3567 = vmatpush2.bf16.msra.mxu1 %v7467_v41 }
 0x1c2   :  { %v2883_v10 = vpop.f32.mrf.mxu0 }
 0x1c3   :  { %v2924_v2 = vpop.f32.mrf.mxu1  ;;  %v2884_v40 = vadd.f32 %v2883_v10, %v9242_v47  ;;  %v7475_v47 = vld [vmem:[%s10414_s3 + $0x184] ss:$16 sps:$4 sm:$0xff]  }
 0x1c4   :  { %v2885_v46 = vpop.f32.mrf.mxu0  ;;  %3568 = vmatprep.subr.bf16.mxu1 %v7475_v47 }
 0x1c5   :  { %v2926_v6 = vpop.f32.mrf.mxu1  ;;  %v2925_v50 = vadd.f32 %v2924_v2, %v2884_v40  ;;  %v2886_v51 = vadd.f32 %v2885_v46, %v9248_v53  ;;  %v7476_v53 = vld [vmem:[%s10414_s3 + $0x188] ss:$16 sps:$4 sm:$0xff]   ;;  %3569 = vmatpush2.bf16.msra.mxu1 %v7473_v29  ;;  %v7506_v29 = vld [vmem:[%s10416_s5 + $0xc0] ss:$16 sps:$4 sm:$0xff]  }
 0x1c6   :  { %v2887_v30 = vpop.f32.mrf.mxu0  ;;  %3610 = vmatpush2.bf16.msra.mxu0 %v7476_v53  ;;  %3570 = vmatprep.subr.bf16.mxu1 %v7481_v58  ;;  %v7524_v53 = vld [vmem:[%s10416_s5 + $0x2c0] ss:$16 sps:$4 sm:$0xff]  }
 0x1c7   :  { %v2928_v52 = vpop.f32.mrf.mxu1  ;;  %v2927_v55 = vadd.f32 %v2926_v6, %v2886_v51  ;;  %3611 = vmatprep.subr.bf16.mxu0 %v7484_v61  ;;  %v7518_v30 = vld [vmem:[%s10416_s5 + $0x2e0] ss:$16 sps:$4 sm:$0xff]   ;;  %v7538_v61 = vld [vmem:[%s10416_s5 + $0x284] ss:$16 sps:$4 sm:$0xff]  }
 0x1c8   :  { %v2888_v57 = vpop.f32.mrf.mxu0  ;;  %v7503_v52 = vld [vmem:[%s10416_s5 + $0xe0] ss:$16 sps:$4 sm:$0xff]  }
 0x1c9   :  { %v2929_v56 = vpop.f32.mrf.mxu1  ;;  %3571 = vmatpush2.bf16.msra.mxu1 %v7479_v59  ;;  %v7532_v57 = vld [vmem:[%s10416_s5 + $0x2a4] ss:$16 sps:$4 sm:$0xff]   ;;  %v7509_v58 = vld [vmem:[%s10416_s5 + $0xa0] ss:$16 sps:$4 sm:$0xff]  }
 0x1ca   :  { %3612 = vmatpush2.bf16.msra.mxu0 %v7482_v60  ;;  %3572 = vmatprep.subr.bf16.mxu1 %v7487_v62  ;;  %v7511_v56 = vld [vmem:[%s10416_s5 + $0xa4] ss:$16 sps:$4 sm:$0xff]   ;;  %v7530_v59 = vld [vmem:[%s10416_s5 + $0x2a0] ss:$16 sps:$4 sm:$0xff]  }
 0x1cb   :  { %3613 = vmatprep.subr.bf16.mxu0 %v7490_v63  ;;  %v7514_v60 = vld [vmem:[%s10416_s5 + $0x84] ss:$16 sps:$4 sm:$0xff]   ;;  %v7512_v62 = vld [vmem:[%s10416_s5 + $0x80] ss:$16 sps:$4 sm:$0xff]  }
 0x1cc   :  { %v7536_v63 = vld [vmem:[%s10416_s5 + $0x280] ss:$16 sps:$4 sm:$0xff]  }
 0x1cd   :  { %3573 = vmatpush2.bf16.msra.mxu1 %v7485_v0  ;;  %v7517_v0 = vld [vmem:[%s10416_s5 + $0x64] ss:$16 sps:$4 sm:$0xff]  }
 0x1ce   :  { %3614 = vmatpush2.bf16.msra.mxu0 %v7488_v1  ;;  %3574 = vmatprep.subr.bf16.mxu1 %v7493_v32  ;;  %v7544_v1 = vld [vmem:[%s10416_s5 + $0x264] ss:$16 sps:$4 sm:$0xff]   ;;  %v7515_v32 = vld [vmem:[%s10416_s5 + $0x60] ss:$16 sps:$4 sm:$0xff]  }
 0x1cf   :  { %3615 = vmatprep.subr.bf16.mxu0 %v7496_v49  ;;  %v7542_v49 = vld [vmem:[%s10416_s5 + $0x260] ss:$16 sps:$4 sm:$0xff]  }
 0x1d1   :  { %3575 = vmatpush2.bf16.msra.mxu1 %v7491_v4  ;;  %v7523_v4 = vld [vmem:[%s10416_s5 + $0x44] ss:$16 sps:$4 sm:$0xff]  }
 0x1d2   :  { %3616 = vmatpush2.bf16.msra.mxu0 %v7494_v5  ;;  %3576 = vmatprep.subr.bf16.mxu1 %v7499_v7  ;;  %v7550_v5 = vld [vmem:[%s10416_s5 + $0x244] ss:$16 sps:$4 sm:$0xff]   ;;  %v7521_v7 = vld [vmem:[%s10416_s5 + $0x40] ss:$16 sps:$4 sm:$0xff]  }
 0x1d3   :  { %3617 = vmatprep.subr.bf16.mxu0 %v7502_v8  ;;  %v7548_v8 = vld [vmem:[%s10416_s5 + $0x240] ss:$16 sps:$4 sm:$0xff]  }
 0x1d5   :  { %3577 = vmatpush2.bf16.msra.mxu1 %v7497_v9  ;;  %v7529_v9 = vld [vmem:[%s10416_s5 + $0x24] ss:$16 sps:$4 sm:$0xff]  }
 0x1d6   :  { %3618 = vmatpush2.bf16.msra.mxu0 %v7500_v11  ;;  %4333 = vmatprep.subr.bf16.mxu1 %v7505_v12  ;;  %v7556_v11 = vld [vmem:[%s10416_s5 + $0x224] ss:$16 sps:$4 sm:$0xff]   ;;  %v7527_v12 = vld [vmem:[%s10416_s5 + $0x20] ss:$16 sps:$4 sm:$0xff]  }
 0x1d7   :  { %4374 = vmatprep.subr.bf16.mxu0 %v7520_v13  ;;  %v7554_v13 = vld [vmem:[%s10416_s5 + $0x220] ss:$16 sps:$4 sm:$0xff]  }
 0x202   :  { %v2965_v14 = vpop.f32.mrf.mxu0 }
 0x203   :  { %v3006_v35 = vpop.f32.mrf.mxu1  ;;  %v2966_v15 = vadd.f32 %v2965_v14, %v2925_v50  ;;  %v7535_v14 = vld [vmem:[%s10416_s5 + $0x4] ss:$16 sps:$4 sm:$0xff]  }
 0x204   :  { %v2967_v16 = vpop.f32.mrf.mxu0 }
 0x205   :  { %v3008_v17 = vpop.f32.mrf.mxu1  ;;  %v3007_v18 = vadd.f32 %v3006_v35, %v2966_v15  ;;  %v2968_v19 = vadd.f32 %v2967_v16, %v2927_v55  ;;  %v7526_v55 = vld [vmem:[%s10416_s5 + $0x2c4] ss:$16 sps:$4 sm:$0xff]   ;;  %v7533_v15 = vld [vmem:[%s10416_s5] ss:$16 sps:$4 sm:$0xff]  }
 0x206   :  { %v2969_v21 = vpop.f32.mrf.mxu0  ;;  %v7562_v35 = vld [vmem:[%s10416_s5 + $0x204] ss:$16 sps:$4 sm:$0xff]   ;;  %v7560_v16 = vld [vmem:[%s10416_s5 + $0x200] ss:$16 sps:$4 sm:$0xff]  }
 0x207   :  { %v3010_v20 = vpop.f32.mrf.mxu1  ;;  %v3009_v22 = vadd.f32 %v3008_v17, %v2968_v19  ;;  %v7541_v17 = vld [vmem:[%s10416_s5 + $0x1e4] ss:$16 sps:$4 sm:$0xff]   ;;  %v7539_v19 = vld [vmem:[%s10416_s5 + $0x1e0] ss:$16 sps:$4 sm:$0xff]  }
 0x208   :  { %v2970_v24 = vpop.f32.mrf.mxu0  ;;  %v7566_v20 = vld [vmem:[%s10416_s5 + $0x360] ss:$16 sps:$4 sm:$0xff]   ;;  %v7547_v21 = vld [vmem:[%s10416_s5 + $0x1c4] ss:$16 sps:$4 sm:$0xff]  }
 0x209   :  { %v3011_v23 = vpop.f32.mrf.mxu1  ;;  %v7572_v24 = vld [vmem:[%s10416_s5 + $0x340] ss:$16 sps:$4 sm:$0xff]  }
 0x20a   :  { %v7545_v23 = vld [vmem:[%s10416_s5 + $0x1c0] ss:$16 sps:$4 sm:$0xff]  }
 0x242   :  { %v3047_v25 = vpop.f32.mrf.mxu0 }
 0x243   :  { %v3088_v26 = vpop.f32.mrf.mxu1  ;;  %v3048_v36 = vadd.f32 %v3047_v25, %v3007_v18  ;;  %v7568_v18 = vld [vmem:[%s10416_s5 + $0x364] ss:$16 sps:$4 sm:$0xff]  }
 0x244   :  { %v3049_v27 = vpop.f32.mrf.mxu0  ;;  %v7553_v25 = vld [vmem:[%s10416_s5 + $0x1a4] ss:$16 sps:$4 sm:$0xff]  }
 0x245   :  { %v3090_v28 = vpop.f32.mrf.mxu1  ;;  %v3050_v37 = vadd.f32 %v3049_v27, %v3009_v22  ;;  %v3089_v10 = vadd.f32 %v3088_v26, %v3048_v36  ;;  %v7574_v22 = vld [vmem:[%s10416_s5 + $0x344] ss:$16 sps:$4 sm:$0xff]   ;;  %v7551_v26 = vld [vmem:[%s10416_s5 + $0x1a0] ss:$16 sps:$4 sm:$0xff]  }
 0x246   :  { %v3051_v33 = vpop.f32.mrf.mxu0  ;;  %v7559_v27 = vld [vmem:[%s10416_s5 + $0x184] ss:$16 sps:$4 sm:$0xff]  }
 0x247   :  { %v3092_v31 = vpop.f32.mrf.mxu1  ;;  %v3091_v38 = vadd.f32 %v3090_v28, %v3050_v37  ;;  %v7557_v28 = vld [vmem:[%s10416_s5 + $0x180] ss:$16 sps:$4 sm:$0xff]   ;;  %v7577_v36 = vld [vmem:[%s10416_s5 + $0x124] ss:$16 sps:$4 sm:$0xff]  }
 0x248   :  { %v3052_v3 = vpop.f32.mrf.mxu0  ;;  %v7565_v31 = vld [vmem:[%s10416_s5 + $0x164] ss:$16 sps:$4 sm:$0xff]   ;;  %v7563_v33 = vld [vmem:[%s10416_s5 + $0x160] ss:$16 sps:$4 sm:$0xff]  }
 0x249   :  { %v3093_v34 = vpop.f32.mrf.mxu1  ;;  %v7569_v3 = vld [vmem:[%s10416_s5 + $0x140] ss:$16 sps:$4 sm:$0xff]   ;;  %v7580_v37 = vld [vmem:[%s10416_s5 + $0x324] ss:$16 sps:$4 sm:$0xff]  }
 0x24a   :  { %v7571_v34 = vld [vmem:[%s10416_s5 + $0x144] ss:$16 sps:$4 sm:$0xff]  }
 0x253   :  { %v3129_v2 = vpop.f32.mrf.mxu1 }
 0x254   :  { %v3130_v39 = vadd.f32 %v3129_v2, %v3089_v10  ;;  %v7575_v10 = vld [vmem:[%s10416_s5 + $0x120] ss:$16 sps:$4 sm:$0xff]  }
 0x255   :  { %v3131_v40 = vpop.f32.mrf.mxu1  ;;  %v7578_v2 = vld [vmem:[%s10416_s5 + $0x320] ss:$16 sps:$4 sm:$0xff]  }
 0x256   :  { %v3132_v41 = vadd.f32 %v3131_v40, %v3091_v38  ;;  %v3136_v44 = vmax.f32 %v3130_v39, 0.0  ;;  %v7583_v38 = vld [vmem:[%s10416_s5 + $0x104] ss:$16 sps:$4 sm:$0xff]   ;;  %v7581_v40 = vld [vmem:[%s10416_s5 + $0x100] ss:$16 sps:$4 sm:$0xff]  }
 0x257   :  { %v3133_v46 = vpop.f32.mrf.mxu1  ;;  %v7586_v39 = vld [vmem:[%s10416_s5 + $0x304] ss:$16 sps:$4 sm:$0xff]  }
 0x258   :  { %v3137_v6 = vmax.f32 %v3132_v41, 0.0  ;;  %v3138_v47 = vpack.c.bf16 %v3136_v44, %v3136_v44  ;;  %v7584_v41 = vld [vmem:[%s10416_s5 + $0x300] ss:$16 sps:$4 sm:$0xff]   ;;  %v7589_v44 = vld [vmem:[%s10416_s5 + $0xec] ss:$16 sps:$4 sm:$0xff]  }
 0x259   :  { %v3134_v50 = vpop.f32.mrf.mxu1  ;;  %v7592_v46 = vld [vmem:[%s10416_s5 + $0x2ec] ss:$16 sps:$4 sm:$0xff]  }
 0x25a   :  { %v3139_v51 = vpack.c.bf16 %v3137_v6, %v3137_v6  ;;  %v9630_v6 = vsub.s32 2, %v8102_v42  ;;  %v3204_v50 = vld [vmem:[%s10415_s4] sm:$0xf] }
 0x25c   :  { %3578 = vmatprep.mubr.bf16.mxu1 %v3139_v51  ;;  %3619 = vmatprep.mubr.bf16.mxu0 %v3139_v51  ;;  %v9636_v51 = vsub.s32 3, %v8102_v42 }
 0x25d   :  { %3579 = vmatmul.mubr.bf16.vlgmr.msra.gmra.mxu1 %v3138_v47  ;;  %3620 = vmatmul.mubr.bf16.vlgmr.msra.gmra.mxu0 %v3138_v47  ;;  %v3213_v47 = vrot.slane %v3204_v50, %v8820_v48 }
 0x25e   :  { %4334 = vmatpush1.bf16.msra.mxu1 %v7503_v52  ;;  %4375 = vmatpush1.bf16.msra.mxu0 %v7518_v30  ;;  %v3209_v52 = vrot.slane %v3204_v50, %v8811_v45  ;;  %v3217_v30 = vrot.slane %v3204_v50, %v9630_v6 }
 0x25f   :  { %4335 = vmatprep.subr.bf16.mxu1 %v7508_v54  ;;  %4376 = vmatprep.subr.bf16.mxu0 %v7526_v55  ;;  %v3221_v54 = vrot.slane %v3204_v50, %v9636_v51  ;;  %v7643_v50 = vld [vmem:[%s10416_s5 + $0x1cc] ss:$16 sps:$4 sm:$0xff]  }
 0x262   :  { %4336 = vmatpush1.bf16.msra.mxu1 %v7506_v29  ;;  %4377 = vmatpush1.bf16.msra.mxu0 %v7524_v53 }
 0x263   :  { %4337 = vmatprep.subr.bf16.mxu1 %v7511_v56  ;;  %4378 = vmatprep.subr.bf16.mxu0 %v7532_v57 }
 0x266   :  { %4338 = vmatpush1.bf16.msra.mxu1 %v7509_v58  ;;  %4379 = vmatpush1.bf16.msra.mxu0 %v7530_v59 }
 0x267   :  { %4339 = vmatprep.subr.bf16.mxu1 %v7514_v60  ;;  %4380 = vmatprep.subr.bf16.mxu0 %v7538_v61 }
 0x26a   :  { %4340 = vmatpush1.bf16.msra.mxu1 %v7512_v62  ;;  %4381 = vmatpush1.bf16.msra.mxu0 %v7536_v63 }
 0x26b   :  { %4341 = vmatprep.subr.bf16.mxu1 %v7517_v0  ;;  %4382 = vmatprep.subr.bf16.mxu0 %v7544_v1 }
 0x26e   :  { %4342 = vmatpush1.bf16.msra.mxu1 %v7515_v32  ;;  %4383 = vmatpush1.bf16.msra.mxu0 %v7542_v49 }
 0x26f   :  { %4343 = vmatprep.subr.bf16.mxu1 %v7523_v4  ;;  %4384 = vmatprep.subr.bf16.mxu0 %v7550_v5 }
 0x272   :  { %4344 = vmatpush1.bf16.msra.mxu1 %v7521_v7  ;;  %4385 = vmatpush1.bf16.msra.mxu0 %v7548_v8  ;;  %v7587_v7 = vld [vmem:[%s10416_s5 + $0xe8] ss:$16 sps:$4 sm:$0xff]  }
 0x273   :  { %4345 = vmatprep.subr.bf16.mxu1 %v7529_v9  ;;  %4386 = vmatprep.subr.bf16.mxu0 %v7556_v11  ;;  %v7590_v8 = vld [vmem:[%s10416_s5 + $0x2e8] ss:$16 sps:$4 sm:$0xff]  }
 0x276   :  { %4346 = vmatpush1.bf16.msra.mxu1 %v7527_v12  ;;  %4387 = vmatpush1.bf16.msra.mxu0 %v7554_v13  ;;  %v7595_v12 = vld [vmem:[%s10416_s5 + $0xcc] ss:$16 sps:$4 sm:$0xff]  }
 0x277   :  { %4347 = vmatprep.subr.bf16.mxu1 %v7535_v14  ;;  %4388 = vmatprep.subr.bf16.mxu0 %v7562_v35  ;;  %v7598_v13 = vld [vmem:[%s10416_s5 + $0x2cc] ss:$16 sps:$4 sm:$0xff]   ;;  %v7593_v14 = vld [vmem:[%s10416_s5 + $0xc8] ss:$16 sps:$4 sm:$0xff]  }
 0x278   :  { %v7596_v35 = vld [vmem:[%s10416_s5 + $0x2c8] ss:$16 sps:$4 sm:$0xff]  }
 0x27a   :  { %4348 = vmatpush1.bf16.msra.mxu1 %v7533_v15  ;;  %4389 = vmatpush1.bf16.msra.mxu0 %v7560_v16  ;;  %v7601_v15 = vld [vmem:[%s10416_s5 + $0xac] ss:$16 sps:$4 sm:$0xff]  }
 0x27b   :  { %4349 = vmatprep.subr.bf16.mxu1 %v7541_v17  ;;  %4398 = vmatprep.subr.bf16.mxu0 %v7568_v18  ;;  %v7604_v16 = vld [vmem:[%s10416_s5 + $0x2ac] ss:$16 sps:$4 sm:$0xff]   ;;  %v7599_v17 = vld [vmem:[%s10416_s5 + $0xa8] ss:$16 sps:$4 sm:$0xff]  }
 0x27c   :  { %v7602_v18 = vld [vmem:[%s10416_s5 + $0x2a8] ss:$16 sps:$4 sm:$0xff]  }
 0x27e   :  { %4350 = vmatpush2.bf16.msra.mxu1 %v7539_v19  ;;  %4399 = vmatpush2.bf16.msra.mxu0 %v7566_v20  ;;  %v7607_v19 = vld [vmem:[%s10416_s5 + $0x8c] ss:$16 sps:$4 sm:$0xff]  }
 0x27f   :  { %4351 = vmatprep.subr.bf16.mxu1 %v7547_v21  ;;  %4400 = vmatprep.subr.bf16.mxu0 %v7574_v22  ;;  %v7610_v20 = vld [vmem:[%s10416_s5 + $0x28c] ss:$16 sps:$4 sm:$0xff]   ;;  %v7605_v21 = vld [vmem:[%s10416_s5 + $0x88] ss:$16 sps:$4 sm:$0xff]  }
 0x280   :  { %v7608_v22 = vld [vmem:[%s10416_s5 + $0x288] ss:$16 sps:$4 sm:$0xff]  }
 0x282   :  { %4352 = vmatpush2.bf16.msra.mxu1 %v7545_v23  ;;  %4401 = vmatpush2.bf16.msra.mxu0 %v7572_v24  ;;  %v7613_v23 = vld [vmem:[%s10416_s5 + $0x6c] ss:$16 sps:$4 sm:$0xff]  }
 0x283   :  { %4353 = vmatprep.subr.bf16.mxu1 %v7553_v25  ;;  %4402 = vmatprep.subr.bf16.mxu0 %v7580_v37  ;;  %v7616_v24 = vld [vmem:[%s10416_s5 + $0x26c] ss:$16 sps:$4 sm:$0xff]   ;;  %v7611_v25 = vld [vmem:[%s10416_s5 + $0x68] ss:$16 sps:$4 sm:$0xff]  }
 0x284   :  { %v7626_v37 = vld [vmem:[%s10416_s5 + $0x228] ss:$16 sps:$4 sm:$0xff]  }
 0x286   :  { %4354 = vmatpush2.bf16.msra.mxu1 %v7551_v26  ;;  %4403 = vmatpush2.bf16.msra.mxu0 %v7578_v2  ;;  %v7614_v26 = vld [vmem:[%s10416_s5 + $0x268] ss:$16 sps:$4 sm:$0xff]   ;;  %v7634_v2 = vld [vmem:[%s10416_s5 + $0x20c] ss:$16 sps:$4 sm:$0xff]  }
 0x287   :  { %4355 = vmatprep.subr.bf16.mxu1 %v7559_v27  ;;  %4404 = vmatprep.subr.bf16.mxu0 %v7586_v39  ;;  %v7619_v27 = vld [vmem:[%s10416_s5 + $0x4c] ss:$16 sps:$4 sm:$0xff]   ;;  %v7632_v39 = vld [vmem:[%s10416_s5 + $0x208] ss:$16 sps:$4 sm:$0xff]  }
 0x28a   :  { %4356 = vmatpush2.bf16.msra.mxu1 %v7557_v28  ;;  %4405 = vmatpush2.bf16.msra.mxu0 %v7584_v41  ;;  %v7622_v28 = vld [vmem:[%s10416_s5 + $0x24c] ss:$16 sps:$4 sm:$0xff]  }
 0x28b   :  { %4357 = vmatprep.subr.bf16.mxu1 %v7565_v31  ;;  %4415 = vmatprep.subr.bf16.mxu0 %v7589_v44  ;;  %v7617_v31 = vld [vmem:[%s10416_s5 + $0x48] ss:$16 sps:$4 sm:$0xff]   ;;  %v7640_v41 = vld [vmem:[%s10416_s5 + $0x36c] ss:$16 sps:$4 sm:$0xff]  }
 0x28c   :  { %v7635_v44 = vld [vmem:[%s10416_s5 + $0x1e8] ss:$16 sps:$4 sm:$0xff]  }
 0x28e   :  { %4358 = vmatpush2.bf16.msra.mxu1 %v7563_v33  ;;  %v7620_v33 = vld [vmem:[%s10416_s5 + $0x248] ss:$16 sps:$4 sm:$0xff]  }
 0x28f   :  { %4359 = vmatprep.subr.bf16.mxu1 %v7571_v34  ;;  %v7625_v34 = vld [vmem:[%s10416_s5 + $0x2c] ss:$16 sps:$4 sm:$0xff]  }
 0x292   :  { %4360 = vmatpush2.bf16.msra.mxu1 %v7569_v3  ;;  %v7628_v3 = vld [vmem:[%s10416_s5 + $0x22c] ss:$16 sps:$4 sm:$0xff]  }
 0x293   :  { %4361 = vmatprep.subr.bf16.mxu1 %v7577_v36  ;;  %v7623_v36 = vld [vmem:[%s10416_s5 + $0x28] ss:$16 sps:$4 sm:$0xff]  }
 0x296   :  { %4362 = vmatpush2.bf16.msra.mxu1 %v7575_v10  ;;  %v7631_v10 = vld [vmem:[%s10416_s5 + $0xc] ss:$16 sps:$4 sm:$0xff]  }
 0x297   :  { %4363 = vmatprep.subr.bf16.mxu1 %v7583_v38  ;;  %v7629_v38 = vld [vmem:[%s10416_s5 + $0x8] ss:$16 sps:$4 sm:$0xff]  }
 0x29a   :  { %4364 = vmatpush2.bf16.msra.mxu1 %v7581_v40  ;;  %v7637_v40 = vld [vmem:[%s10416_s5 + $0x1ec] ss:$16 sps:$4 sm:$0xff]  }
 0x29b   :  { %4456 = vmatprep.subr.bf16.mxu1 %v7592_v46  ;;  %v7638_v46 = vld [vmem:[%s10416_s5 + $0x368] ss:$16 sps:$4 sm:$0xff]  }
 0x31d   :  { %v3580_v55 = vpop.f32.mrf.mxu1  ;;  %v3621_v29 = vpop.f32.mrf.mxu0 }
 0x31e   :  { %v3581_v53 = vadd.f32 %v3580_v55, %v3209_v52  ;;  %v3622_v56 = vadd.f32 %v3621_v29, %v3217_v30  ;;  %v7646_v52 = vld [vmem:[%s10416_s5 + $0x34c] ss:$16 sps:$4 sm:$0xff]   ;;  %v7641_v30 = vld [vmem:[%s10416_s5 + $0x1c8] ss:$16 sps:$4 sm:$0xff]  }
 0x31f   :  { %v3582_v57 = vpop.f32.mrf.mxu1  ;;  %v3623_v58 = vpop.f32.mrf.mxu0  ;;  %v7652_v55 = vld [vmem:[%s10416_s5 + $0x32c] ss:$16 sps:$4 sm:$0xff]   ;;  %v7647_v29 = vld [vmem:[%s10416_s5 + $0x1a8] ss:$16 sps:$4 sm:$0xff]  }
 0x320   :  { %v3583_v59 = vadd.f32 %v3582_v57, %v3213_v47  ;;  %v3624_v60 = vadd.f32 %v3623_v58, %v3221_v54  ;;  %v9642_v61 = vmax.f32 %v3581_v53, 0.0  ;;  %v9644_v42 = vmax.f32 %v3622_v56, 0.0  ;;  %v7644_v47 = vld [vmem:[%s10416_s5 + $0x348] ss:$16 sps:$4 sm:$0xff]   ;;  %v7649_v54 = vld [vmem:[%s10416_s5 + $0x1ac] ss:$16 sps:$4 sm:$0xff]  }
 0x321   :  { %v3584_v62 = vpop.f32.mrf.mxu1  ;;  %v3625_v63 = vpop.f32.mrf.mxu0  ;;  %v7650_v53 = vld [vmem:[%s10416_s5 + $0x328] ss:$16 sps:$4 sm:$0xff]   ;;  %v7655_v56 = vld [vmem:[%s10416_s5 + $0x18c] ss:$16 sps:$4 sm:$0xff]  }
 0x322   :  { %v9646_v0 = vmax.f32 %v3583_v59, 0.0  ;;  %v9648_v1 = vmax.f32 %v3624_v60, 0.0  ;;  %v9666_v9 = vpack.c.bf16 %v9642_v61, %v9642_v61  ;;  %v9670_v11 = vpack.c.bf16 %v9644_v42, %v9644_v42  ;;  %v7658_v57 = vld [vmem:[%s10416_s5 + $0x30c] ss:$16 sps:$4 sm:$0xff]   ;;  %v7653_v58 = vld [vmem:[%s10416_s5 + $0x188] ss:$16 sps:$4 sm:$0xff]  }
 0x323   :  { %v3585_v32 = vpop.f32.mrf.mxu1  ;;  %v3626_v49 = vpop.f32.mrf.mxu0  ;;  %v7656_v59 = vld [vmem:[%s10416_s5 + $0x308] ss:$16 sps:$4 sm:$0xff]   ;;  %v7661_v60 = vld [vmem:[%s10416_s5 + $0x16c] ss:$16 sps:$4 sm:$0xff]   ;;  %v7664_v62 = vld [vmem:[%s10418_s7 + $0xe4] ss:$16 sps:$4 sm:$0xff]  }
 0x324   :  { %v9652_v4 = vpack.c.bf16 %v9646_v0, %v9646_v0  ;;  %v9656_v5 = vpack.c.bf16 %v9648_v1, %v9648_v1  ;;  %v7659_v63 = vld [vmem:[%s10416_s5 + $0x168] ss:$16 sps:$4 sm:$0xff]   ;;  %v7662_v32 = vld [vmem:[%s10418_s7 + $0xe0] ss:$16 sps:$4 sm:$0xff]   ;;  %v7667_v49 = vld [vmem:[%s10416_s5 + $0x14c] ss:$16 sps:$4 sm:$0xff]  }
 0x326   :  { %4365 = vmatprep.mubr.bf16.mxu1 %v9652_v4  ;;  %6593 = vmatprep.mubr.msk.bf16.mxu0 %vm2599_vm0, %v9656_v5 }
 0x327   :  { %4366 = vmatmul.mubr.bf16.vlgmr.msra.gmra.mxu1 %v9666_v9  ;;  %4407 = vmatmul.mubr.bf16.vlgmr.msra.gmra.mxu0 %v9670_v11 }
 0x328   :  { %4416 = vmatpush1.bf16.msra.mxu0 %v7587_v7  ;;  %4457 = vmatpush1.bf16.msra.mxu1 %v7590_v8  ;;  %v7670_v7 = vld [vmem:[%s10418_s7 + $0xc4] ss:$16 sps:$4 sm:$0xff]   ;;  %v7665_v8 = vld [vmem:[%s10416_s5 + $0x148] ss:$16 sps:$4 sm:$0xff]  }
 0x329   :  { %4447 = vmatprep.mubr.bf16.mxu0 %v9652_v4  ;;  %6594 = vmatprep.mubr.msk.bf16.mxu1 %vm2599_vm0, %v9656_v5 }
 0x32a   :  { %4417 = vmatprep.subr.bf16.mxu0 %v7595_v12  ;;  %4458 = vmatprep.subr.bf16.mxu1 %v7598_v13  ;;  %v7668_v12 = vld [vmem:[%s10418_s7 + $0xc0] ss:$16 sps:$4 sm:$0xff]   ;;  %v7673_v13 = vld [vmem:[%s10416_s5 + $0x12c] ss:$16 sps:$4 sm:$0xff]  }
 0x32c   :  { %4418 = vmatpush1.bf16.msra.mxu0 %v7593_v14  ;;  %4459 = vmatpush1.bf16.msra.mxu1 %v7596_v35  ;;  %v7676_v14 = vld [vmem:[%s10418_s7 + $0xa4] ss:$16 sps:$4 sm:$0xff]   ;;  %v7671_v35 = vld [vmem:[%s10416_s5 + $0x128] ss:$16 sps:$4 sm:$0xff]  }
 0x32d   :  { %4419 = vmatprep.subr.bf16.mxu0 %v7601_v15  ;;  %4460 = vmatprep.subr.bf16.mxu1 %v7604_v16  ;;  %v7674_v15 = vld [vmem:[%s10418_s7 + $0xa0] ss:$16 sps:$4 sm:$0xff]   ;;  %v7679_v16 = vld [vmem:[%s10416_s5 + $0x10c] ss:$16 sps:$4 sm:$0xff]  }
 0x330   :  { %4420 = vmatpush1.bf16.msra.mxu0 %v7599_v17  ;;  %4461 = vmatpush1.bf16.msra.mxu1 %v7602_v18  ;;  %v7682_v17 = vld [vmem:[%s10418_s7 + $0x84] ss:$16 sps:$4 sm:$0xff]   ;;  %v7677_v18 = vld [vmem:[%s10416_s5 + $0x108] ss:$16 sps:$4 sm:$0xff]   ;;  %s6011_s5 = sshll.u32 %s7919_s27, 4  ;;  %s6012_s5 = int_to_ptr.vmem [resolvable:$true] %s6011_s5 }
 0x331   :  { %4421 = vmatprep.subr.bf16.mxu0 %v7607_v19  ;;  %4462 = vmatprep.subr.bf16.mxu1 %v7610_v20  ;;  %v7680_v19 = vld [vmem:[%s10418_s7 + $0x80] ss:$16 sps:$4 sm:$0xff]   ;;  %v7685_v20 = vld [vmem:[%s10418_s7 + $0x64] ss:$16 sps:$4 sm:$0xff]   ;;  %s7895_s28 = scalar_lea.vmem %s6012_s5, 32  ;;  %p7900_p1 = scmp.lt.s32.totalorder %s6012_s5, %s6012_s5 }
 0x332   :  { %p7896_p0 = scmp.ne.s32.totalorder %s6012_s5, %s7895_s28  ;;  %p7901_p2 = scmp.lt.s32.totalorder %s7895_s28, %s7895_s28 }
 0x334   :  { %4422 = vmatpush1.bf16.msra.mxu0 %v7605_v21  ;;  %4463 = vmatpush1.bf16.msra.mxu1 %v7608_v22  ;;  %v7688_v21 = vld [vmem:[%s10418_s7 + $0x2e4] ss:$16 sps:$4 sm:$0xff]   ;;  %v7683_v22 = vld [vmem:[%s10418_s7 + $0x60] ss:$16 sps:$4 sm:$0xff]   ;;  %p7902_p3 = por %p7901_p2, %p7900_p1 }
 0x335   :  { %4423 = vmatprep.subr.bf16.mxu0 %v7613_v23  ;;  %4464 = vmatprep.subr.bf16.mxu1 %v7616_v24  ;;  %v7686_v23 = vld [vmem:[%s10418_s7 + $0x2e0] ss:$16 sps:$4 sm:$0xff]   ;;  %v7691_v24 = vld [vmem:[%s10418_s7 + $0x44] ss:$16 sps:$4 sm:$0xff]  }
 0x336   :  { %p7903_p4 = pnand %p7902_p3, %p7896_p0 }
 0x338   :  { %4424 = vmatpush1.bf16.msra.mxu0 %v7611_v25  ;;  %4465 = vmatpush1.bf16.msra.mxu1 %v7614_v26  ;;  %v7694_v25 = vld [vmem:[%s10418_s7 + $0x2c4] ss:$16 sps:$4 sm:$0xff]   ;;  %v7689_v26 = vld [vmem:[%s10418_s7 + $0x40] ss:$16 sps:$4 sm:$0xff]  }
 0x339   :  { %4425 = vmatprep.subr.bf16.mxu0 %v7619_v27  ;;  %4466 = vmatprep.subr.bf16.mxu1 %v7622_v28  ;;  %v7692_v27 = vld [vmem:[%s10418_s7 + $0x2c0] ss:$16 sps:$4 sm:$0xff]   ;;  %v7697_v28 = vld [vmem:[%s10418_s7 + $0x24] ss:$16 sps:$4 sm:$0xff]  }
 0x33c   :  { %4426 = vmatpush1.bf16.msra.mxu0 %v7617_v31  ;;  %4467 = vmatpush1.bf16.msra.mxu1 %v7620_v33  ;;  %v7700_v31 = vld [vmem:[%s10418_s7 + $0x2a4] ss:$16 sps:$4 sm:$0xff]   ;;  %v7695_v33 = vld [vmem:[%s10418_s7 + $0x20] ss:$16 sps:$4 sm:$0xff]  }
 0x33d   :  { %4427 = vmatprep.subr.bf16.mxu0 %v7625_v34  ;;  %4468 = vmatprep.subr.bf16.mxu1 %v7628_v3  ;;  %v7698_v34 = vld [vmem:[%s10418_s7 + $0x2a0] ss:$16 sps:$4 sm:$0xff]   ;;  %v7703_v3 = vld [vmem:[%s10418_s7 + $0x4] ss:$16 sps:$4 sm:$0xff]  }
 0x340   :  { %4428 = vmatpush1.bf16.msra.mxu0 %v7623_v36  ;;  %4469 = vmatpush1.bf16.msra.mxu1 %v7626_v37  ;;  %v7706_v36 = vld [vmem:[%s10418_s7 + $0x284] ss:$16 sps:$4 sm:$0xff]   ;;  %v7701_v37 = vld [vmem:[%s10418_s7] ss:$16 sps:$4 sm:$0xff]  }
 0x341   :  { %4429 = vmatprep.subr.bf16.mxu0 %v7631_v10  ;;  %4470 = vmatprep.subr.bf16.mxu1 %v7634_v2  ;;  %v7704_v10 = vld [vmem:[%s10418_s7 + $0x280] ss:$16 sps:$4 sm:$0xff]   ;;  %v7709_v2 = vld [vmem:[%s10418_s7 + $0x1e4] ss:$16 sps:$4 sm:$0xff]  }
 0x344   :  { %4430 = vmatpush1.bf16.msra.mxu0 %v7629_v38  ;;  %4471 = vmatpush1.bf16.msra.mxu1 %v7632_v39  ;;  %v7712_v38 = vld [vmem:[%s10418_s7 + $0x264] ss:$16 sps:$4 sm:$0xff]   ;;  %v7707_v39 = vld [vmem:[%s10418_s7 + $0x1e0] ss:$16 sps:$4 sm:$0xff]  }
 0x345   :  { %4431 = vmatprep.subr.bf16.mxu0 %v7637_v40  ;;  %4480 = vmatprep.subr.bf16.mxu1 %v7640_v41  ;;  %v7710_v40 = vld [vmem:[%s10418_s7 + $0x260] ss:$16 sps:$4 sm:$0xff]   ;;  %v7715_v41 = vld [vmem:[%s10418_s7 + $0x1c4] ss:$16 sps:$4 sm:$0xff]  }
 0x348   :  { %4432 = vmatpush2.bf16.msra.mxu0 %v7635_v44  ;;  %4481 = vmatpush2.bf16.msra.mxu1 %v7638_v46  ;;  %v7718_v44 = vld [vmem:[%s10418_s7 + $0x244] ss:$16 sps:$4 sm:$0xff]   ;;  %v7713_v46 = vld [vmem:[%s10418_s7 + $0x1c0] ss:$16 sps:$4 sm:$0xff]  }
 0x349   :  { %4433 = vmatprep.subr.bf16.mxu0 %v7643_v50  ;;  %4482 = vmatprep.subr.bf16.mxu1 %v7646_v52  ;;  %v7716_v50 = vld [vmem:[%s10418_s7 + $0x240] ss:$16 sps:$4 sm:$0xff]   ;;  %v7721_v52 = vld [vmem:[%s10418_s7 + $0x1a4] ss:$16 sps:$4 sm:$0xff]  }
 0x34c   :  { %4434 = vmatpush2.bf16.msra.mxu0 %v7641_v30  ;;  %4483 = vmatpush2.bf16.msra.mxu1 %v7644_v47  ;;  %v7724_v30 = vld [vmem:[%s10418_s7 + $0x224] ss:$16 sps:$4 sm:$0xff]   ;;  %v7719_v47 = vld [vmem:[%s10418_s7 + $0x1a0] ss:$16 sps:$4 sm:$0xff]  }
 0x34d   :  { %4435 = vmatprep.subr.bf16.mxu0 %v7649_v54  ;;  %4484 = vmatprep.subr.bf16.mxu1 %v7652_v55  ;;  %v7722_v54 = vld [vmem:[%s10418_s7 + $0x220] ss:$16 sps:$4 sm:$0xff]   ;;  %v7727_v55 = vld [vmem:[%s10418_s7 + $0x184] ss:$16 sps:$4 sm:$0xff]  }
 0x350   :  { %4436 = vmatpush2.bf16.msra.mxu0 %v7647_v29  ;;  %4485 = vmatpush2.bf16.msra.mxu1 %v7650_v53  ;;  %v7730_v29 = vld [vmem:[%s10418_s7 + $0x204] ss:$16 sps:$4 sm:$0xff]   ;;  %v7725_v53 = vld [vmem:[%s10418_s7 + $0x180] ss:$16 sps:$4 sm:$0xff]  }
 0x351   :  { %4437 = vmatprep.subr.bf16.mxu0 %v7655_v56  ;;  %4486 = vmatprep.subr.bf16.mxu1 %v7658_v57  ;;  %v7728_v56 = vld [vmem:[%s10418_s7 + $0x200] ss:$16 sps:$4 sm:$0xff]   ;;  %v7733_v57 = vld [vmem:[%s10418_s7 + $0x164] ss:$16 sps:$4 sm:$0xff]  }
 0x354   :  { %4438 = vmatpush2.bf16.msra.mxu0 %v7653_v58  ;;  %4487 = vmatpush2.bf16.msra.mxu1 %v7656_v59  ;;  %v7736_v58 = vld [vmem:[%s10418_s7 + $0x364] ss:$16 sps:$4 sm:$0xff]   ;;  %v7731_v59 = vld [vmem:[%s10418_s7 + $0x160] ss:$16 sps:$4 sm:$0xff]  }
 0x355   :  { %4439 = vmatprep.subr.bf16.mxu0 %v7661_v60  ;;  %5199 = vmatprep.subr.bf16.mxu1 %v7664_v62  ;;  %v7734_v60 = vld [vmem:[%s10418_s7 + $0x360] ss:$16 sps:$4 sm:$0xff]   ;;  %v7739_v62 = vld [vmem:[%s10418_s7 + $0x144] ss:$16 sps:$4 sm:$0xff]  }
 0x357   :  { %4489 = vmatmul.mubr.bf16.vlgmr.msra.gmra.mxu1 %v9670_v11 }
 0x358   :  { %4440 = vmatpush2.bf16.msra.mxu0 %v7659_v63  ;;  %5200 = vmatpush1.bf16.msra.mxu1 %v7662_v32  ;;  %v7742_v63 = vld [vmem:[%s10418_s7 + $0x344] ss:$16 sps:$4 sm:$0xff]   ;;  %v7737_v32 = vld [vmem:[%s10418_s7 + $0x140] ss:$16 sps:$4 sm:$0xff]  }
 0x359   :  { %5231 = vmatprep.mubr.bf16.mxu1 %v9652_v4  ;;  %4441 = vmatprep.subr.bf16.mxu0 %v7667_v49  ;;  %v7740_v49 = vld [vmem:[%s10418_s7 + $0x340] ss:$16 sps:$4 sm:$0xff]  }
 0x35a   :  { %5201 = vmatprep.subr.bf16.mxu1 %v7670_v7  ;;  %v7745_v7 = vld [vmem:[%s10418_s7 + $0x124] ss:$16 sps:$4 sm:$0xff]  }
 0x35c   :  { %4442 = vmatpush2.bf16.msra.mxu0 %v7665_v8  ;;  %5202 = vmatpush1.bf16.msra.mxu1 %v7668_v12  ;;  %v7748_v8 = vld [vmem:[%s10418_s7 + $0x324] ss:$16 sps:$4 sm:$0xff]   ;;  %v7743_v12 = vld [vmem:[%s10418_s7 + $0x120] ss:$16 sps:$4 sm:$0xff]  }
 0x35d   :  { %4443 = vmatprep.subr.bf16.mxu0 %v7673_v13  ;;  %5203 = vmatprep.subr.bf16.mxu1 %v7676_v14  ;;  %v7746_v13 = vld [vmem:[%s10418_s7 + $0x320] ss:$16 sps:$4 sm:$0xff]   ;;  %v7751_v14 = vld [vmem:[%s10418_s7 + $0x104] ss:$16 sps:$4 sm:$0xff]  }
 0x360   :  { %4444 = vmatpush2.bf16.msra.mxu0 %v7671_v35  ;;  %5204 = vmatpush1.bf16.msra.mxu1 %v7674_v15  ;;  %v7754_v35 = vld [vmem:[%s10418_s7 + $0x304] ss:$16 sps:$4 sm:$0xff]   ;;  %v7749_v15 = vld [vmem:[%s10418_s7 + $0x100] ss:$16 sps:$4 sm:$0xff]  }
 0x361   :  { %4445 = vmatprep.subr.bf16.mxu0 %v7679_v16  ;;  %5205 = vmatprep.subr.bf16.mxu1 %v7682_v17  ;;  %v7752_v16 = vld [vmem:[%s10418_s7 + $0x300] ss:$16 sps:$4 sm:$0xff]   ;;  %v7757_v17 = vld [vmem:[%s10418_s7 + $0xec] ss:$16 sps:$4 sm:$0xff]  }
 0x364   :  { %4446 = vmatpush2.bf16.msra.mxu0 %v7677_v18  ;;  %5206 = vmatpush1.bf16.msra.mxu1 %v7680_v19  ;;  %v7760_v18 = vld [vmem:[%s10418_s7 + $0x2ec] ss:$16 sps:$4 sm:$0xff]   ;;  %v7755_v19 = vld [vmem:[%s10418_s7 + $0xe8] ss:$16 sps:$4 sm:$0xff]  }
 0x365   :  { %5207 = vmatprep.subr.bf16.mxu1 %v7685_v20  ;;  %5240 = vmatprep.subr.bf16.mxu0 %v7688_v21  ;;  %v7758_v20 = vld [vmem:[%s10418_s7 + $0x2e8] ss:$16 sps:$4 sm:$0xff]   ;;  %v7763_v21 = vld [vmem:[%s10418_s7 + $0xcc] ss:$16 sps:$4 sm:$0xff]  }
 0x367   :  { %4448 = vmatmul.mubr.bf16.vlgmr.msra.gmra.mxu0 %v9666_v9 }
 0x368   :  { %5208 = vmatpush1.bf16.msra.mxu1 %v7683_v22  ;;  %5241 = vmatpush1.bf16.msra.mxu0 %v7686_v23  ;;  %v7766_v22 = vld [vmem:[%s10418_s7 + $0x2cc] ss:$16 sps:$4 sm:$0xff]   ;;  %v7761_v23 = vld [vmem:[%s10418_s7 + $0xc8] ss:$16 sps:$4 sm:$0xff]  }
 0x369   :  { %6707 = vmatprep.mubr.msk.bf16.mxu0 %vm2599_vm0, %v9656_v5  ;;  %5209 = vmatprep.subr.bf16.mxu1 %v7691_v24  ;;  %v7764_v24 = vld [vmem:[%s10418_s7 + $0x2c8] ss:$16 sps:$4 sm:$0xff]  }
 0x36a   :  { %5242 = vmatprep.subr.bf16.mxu0 %v7694_v25  ;;  %v7769_v25 = vld [vmem:[%s10418_s7 + $0xac] ss:$16 sps:$4 sm:$0xff]  }
 0x36c   :  { %5210 = vmatpush1.bf16.msra.mxu1 %v7689_v26  ;;  %5243 = vmatpush1.bf16.msra.mxu0 %v7692_v27  ;;  %v7767_v26 = vld [vmem:[%s10418_s7 + $0xa8] ss:$16 sps:$4 sm:$0xff]   ;;  %v7775_v27 = vld [vmem:[%s10418_s7 + $0x8c] ss:$16 sps:$4 sm:$0xff]  }
 0x36d   :  { %5211 = vmatprep.subr.bf16.mxu1 %v7697_v28  ;;  %5244 = vmatprep.subr.bf16.mxu0 %v7700_v31  ;;  %v7778_v28 = vld [vmem:[%s10418_s7 + $0x28c] ss:$16 sps:$4 sm:$0xff]   ;;  %v7773_v31 = vld [vmem:[%s10418_s7 + $0x88] ss:$16 sps:$4 sm:$0xff]  }
 0x370   :  { %5212 = vmatpush1.bf16.msra.mxu1 %v7695_v33  ;;  %5245 = vmatpush1.bf16.msra.mxu0 %v7698_v34  ;;  %v7776_v33 = vld [vmem:[%s10418_s7 + $0x288] ss:$16 sps:$4 sm:$0xff]   ;;  %v7781_v34 = vld [vmem:[%s10418_s7 + $0x6c] ss:$16 sps:$4 sm:$0xff]  }
 0x371   :  { %5213 = vmatprep.subr.bf16.mxu1 %v7703_v3  ;;  %5246 = vmatprep.subr.bf16.mxu0 %v7706_v36  ;;  %v7784_v3 = vld [vmem:[%s10418_s7 + $0x26c] ss:$16 sps:$4 sm:$0xff]   ;;  %v7779_v36 = vld [vmem:[%s10418_s7 + $0x68] ss:$16 sps:$4 sm:$0xff]  }
 0x374   :  { %5214 = vmatpush1.bf16.msra.mxu1 %v7701_v37  ;;  %5247 = vmatpush1.bf16.msra.mxu0 %v7704_v10  ;;  %v7782_v37 = vld [vmem:[%s10418_s7 + $0x268] ss:$16 sps:$4 sm:$0xff]   ;;  %v7787_v10 = vld [vmem:[%s10418_s7 + $0x4c] ss:$16 sps:$4 sm:$0xff]  }
 0x375   :  { %5215 = vmatprep.subr.bf16.mxu1 %v7709_v2  ;;  %5248 = vmatprep.subr.bf16.mxu0 %v7712_v38  ;;  %v7790_v2 = vld [vmem:[%s10418_s7 + $0x24c] ss:$16 sps:$4 sm:$0xff]   ;;  %v7785_v38 = vld [vmem:[%s10418_s7 + $0x48] ss:$16 sps:$4 sm:$0xff]  }
 0x378   :  { %5216 = vmatpush2.bf16.msra.mxu1 %v7707_v39  ;;  %5249 = vmatpush1.bf16.msra.mxu0 %v7710_v40  ;;  %v7788_v39 = vld [vmem:[%s10418_s7 + $0x248] ss:$16 sps:$4 sm:$0xff]   ;;  %v7793_v40 = vld [vmem:[%s10418_s7 + $0x2c] ss:$16 sps:$4 sm:$0xff]  }
 0x379   :  { %5217 = vmatprep.subr.bf16.mxu1 %v7715_v41  ;;  %5250 = vmatprep.subr.bf16.mxu0 %v7718_v44  ;;  %v7796_v41 = vld [vmem:[%s10418_s7 + $0x22c] ss:$16 sps:$4 sm:$0xff]   ;;  %v7791_v44 = vld [vmem:[%s10418_s7 + $0x28] ss:$16 sps:$4 sm:$0xff]  }
 0x37c   :  { %5218 = vmatpush2.bf16.msra.mxu1 %v7713_v46  ;;  %5251 = vmatpush1.bf16.msra.mxu0 %v7716_v50  ;;  %v7794_v46 = vld [vmem:[%s10418_s7 + $0x228] ss:$16 sps:$4 sm:$0xff]   ;;  %v7799_v50 = vld [vmem:[%s10418_s7 + $0xc] ss:$16 sps:$4 sm:$0xff]  }
 0x37d   :  { %5219 = vmatprep.subr.bf16.mxu1 %v7721_v52  ;;  %5252 = vmatprep.subr.bf16.mxu0 %v7724_v30  ;;  %v7802_v52 = vld [vmem:[%s10418_s7 + $0x20c] ss:$16 sps:$4 sm:$0xff]   ;;  %v7797_v30 = vld [vmem:[%s10418_s7 + $0x8] ss:$16 sps:$4 sm:$0xff]  }
 0x380   :  { %5220 = vmatpush2.bf16.msra.mxu1 %v7719_v47  ;;  %5253 = vmatpush1.bf16.msra.mxu0 %v7722_v54  ;;  %v7800_v47 = vld [vmem:[%s10418_s7 + $0x208] ss:$16 sps:$4 sm:$0xff]   ;;  %v7805_v54 = vld [vmem:[%s10418_s7 + $0x1ec] ss:$16 sps:$4 sm:$0xff]  }
 0x381   :  { %5221 = vmatprep.subr.bf16.mxu1 %v7727_v55  ;;  %5254 = vmatprep.subr.bf16.mxu0 %v7730_v29  ;;  %v7808_v55 = vld [vmem:[%s10418_s7 + $0x36c] ss:$16 sps:$4 sm:$0xff]   ;;  %v7803_v29 = vld [vmem:[%s10418_s7 + $0x1e8] ss:$16 sps:$4 sm:$0xff]  }
 0x384   :  { %5222 = vmatpush2.bf16.msra.mxu1 %v7725_v53  ;;  %5255 = vmatpush1.bf16.msra.mxu0 %v7728_v56  ;;  %v7806_v53 = vld [vmem:[%s10418_s7 + $0x368] ss:$16 sps:$4 sm:$0xff]   ;;  %v7811_v56 = vld [vmem:[%s10418_s7 + $0x1cc] ss:$16 sps:$4 sm:$0xff]  }
 0x385   :  { %5223 = vmatprep.subr.bf16.mxu1 %v7733_v57  ;;  %5264 = vmatprep.subr.bf16.mxu0 %v7736_v58  ;;  %v7814_v57 = vld [vmem:[%s10418_s7 + $0x34c] ss:$16 sps:$4 sm:$0xff]   ;;  %v7809_v58 = vld [vmem:[%s10418_s7 + $0x1c8] ss:$16 sps:$4 sm:$0xff]  }
 0x388   :  { %5224 = vmatpush2.bf16.msra.mxu1 %v7731_v59  ;;  %5265 = vmatpush2.bf16.msra.mxu0 %v7734_v60  ;;  %v7812_v59 = vld [vmem:[%s10418_s7 + $0x348] ss:$16 sps:$4 sm:$0xff]   ;;  %v7817_v60 = vld [vmem:[%s10418_s7 + $0x1ac] ss:$16 sps:$4 sm:$0xff]  }
 0x389   :  { %5225 = vmatprep.subr.bf16.mxu1 %v7739_v62  ;;  %5266 = vmatprep.subr.bf16.mxu0 %v7742_v63  ;;  %v7820_v62 = vld [vmem:[%s10418_s7 + $0x32c] ss:$16 sps:$4 sm:$0xff]   ;;  %v7815_v63 = vld [vmem:[%s10418_s7 + $0x1a8] ss:$16 sps:$4 sm:$0xff]  }
 0x38c   :  { %5226 = vmatpush2.bf16.msra.mxu1 %v7737_v32  ;;  %5267 = vmatpush2.bf16.msra.mxu0 %v7740_v49  ;;  %v7818_v32 = vld [vmem:[%s10418_s7 + $0x328] ss:$16 sps:$4 sm:$0xff]   ;;  %v7823_v49 = vld [vmem:[%s10418_s7 + $0x18c] ss:$16 sps:$4 sm:$0xff]  }
 0x38d   :  { %5227 = vmatprep.subr.bf16.mxu1 %v7745_v7  ;;  %5268 = vmatprep.subr.bf16.mxu0 %v7748_v8  ;;  %v7826_v7 = vld [vmem:[%s10418_s7 + $0x30c] ss:$16 sps:$4 sm:$0xff]   ;;  %v7821_v8 = vld [vmem:[%s10418_s7 + $0x188] ss:$16 sps:$4 sm:$0xff]  }
 0x390   :  { %5228 = vmatpush2.bf16.msra.mxu1 %v7743_v12  ;;  %5269 = vmatpush2.bf16.msra.mxu0 %v7746_v13  ;;  %v7824_v12 = vld [vmem:[%s10418_s7 + $0x308] ss:$16 sps:$4 sm:$0xff]   ;;  %v7829_v13 = vld [vmem:[%s10418_s7 + $0x16c] ss:$16 sps:$4 sm:$0xff]  }
 0x391   :  { %5229 = vmatprep.subr.bf16.mxu1 %v7751_v14  ;;  %5270 = vmatprep.subr.bf16.mxu0 %v7754_v35  ;;  %v7839_v14 = vld [vmem:[%s10420_s9 + $0x78] sm:$0xff]  }
 0x392   :  { %v7827_v35 = vld [vmem:[%s10418_s7 + $0x168] ss:$16 sps:$4 sm:$0xff]  }
 0x394   :  { %5230 = vmatpush2.bf16.msra.mxu1 %v7749_v15  ;;  %5271 = vmatpush2.bf16.msra.mxu0 %v7752_v16  ;;  %v7832_v15 = vld [vmem:[%s10418_s7 + $0x14c] ss:$16 sps:$4 sm:$0xff]  }
 0x395   :  { %5281 = vmatprep.subr.bf16.mxu0 %v7757_v17  ;;  %5322 = vmatprep.subr.bf16.mxu1 %v7760_v18  ;;  %v7840_v16 = vld [vmem:[%s10420_s9 + $0x38] sm:$0xff]   ;;  %v7841_v17 = vld [vmem:[%s10420_s9 + $0x70] sm:$0xff]  }
 0x396   :  { %v7830_v18 = vld [vmem:[%s10418_s7 + $0x148] ss:$16 sps:$4 sm:$0xff]  }
 0x397   :  { %5232 = vmatmul.mubr.bf16.vlgmr.msra.gmra.mxu1 %v9666_v9  ;;  %5273 = vmatmul.mubr.bf16.vlgmr.msra.gmra.mxu0 %v9670_v11 }
 0x398   :  { %5282 = vmatpush1.bf16.msra.mxu0 %v7755_v19  ;;  %5313 = vmatprep.mubr.bf16.mxu0 %v9652_v4  ;;  %v7772_v4 = vld [vmem:[%s10418_s7 + $0x2ac] ss:$16 sps:$4 sm:$0xff]  }
 0x399   :  { %5323 = vmatpush1.bf16.msra.mxu1 %v7758_v20  ;;  %6708 = vmatprep.mubr.msk.bf16.mxu1 %vm2599_vm0, %v9656_v5  ;;  %v7770_v5 = vld [vmem:[%s10418_s7 + $0x2a8] ss:$16 sps:$4 sm:$0xff]   ;;  %v7835_v19 = vld [vmem:[%s10418_s7 + $0x12c] ss:$16 sps:$4 sm:$0xff]   ;;  %v7842_v20 = vld [vmem:[%s10420_s9 + $0x30] sm:$0xff]  }
 0x39a   :  { %5283 = vmatprep.subr.bf16.mxu0 %v7763_v21  ;;  %5324 = vmatprep.subr.bf16.mxu1 %v7766_v22  ;;  %v7833_v21 = vld [vmem:[%s10418_s7 + $0x128] ss:$16 sps:$4 sm:$0xff]   ;;  %v7838_v22 = vld [vmem:[%s10418_s7 + $0x10c] ss:$16 sps:$4 sm:$0xff]  }
 0x39c   :  { %5284 = vmatpush1.bf16.msra.mxu0 %v7761_v23  ;;  %v7844_v23 = vld [vmem:[%s10420_s9 + $0x28] sm:$0xff]  }
 0x39d   :  { %5325 = vmatpush1.bf16.msra.mxu1 %v7764_v24  ;;  %5285 = vmatprep.subr.bf16.mxu0 %v7769_v25  ;;  %v7845_v24 = vld [vmem:[%s10420_s9 + $0x60] sm:$0xff]   ;;  %v7836_v25 = vld [vmem:[%s10418_s7 + $0x108] ss:$16 sps:$4 sm:$0xff]  }
 0x39e   :  { %5326 = vmatprep.subr.bf16.mxu1 %v7772_v4  ;;  %v7846_v4 = vld [vmem:[%s10420_s9 + $0x20] sm:$0xff]  }
 0x3a0   :  { %5286 = vmatpush1.bf16.msra.mxu0 %v7767_v26  ;;  %v7847_v26 = vld [vmem:[%s10420_s9 + $0x58] sm:$0xff]  }
 0x3a1   :  { %5327 = vmatpush1.bf16.msra.mxu1 %v7770_v5  ;;  %5287 = vmatprep.subr.bf16.mxu0 %v7775_v27  ;;  %v7855_v5 = vld [vmem:[%s10420_s9 + $0xb8] sm:$0xff]  }
 0x3a2   :  { %5328 = vmatprep.subr.bf16.mxu1 %v7778_v28  ;;  %v7848_v27 = vld [vmem:[%s10420_s9 + $0x18] sm:$0xff]   ;;  %v7849_v28 = vld [vmem:[%s10420_s9 + $0x50] sm:$0xff]  }
 0x3a4   :  { %5288 = vmatpush1.bf16.msra.mxu0 %v7773_v31  ;;  %v7856_v31 = vld [vmem:[%s10420_s9 + $0xb0] sm:$0xff]  }
 0x3a5   :  { %5329 = vmatpush1.bf16.msra.mxu1 %v7776_v33  ;;  %5289 = vmatprep.subr.bf16.mxu0 %v7781_v34  ;;  %v7850_v33 = vld [vmem:[%s10420_s9 + $0x10] sm:$0xff]   ;;  %v7851_v34 = vld [vmem:[%s10420_s9 + $0x48] sm:$0xff]  }
 0x3a6   :  { %5330 = vmatprep.subr.bf16.mxu1 %v7784_v3  ;;  %v7852_v3 = vld [vmem:[%s10420_s9 + $0x8] sm:$0xff]  }
 0x3a8   :  { %5290 = vmatpush1.bf16.msra.mxu0 %v7779_v36  ;;  %v7853_v36 = vld [vmem:[%s10420_s9 + $0x40] sm:$0xff]  }
 0x3a9   :  { %5331 = vmatpush1.bf16.msra.mxu1 %v7782_v37  ;;  %5291 = vmatprep.subr.bf16.mxu0 %v7787_v10  ;;  %v7858_v37 = vld [vmem:[%s10420_s9 + $0xa0] sm:$0xff]  }
 0x3aa   :  { %5332 = vmatprep.subr.bf16.mxu1 %v7790_v2  ;;  %v10247_v10 = vld [vmem:[%s10417_s6] sm:$0xf] }
 0x3ab   :  { %v7854_v2 = vld [vmem:[%s10420_s9] sm:$0xff]  }
 0x3ac   :  { %5292 = vmatpush1.bf16.msra.mxu0 %v7785_v38  ;;  %v7867_v38 = vld [vmem:[%s10420_s9 + $0x78] sm:$0xff]  }
 0x3ad   :  { %5333 = vmatpush1.bf16.msra.mxu1 %v7788_v39  ;;  %5293 = vmatprep.subr.bf16.mxu0 %v7793_v40  ;;  %v3753_v39 = vrot.slane %v10247_v10, %v8811_v45  ;;  %v7859_v40 = vld [vmem:[%s10420_s9 + $0x98] sm:$0xff]  }
 0x3ae   :  { %5334 = vmatprep.subr.bf16.mxu1 %v7796_v41  ;;  %v3757_v41 = vrot.slane %v10247_v10, %v8820_v48 }
 0x3b0   :  { %5294 = vmatpush1.bf16.msra.mxu0 %v7791_v44 }
 0x3b1   :  { %5335 = vmatpush1.bf16.msra.mxu1 %v7794_v46  ;;  %5295 = vmatprep.subr.bf16.mxu0 %v7799_v50 }
 0x3b2   :  { %5336 = vmatprep.subr.bf16.mxu1 %v7802_v52  ;;  %v7860_v52 = vld [vmem:[%s10420_s9 + $0x90] sm:$0xff]  }
 0x3b4   :  { %5296 = vmatpush1.bf16.msra.mxu0 %v7797_v30 }
 0x3b5   :  { %5337 = vmatpush1.bf16.msra.mxu1 %v7800_v47  ;;  %5297 = vmatprep.subr.bf16.mxu0 %v7805_v54 }
 0x3b6   :  { %5346 = vmatprep.subr.bf16.mxu1 %v7808_v55 }
 0x3b8   :  { %5298 = vmatpush2.bf16.msra.mxu0 %v7803_v29 }
 0x3b9   :  { %5347 = vmatpush2.bf16.msra.mxu1 %v7806_v53  ;;  %5299 = vmatprep.subr.bf16.mxu0 %v7811_v56 }
 0x3ba   :  { %5348 = vmatprep.subr.bf16.mxu1 %v7814_v57  ;;  %v7861_v57 = vld [vmem:[%s10420_s9 + $0x88] sm:$0xff]  }
 0x3bc   :  { %5300 = vmatpush2.bf16.msra.mxu0 %v7809_v58 }
 0x3bd   :  { %5349 = vmatpush2.bf16.msra.mxu1 %v7812_v59  ;;  %5301 = vmatprep.subr.bf16.mxu0 %v7817_v60 }
 0x3be   :  { %5350 = vmatprep.subr.bf16.mxu1 %v7820_v62 }
 0x3c0   :  { %5302 = vmatpush2.bf16.msra.mxu0 %v7815_v63 }
 0x3c1   :  { %5351 = vmatpush2.bf16.msra.mxu1 %v7818_v32  ;;  %5303 = vmatprep.subr.bf16.mxu0 %v7823_v49  ;;  %v7862_v32 = vld [vmem:[%s10420_s9 + $0x80] sm:$0xff]   ;;  %v7868_v49 = vld [vmem:[%s10420_s9 + $0x38] sm:$0xff]  }
 0x3c2   :  { %5352 = vmatprep.subr.bf16.mxu1 %v7826_v7 }
 0x3c4   :  { %5304 = vmatpush2.bf16.msra.mxu0 %v7821_v8  ;;  %v7869_v8 = vld [vmem:[%s10420_s9 + $0x70] sm:$0xff]  }
 0x3c5   :  { %5353 = vmatpush2.bf16.msra.mxu1 %v7824_v12  ;;  %5305 = vmatprep.subr.bf16.mxu0 %v7829_v13  ;;  %v7863_v12 = vld [vmem:[%s10420_s9 + $0xd8] sm:$0xff]   ;;  %v7870_v13 = vld [vmem:[%s10420_s9 + $0x30] sm:$0xff]  }
 0x3c6   :  { %6769 = vmatprep.subr.bf16.mxu1 %v7839_v14  ;;  %v7871_v14 = vld [vmem:[%s10420_s9 + $0x68] sm:$0xff]  }
 0x3c8   :  { %5355 = vmatmul.mubr.bf16.vlgmr.msra.gmra.mxu1 %v9670_v11  ;;  %5306 = vmatpush2.bf16.msra.mxu0 %v7827_v35  ;;  %v7843_v11 = vld [vmem:[%s10420_s9 + $0x68] sm:$0xff]   ;;  %v7864_v35 = vld [vmem:[%s10420_s9 + $0xd0] sm:$0xff]  }
 0x3c9   :  { %5307 = vmatprep.subr.bf16.mxu0 %v7832_v15  ;;  %6770 = vmatpush3.bf16.msra.mxu1 %v7840_v16  ;;  %v7872_v15 = vld [vmem:[%s10420_s9 + $0x28] sm:$0xff]   ;;  %v7873_v16 = vld [vmem:[%s10420_s9 + $0x60] sm:$0xff]  }
 0x3ca   :  { %6771 = vmatprep.subr.bf16.mxu1 %v7841_v17  ;;  %v7865_v17 = vld [vmem:[%s10420_s9 + $0xc8] sm:$0xff]  }
 0x3cc   :  { %5308 = vmatpush2.bf16.msra.mxu0 %v7830_v18  ;;  %v7874_v18 = vld [vmem:[%s10420_s9 + $0x20] sm:$0xff]  }
 0x3cd   :  { %5309 = vmatprep.subr.bf16.mxu0 %v7835_v19  ;;  %6772 = vmatpush3.bf16.msra.mxu1 %v7842_v20  ;;  %v7875_v19 = vld [vmem:[%s10420_s9 + $0x58] sm:$0xff]   ;;  %v7866_v20 = vld [vmem:[%s10420_s9 + $0xc0] sm:$0xff]  }
 0x3ce   :  { %6773 = vmatprep.subr.bf16.mxu1 %v7843_v11  ;;  %v7876_v11 = vld [vmem:[%s10420_s9 + $0x18] sm:$0xff]  }
 0x3d0   :  { %5310 = vmatpush2.bf16.msra.mxu0 %v7833_v21  ;;  %v7877_v21 = vld [vmem:[%s10420_s9 + $0x50] sm:$0xff]  }
 0x3d1   :  { %5311 = vmatprep.subr.bf16.mxu0 %v7838_v22  ;;  %6774 = vmatpush3.bf16.msra.mxu1 %v7844_v23  ;;  %v7878_v22 = vld [vmem:[%s10420_s9 + $0x10] sm:$0xff]   ;;  %v7879_v23 = vld [vmem:[%s10420_s9 + $0x48] sm:$0xff]  }
 0x3d2   :  { %6775 = vmatprep.subr.bf16.mxu1 %v7845_v24  ;;  %v7880_v24 = vld [vmem:[%s10420_s9 + $0x8] sm:$0xff]  }
 0x3d4   :  { %5312 = vmatpush2.bf16.msra.mxu0 %v7836_v25  ;;  %v7881_v25 = vld [vmem:[%s10420_s9 + $0x40] sm:$0xff]  }
 0x3d5   :  { %6776 = vmatpush3.bf16.msra.mxu1 %v7846_v4  ;;  %5649 = vmatprep.subr.bf16.mxu0 %v7918_v43  ;;  %v7882_v4 = vld [vmem:[%s10420_s9] sm:$0xff]  }
 0x3d6   :  { %6777 = vmatprep.subr.bf16.mxu1 %v7847_v26 }
 0x3d7   :  { %5314 = vmatmul.mubr.bf16.vlgmr.msra.gmra.mxu0 %v9666_v9  ;;  %v7857_v9 = vld [vmem:[%s10420_s9 + $0xa8] sm:$0xff]  }
 0x3d8   :  { %5650 = vmatpush1.bf16.msra.mxu0 %v7855_v5 }
 0x3d9   :  { %6778 = vmatpush3.bf16.msra.mxu1 %v7848_v27  ;;  %5651 = vmatprep.subr.bf16.mxu0 %v7918_v43 }
 0x3da   :  { %6779 = vmatprep.subr.bf16.mxu1 %v7849_v28 }
 0x3dc   :  { %5652 = vmatpush1.bf16.msra.mxu0 %v7856_v31  ;;  %v3761_v31 = vrot.slane %v10247_v10, %v9630_v6 }
 0x3dd   :  { %6780 = vmatpush3.bf16.msra.mxu1 %v7850_v33  ;;  %5653 = vmatprep.subr.bf16.mxu0 %v7918_v43  ;;  %v3765_v33 = vrot.slane %v10247_v10, %v9636_v51  ;;  %v7884_v10 = vld [vmem:[%s10420_s9 + $0xb0] sm:$0xff]  }
 0x3de   :  { %6781 = vmatprep.subr.bf16.mxu1 %v7851_v34 }
 0x3e0   :  { %5654 = vmatpush1.bf16.msra.mxu0 %v7857_v9 }
 0x3e1   :  { %6782 = vmatpush3.bf16.msra.mxu1 %v7852_v3  ;;  %5655 = vmatprep.subr.bf16.mxu0 %v7918_v43 }
 0x3e2   :  { %6783 = vmatprep.subr.bf16.mxu1 %v7853_v36 }
 0x3e4   :  { %5656 = vmatpush1.bf16.msra.mxu0 %v7858_v37 }
 0x3e5   :  { %6784 = vmatpush3.bf16.msra.mxu1 %v7854_v2  ;;  %5657 = vmatprep.subr.bf16.mxu0 %v7918_v43 }
 0x3e6   :  { %6791 = vmatprep.subr.bf16.mxu1 %v7867_v38 }
 0x3e7   :  { %v4367_v44 = vpop.f32.mrf.mxu1  ;;  %v4408_v46 = vpop.f32.mrf.mxu0 }
 0x3e8   :  { %v4368_v50 = vadd.f32 %v4367_v44, %v3753_v39  ;;  %5658 = vmatpush1.bf16.msra.mxu0 %v7859_v40 }
 0x3e9   :  { %v4369_v30 = vpop.f32.mrf.mxu1  ;;  %v4410_v47 = vpop.f32.mrf.mxu0  ;;  %5659 = vmatprep.subr.bf16.mxu0 %v7918_v43 }
 0x3ea   :  { %v4409_v54 = vadd.f32 %v4408_v46, %v4368_v50  ;;  %v4370_v55 = vadd.f32 %v4369_v30, %v3757_v41  ;;  %v7883_v46 = vld [vmem:[%s10420_s9 + $0xb8] sm:$0xff]   ;;  %v7886_v30 = vld [vmem:[%s10420_s9 + $0xa0] sm:$0xff]  }
 0x3eb   :  { %v4371_v29 = vpop.f32.mrf.mxu1  ;;  %v4412_v53 = vpop.f32.mrf.mxu0 }
 0x3ec   :  { %v4411_v56 = vadd.f32 %v4410_v47, %v4370_v55  ;;  %5660 = vmatpush1.bf16.msra.mxu0 %v7860_v52  ;;  %v4497_v58 = vmax.f32 %v4409_v54, 0.0  ;;  %v7885_v52 = vld [vmem:[%s10420_s9 + $0xa8] sm:$0xff]   ;;  %v7887_v47 = vld [vmem:[%s10420_s9 + $0x98] sm:$0xff]   ;;  %v7888_v54 = vld [vmem:[%s10420_s9 + $0x90] sm:$0xff]  }
 0x3ed   :  { %v4372_v59 = vpop.f32.mrf.mxu1  ;;  %v4413_v60 = vpop.f32.mrf.mxu0  ;;  %5661 = vmatprep.subr.bf16.mxu0 %v7918_v43  ;;  %v7889_v55 = vld [vmem:[%s10420_s9 + $0x88] sm:$0xff]   ;;  %v7890_v29 = vld [vmem:[%s10420_s9 + $0x80] sm:$0xff]   ;;  %v7891_v53 = vld [vmem:[%s10420_s9 + $0xd8] sm:$0xff]  }
 0x3ee   :  { %v4498_v62 = vmax.f32 %v4411_v56, 0.0  ;;  %v4501_v7 = vpack.c.bf16 %v4497_v58, %v4497_v58  ;;  %v4617_v56 = vld [vmem:[%s10419_s8] sm:$0xf]  ;;  %v7892_v58 = vld [vmem:[%s10420_s9 + $0xd0] sm:$0xff]  }
 0x3ef   :  { %v4626_v59 = vrot.slane %v4617_v56, %v8820_v48  ;;  %v7894_v48 = vld [vmem:[%s10420_s9 + $0xc0] sm:$0xff]  }
 0x3f0   :  { %v4502_v63 = vpack.c.bf16 %v4498_v62, %v4498_v62  ;;  %5662 = vmatpush1.bf16.msra.mxu0 %v7861_v57  ;;  %v4622_v57 = vrot.slane %v4617_v56, %v8811_v45 }
 0x3f1   :  { %5663 = vmatprep.subr.bf16.mxu0 %v7918_v43 }
 0x3f2   :  { %5641 = vmatprep.mubr.bf16.mxu1 %v4502_v63 }
 0x3f3   :  { %5642 = vmatmul.mubr.bf16.vlgmr.msra.gmra.mxu1 %v4501_v7 }
 0x3f4   :  { %5664 = vmatpush1.bf16.msra.mxu0 %v7862_v32  ;;  %6792 = vmatpush3.bf16.msra.mxu1 %v7868_v49  ;;  %v7893_v32 = vld [vmem:[%s10420_s9 + $0xc8] sm:$0xff]  }
 0x3f5   :  { %5673 = vmatprep.subr.bf16.mxu0 %v7918_v43  ;;  %6793 = vmatprep.subr.bf16.mxu1 %v7869_v8 }
 0x3f8   :  { %5674 = vmatpush2.bf16.msra.mxu0 %v7863_v12  ;;  %6794 = vmatpush3.bf16.msra.mxu1 %v7870_v13 }
 0x3f9   :  { %5675 = vmatprep.subr.bf16.mxu0 %v7918_v43  ;;  %6795 = vmatprep.subr.bf16.mxu1 %v7871_v14 }
 0x3fc   :  { %5676 = vmatpush2.bf16.msra.mxu0 %v7864_v35  ;;  %6796 = vmatpush3.bf16.msra.mxu1 %v7872_v15 }
 0x3fd   :  { %5677 = vmatprep.subr.bf16.mxu0 %v7918_v43  ;;  %6797 = vmatprep.subr.bf16.mxu1 %v7873_v16 }
 0x400   :  { %5678 = vmatpush2.bf16.msra.mxu0 %v7865_v17  ;;  %6798 = vmatpush3.bf16.msra.mxu1 %v7874_v18 }
 0x401   :  { %5679 = vmatprep.subr.bf16.mxu0 %v7918_v43  ;;  %6799 = vmatprep.subr.bf16.mxu1 %v7875_v19 }
 0x404   :  { %5680 = vmatpush2.bf16.msra.mxu0 %v7866_v20  ;;  %6800 = vmatpush3.bf16.msra.mxu1 %v7876_v11 }
 0x405   :  { %6801 = vmatprep.subr.bf16.mxu1 %v7877_v21  ;;  %5964 = vmatprep.subr.bf16.mxu0 %v7918_v43 }
 0x408   :  { %6802 = vmatpush3.bf16.msra.mxu1 %v7878_v22 }
 0x409   :  { %6803 = vmatprep.subr.bf16.mxu1 %v7879_v23 }
 0x40c   :  { %6804 = vmatpush3.bf16.msra.mxu1 %v7880_v24 }
 0x40d   :  { %6805 = vmatprep.subr.bf16.mxu1 %v7881_v25  ;;  %v4630_v25 = vrot.slane %v4617_v56, %v9630_v6 }
 0x410   :  { %6806 = vmatpush3.bf16.msra.mxu1 %v7882_v4  ;;  %v4634_v4 = vrot.slane %v4617_v56, %v9636_v51 }
 0x417   :  { %v4490_v26 = vpop.f32.mrf.mxu1 }
 0x419   :  { %v4492_v5 = vpop.f32.mrf.mxu1 }
 0x41b   :  { %v4494_v27 = vpop.f32.mrf.mxu1 }
 0x41d   :  { %v4495_v28 = vpop.f32.mrf.mxu1 }
 0x427   :  { %v4449_v34 = vpop.f32.mrf.mxu0 }
 0x428   :  { %v4450_v9 = vadd.f32 %v4449_v34, %v3761_v31 }
 0x429   :  { %v4451_v3 = vpop.f32.mrf.mxu0 }
 0x42a   :  { %v4491_v36 = vadd.f32 %v4490_v26, %v4450_v9  ;;  %v4452_v37 = vadd.f32 %v4451_v3, %v3765_v33 }
 0x42b   :  { %v4453_v2 = vpop.f32.mrf.mxu0 }
 0x42c   :  { %v4493_v38 = vadd.f32 %v4492_v5, %v4452_v37  ;;  %v4499_v39 = vmax.f32 %v4491_v36, 0.0 }
 0x42d   :  { %v4454_v40 = vpop.f32.mrf.mxu0 }
 0x42e   :  { %v4500_v41 = vmax.f32 %v4493_v38, 0.0  ;;  %v4503_v50 = vpack.c.bf16 %v4499_v39, %v4499_v39  ;;  %v6709_v40 = vld [vmem:[%s10421_s10] ss:$0 sm:$0xff] }
 0x430   :  { %v4504_v44 = vpack.c.bf16 %v4500_v41, %v4500_v41 }
 0x432   :  { %6738 = vmatprep.mubr.msk.bf16.mxu0 %vm2599_vm0, %v4504_v44 }
 0x433   :  { %5682 = vmatmul.mubr.bf16.vlgmr.msra.gmra.mxu0 %v4503_v50 }
 0x434   :  { %5965 = vmatpush1.bf16.msra.mxu0 %v7883_v46 }
 0x435   :  { %5966 = vmatprep.subr.bf16.mxu0 %v7918_v43 }
 0x438   :  { %5967 = vmatpush1.bf16.msra.mxu0 %v7884_v10 }
 0x439   :  { %5968 = vmatprep.subr.bf16.mxu0 %v7918_v43 }
 0x43c   :  { %5969 = vmatpush1.bf16.msra.mxu0 %v7885_v52 }
 0x43d   :  { %5970 = vmatprep.subr.bf16.mxu0 %v7918_v43 }
 0x440   :  { %5971 = vmatpush1.bf16.msra.mxu0 %v7886_v30 }
 0x441   :  { %5972 = vmatprep.subr.bf16.mxu0 %v7918_v43 }
 0x444   :  { %5973 = vmatpush1.bf16.msra.mxu0 %v7887_v47 }
 0x445   :  { %5974 = vmatprep.subr.bf16.mxu0 %v7918_v43 }
 0x448   :  { %5975 = vmatpush1.bf16.msra.mxu0 %v7888_v54 }
 0x449   :  { %5976 = vmatprep.subr.bf16.mxu0 %v7918_v43 }
 0x44c   :  { %5977 = vmatpush1.bf16.msra.mxu0 %v7889_v55 }
 0x44d   :  { %5978 = vmatprep.subr.bf16.mxu0 %v7918_v43 }
 0x450   :  { %5979 = vmatpush1.bf16.msra.mxu0 %v7890_v29 }
 0x451   :  { %5988 = vmatprep.subr.bf16.mxu0 %v7918_v43 }
 0x454   :  { %5989 = vmatpush2.bf16.msra.mxu0 %v7891_v53 }
 0x455   :  { %5990 = vmatprep.subr.bf16.mxu0 %v7918_v43 }
 0x457   :  { %v5233_v60 = vpop.f32.mrf.mxu1  ;;  %v5274_v62 = vpop.f32.mrf.mxu0 }
 0x458   :  { %v5234_v63 = vadd.f32 %v5233_v60, %v4622_v57  ;;  %5991 = vmatpush2.bf16.msra.mxu0 %v7892_v58 }
 0x459   :  { %v5235_v49 = vpop.f32.mrf.mxu1  ;;  %v5276_v7 = vpop.f32.mrf.mxu0  ;;  %5992 = vmatprep.subr.bf16.mxu0 %v7918_v43 }
 0x45a   :  { %v5275_v45 = vadd.f32 %v5274_v62, %v5234_v63  ;;  %v5236_v8 = vadd.f32 %v5235_v49, %v4626_v59 }
 0x45b   :  { %v5237_v12 = vpop.f32.mrf.mxu1  ;;  %v5278_v13 = vpop.f32.mrf.mxu0 }
 0x45c   :  { %v5363_v14 = vmax.f32 %v5275_v45, 0.0  ;;  %v5277_v35 = vadd.f32 %v5276_v7, %v5236_v8  ;;  %5993 = vmatpush2.bf16.msra.mxu0 %v7893_v32 }
 0x45d   :  { %v5238_v15 = vpop.f32.mrf.mxu1  ;;  %v5279_v16 = vpop.f32.mrf.mxu0  ;;  %5994 = vmatprep.subr.bf16.mxu0 %v7918_v43 }
 0x45e   :  { %v5364_v17 = vmax.f32 %v5277_v35, 0.0  ;;  %v5367_v18 = vadd.f32 %v5363_v14, %v9642_v61 }
 0x460   :  { %v5368_v19 = vadd.f32 %v5364_v17, %v9646_v0  ;;  %5995 = vmatpush2.bf16.msra.mxu0 %v7894_v48  ;;  %v5371_v11 = vpack.c.bf16 %v5367_v18, %v5367_v18 }
 0x462   :  { %v5372_v20 = vpack.c.bf16 %v5368_v19, %v5368_v19 }
 0x464   :  { %5956 = vmatprep.mubr.bf16.mxu1 %v5372_v20 }
 0x465   :  { %5957 = vmatmul.mubr.bf16.vlgmr.msra.gmra.mxu1 %v5371_v11 }
 0x488   :  { %v5356_v21 = vpop.f32.mrf.mxu1 }
 0x48a   :  { %v5358_v22 = vpop.f32.mrf.mxu1 }
 0x48c   :  { %v5360_v23 = vpop.f32.mrf.mxu1 }
 0x48e   :  { %v5361_v24 = vpop.f32.mrf.mxu1 }
 0x497   :  { %v5315_v26 = vpop.f32.mrf.mxu0 }
 0x498   :  { %v5316_v43 = vadd.f32 %v5315_v26, %v4630_v25 }
 0x499   :  { %v5317_v5 = vpop.f32.mrf.mxu0 }
 0x49a   :  { %v5357_v27 = vadd.f32 %v5356_v21, %v5316_v43  ;;  %v5318_v61 = vadd.f32 %v5317_v5, %v4634_v4 }
 0x49b   :  { %v5319_v28 = vpop.f32.mrf.mxu0 }
 0x49c   :  { %v5365_v0 = vmax.f32 %v5357_v27, 0.0  ;;  %v5359_v31 = vadd.f32 %v5358_v22, %v5318_v61 }
 0x49d   :  { %v5320_v33 = vpop.f32.mrf.mxu0 }
 0x49e   :  { %v5366_v34 = vmax.f32 %v5359_v31, 0.0  ;;  %v5369_v9 = vadd.f32 %v5365_v0, %v9644_v42 }
 0x4a0   :  { %v5370_v3 = vadd.f32 %v5366_v34, %v9648_v1  ;;  %v5373_v37 = vpack.c.bf16 %v5369_v9, %v5369_v9 }
 0x4a2   :  { %v5374_v36 = vpack.c.bf16 %v5370_v3, %v5370_v3 }
 0x4a4   :  { %6768 = vmatprep.mubr.msk.bf16.mxu0 %vm2599_vm0, %v5374_v36 }
 0x4a5   :  { %5997 = vmatmul.mubr.bf16.vlgmr.msra.gmra.mxu0 %v5373_v37 }
 0x4b3   :  { %v6785_v6 = vpop.f32.mrf.mxu1 }
 0x4b5   :  { %v6786_v51 = vpop.f32.mrf.mxu1 }
 0x4b6   :  { %v6787_v39 = vadd.f32 %v6786_v51, %v6785_v6 }
 0x4b7   :  { %v6788_v2 = vpop.f32.mrf.mxu1 }
 0x4b8   :  { %v5644_v41 = vadd.f32 %v6787_v39, %v6709_v40 }
 0x4b9   :  { %v6789_v38 = vpop.f32.mrf.mxu1 }
 0x4f3   :  { %v5683_v42 = vpop.f32.mrf.mxu0 }
 0x4f4   :  { %v5684_v44 = vadd.f32 %v5683_v42, %v5644_v41 }
 0x4f5   :  { %v5685_v1 = vpop.f32.mrf.mxu0 }
 0x4f6   :  { %5689 = vst [vmem:[#allocation2] sm:$0x3] %v5684_v44 }
 0x4f7   :  { %v5686_v46 = vpop.f32.mrf.mxu0 }
 0x4f8   :  { %7906 = shalt.err (!%p7903_p4)
}
 0x4f9   :  { %6014 = dma.vmem_to_hbm [thread:$0]  %s6012_s5, 32, %s10422_s11, [#allocation3]   ;;  %v5687_v50 = vpop.f32.mrf.mxu0 }
 0x525   :  { %v6807_v10 = vpop.f32.mrf.mxu1 }
 0x527   :  { %v6808_v52 = vpop.f32.mrf.mxu1 }
 0x528   :  { %v6809_v54 = vadd.f32 %v6808_v52, %v6807_v10 }
 0x529   :  { %v6810_v30 = vpop.f32.mrf.mxu1 }
 0x52a   :  { %v5959_v55 = vadd.f32 %v6809_v54, %v6709_v40 }
 0x52b   :  { %v6811_v47 = vpop.f32.mrf.mxu1 }
 0x565   :  { %v5998_v29 = vpop.f32.mrf.mxu0 }
 0x566   :  { %v5999_v53 = vadd.f32 %v5998_v29, %v5959_v55 }
 0x567   :  { %v6000_v56 = vpop.f32.mrf.mxu0 }
 0x568   :  { %6004 = vst [vmem:[%s10423_s12] sm:$0x3] %v5999_v53 }
 0x569   :  { %v6001_v57 = vpop.f32.mrf.mxu0 }
 0x56b   :  { %v6002_v58 = vpop.f32.mrf.mxu0 }
 0x56c   :  { %7915 = dma.done.wait [#allocation3], 32  }
 0x56d   :  { %7916 = vsyncadd [#allocation3], 4294967264 }
 0x56e   :  { %6022 = vsyncpa [#allocation3], 1 }

</bundles_post_ra>
